<compile_context>
chip_gen: v6e
topology: v6e:2x2x1
jax: 0.10.0
libtpu: 0.0.40
codegen_flags: <defaults>
</compile_context>

<pallas_src>
import jax
import jax.numpy as jnp
from jax import lax
from jax.experimental import pallas as pl
from jax.experimental.pallas import tpu as pltpu

EPS = 1e-5  # nn.BatchNorm2d default eps


def _make_kernel(B, H, W, C):
    HW = H * W
    BHW = B * HW
    inv_n = 1.0 / float(BHW)
    inv_hw = 1.0 / float(HW)
    OFFSETS = [(ky - 1, kx - 1) for ky in range(3) for kx in range(3)]  # raster order

    def kernel(xin_ref, yy_ref, xx_ref,
               w1_ref, g1_ref, b1_ref,
               w2_ref, g2_ref, b2_ref,
               f1_ref, f2_ref,
               out_ref):
        # ---- assemble channels-major activation slab (C, BHW) via lane-aligned copies
        xres = jnp.concatenate([xin_ref[b] for b in range(B)], axis=1)   # (C, BHW) f32

        # ---- border-validity masks for the 8 non-center 3x3 taps (shared by both convs)
        yy = yy_ref[...]                                                  # (1, BHW) i32
        xx = xx_ref[...]
        masks = {}
        for dy, dx in OFFSETS:
            if dy == 0 and dx == 0:
                continue
            masks[(dy, dx)] = ((yy + dy >= 0) & (yy + dy < H) &
                               (xx + dx >= 0) & (xx + dx < W))

        def im2col(act_f32):
            """(C, BHW) f32 -> (9*C, BHW) bf16 patch slab via XLU lane rolls.

            Rolls wrap across sample boundaries, but every wrapped position is
            also zeroed by the y/x border mask, so the slab is exact.
            """
            rows = []
            for dy, dx in OFFSETS:
                if dy == 0 and dx == 0:
                    rows.append(act_f32.astype(jnp.bfloat16))
                    continue
                off = dy * W + dx
                shifted = pltpu.roll(act_f32, (-off) % BHW, axis=1)
                rows.append(jnp.where(masks[(dy, dx)], shifted, 0.0)
                            .astype(jnp.bfloat16))
            return jnp.concatenate(rows, axis=0)                          # (9C, BHW) bf16

        def folded_bn(acc, g_ref, b_ref):
            """Training-mode batch norm (biased var), folded into one per-channel FMA."""
            s = jnp.sum(acc, axis=1, keepdims=True)
            q = jnp.sum(acc * acc, axis=1, keepdims=True)
            mu = s * inv_n
            var = q * inv_n - mu * mu
            sc = g_ref[...] * lax.rsqrt(var + EPS)
            sh = b_ref[...] - mu * sc
            return acc * sc + sh

        # ---- conv1 (single im2col matmul, bf16 operands, f32 acc) + bn1 + relu
        acc1 = jnp.dot(w1_ref[...], im2col(xres), preferred_element_type=jnp.float32)
        out1 = jnp.maximum(folded_bn(acc1, g1_ref, b1_ref), 0.0)          # (C, BHW) f32

        # ---- conv2 + bn2 (no relu yet)
        acc2 = jnp.dot(w2_ref[...], im2col(out1), preferred_element_type=jnp.float32)
        out2 = folded_bn(acc2, g2_ref, b2_ref)                            # (C, BHW) f32

        # ---- SE: per-sample global avg pool (lane-aligned static slices) -> fc stack
        pools = [jnp.sum(out2[:, b * HW:(b + 1) * HW], axis=1, keepdims=True) * inv_hw
                 for b in range(B)]
        y = jnp.concatenate(pools, axis=1).astype(jnp.bfloat16)           # (C, B)
        h = jnp.maximum(
            jnp.dot(f1_ref[...], y, preferred_element_type=jnp.float32), 0.0)
        se = jax.nn.sigmoid(
            jnp.dot(f2_ref[...], h.astype(jnp.bfloat16),
                    preferred_element_type=jnp.float32))                  # (C, B) f32

        # ---- SE rescale + residual add + relu, fused into per-sample (B, C, HW) stores
        for b in range(B):
            o2b = out2[:, b * HW:(b + 1) * HW]                            # (C, HW)
            out_ref[b] = jnp.maximum(o2b * se[:, b:b + 1] + xin_ref[b], 0.0)

    return kernel


def se_basic_block(x_nchw, params):
    """x_nchw: (B, C, H, W) float32, PyTorch layout. Returns (B, C, H, W)."""
    B, Cin, H, W = x_nchw.shape
    C = params['w1'].shape[0]
    assert Cin == C, "downsample=None requires inplanes == planes"
    HW, BHW = H * W, B * H * W
    # per-sample lane blocks / lane-dense stores require HW to be a lane-tile multiple
    assert HW % 128 == 0, "this kernel variant requires H*W to be a multiple of 128"

    xin = x_nchw.astype(jnp.float32).reshape(B, C, HW)   # free reshape, no transpose

    # flat (y, x) coordinates per pixel, tiled over the batch (shared conv border masks)
    ys = jnp.arange(H, dtype=jnp.int32)
    xs = jnp.arange(W, dtype=jnp.int32)
    yy = jnp.tile(jnp.repeat(ys, W), B).reshape(1, BHW)
    xx = jnp.tile(xs, B * H).reshape(1, BHW)

    # conv weights (Cout, Cin, 3, 3) -> (Cout, 9*Cin), (ky,kx)-major / cin-minor, bf16
    w1m = jnp.transpose(params['w1'], (0, 2, 3, 1)).reshape(C, 9 * C).astype(jnp.bfloat16)
    w2m = jnp.transpose(params['w2'], (0, 2, 3, 1)).reshape(C, 9 * C).astype(jnp.bfloat16)
    g1 = params['bn1_gamma'].reshape(C, 1).astype(jnp.float32)
    b1 = params['bn1_beta'].reshape(C, 1).astype(jnp.float32)
    g2 = params['bn2_gamma'].reshape(C, 1).astype(jnp.float32)
    b2 = params['bn2_beta'].reshape(C, 1).astype(jnp.float32)
    f1 = params['fc1'].astype(jnp.bfloat16)     # (hidden, C): h = fc1 @ y
    f2 = params['fc2'].astype(jnp.bfloat16)     # (C, hidden): s = fc2 @ h

    vmem = pl.BlockSpec(memory_space=pltpu.MemorySpace.VMEM)
    kernel = _make_kernel(B, H, W, C)
    out = pl.pallas_call(
        kernel,
        out_shape=jax.ShapeDtypeStruct((B, C, HW), jnp.float32),
        in_specs=[vmem] * 11,
        out_specs=vmem,
        compiler_params=pltpu.CompilerParams(vmem_limit_bytes=32 * 1024 * 1024),
    )(xin, yy, xx, w1m, g1, b1, w2m, g2, b2, f1, f2)

    return out.reshape(B, C, H, W)               # free reshape, no transpose


def ref_forward(x, p):
    """Pure-JAX reference reproducing the PyTorch forward (NCHW, f32)."""
    def conv(x, w):
        return lax.conv_general_dilated(
            x, w, window_strides=(1, 1), padding=((1, 1), (1, 1)),
            dimension_numbers=('NCHW', 'OIHW', 'NCHW'),
            precision=lax.Precision.HIGHEST)

    def bn(x, g, b):
        mu = jnp.mean(x, axis=(0, 2, 3), keepdims=True)
        var = jnp.mean((x - mu) ** 2, axis=(0, 2, 3), keepdims=True)
        return ((x - mu) * lax.rsqrt(var + EPS) * g.reshape(1, -1, 1, 1)
                + b.reshape(1, -1, 1, 1))

    out = jax.nn.relu(bn(conv(x, p['w1']), p['bn1_gamma'], p['bn1_beta']))
    out = bn(conv(out, p['w2']), p['bn2_gamma'], p['bn2_beta'])
    y = jnp.mean(out, axis=(2, 3))
    y = jax.nn.relu(jnp.dot(y, p['fc1'].T, precision=lax.Precision.HIGHEST))
    y = jax.nn.sigmoid(jnp.dot(y, p['fc2'].T, precision=lax.Precision.HIGHEST))
    out = out * y[:, :, None, None]
    return jax.nn.relu(out + x)


if __name__ == "__main__":
    B, C, H, W = 2, 32, 16, 16        # inplanes = planes = 32, stride = 1
    reduction = 8
    hidden = C // reduction

    key = jax.random.PRNGKey(0)
    ks = jax.random.split(key, 9)
    params = {
        'w1':        0.1 * jax.random.normal(ks[0], (C, C, 3, 3), jnp.float32),
        'bn1_gamma': 1.0 + 0.1 * jax.random.normal(ks[1], (C,), jnp.float32),
        'bn1_beta':  0.1 * jax.random.normal(ks[2], (C,), jnp.float32),
        'w2':        0.1 * jax.random.normal(ks[3], (C, C, 3, 3), jnp.float32),
        'bn2_gamma': 1.0 + 0.1 * jax.random.normal(ks[4], (C,), jnp.float32),
        'bn2_beta':  0.1 * jax.random.normal(ks[5], (C,), jnp.float32),
        # SE fc weights: Linear(C, C//r, bias=False), Linear(C//r, C, bias=False)
        'fc1':       0.2 * jax.random.normal(ks[6], (hidden, C), jnp.float32),
        'fc2':       0.2 * jax.random.normal(ks[7], (C, hidden), jnp.float32),
    }
    x = jax.random.normal(ks[8], (B, C, H, W), jnp.float32)

    out = se_basic_block(x, params)
    out = jax.block_until_ready(out)

    ref = ref_forward(x, params)
    err = float(jnp.max(jnp.abs(out - ref)))
    assert out.shape == (B, C, H, W)
    # Tolerance accounts for bf16 MXU operands (f32 accumulation) vs the f32 reference.
    assert err < 2.5e-2, f"max abs err {err}"
    print("KERNEL_OK")
</pallas_src>

<mosaic_0001>
module attributes {stable_mosaic.version = 11 : i64} {
  func.func @kernel(%arg0: memref<2x32x256xf32, #tpu.memory_space<vmem>>, %arg1: memref<1x512xi32, #tpu.memory_space<vmem>>, %arg2: memref<1x512xi32, #tpu.memory_space<vmem>>, %arg3: memref<32x288xbf16, #tpu.memory_space<vmem>>, %arg4: memref<32x1xf32, #tpu.memory_space<vmem>>, %arg5: memref<32x1xf32, #tpu.memory_space<vmem>>, %arg6: memref<32x288xbf16, #tpu.memory_space<vmem>>, %arg7: memref<32x1xf32, #tpu.memory_space<vmem>>, %arg8: memref<32x1xf32, #tpu.memory_space<vmem>>, %arg9: memref<4x32xbf16, #tpu.memory_space<vmem>>, %arg10: memref<32x4xbf16, #tpu.memory_space<vmem>>, %arg11: memref<2x32x256xf32, #tpu.memory_space<vmem>>) attributes {dimension_semantics = [], scalar_prefetch = 0 : i64, scratch_operands = 0 : i64, tpu.core_type = #tpu.core_type<tc>} {
    %c0 = arith.constant 0 : index
    %c0_0 = arith.constant 0 : index
    %c0_1 = arith.constant 0 : index
    %0 = vector.load %arg0[%c0, %c0_0, %c0_1] : memref<2x32x256xf32, #tpu.memory_space<vmem>>, vector<1x32x256xf32>
    %1 = vector.shape_cast %0 : vector<1x32x256xf32> to vector<32x256xf32>
    %c1 = arith.constant 1 : index
    %c0_2 = arith.constant 0 : index
    %c0_3 = arith.constant 0 : index
    %2 = vector.load %arg0[%c1, %c0_2, %c0_3] : memref<2x32x256xf32, #tpu.memory_space<vmem>>, vector<1x32x256xf32>
    %3 = vector.shape_cast %2 : vector<1x32x256xf32> to vector<32x256xf32>
    %4 = tpu.concatenate %1, %3 in 1 : vector<32x256xf32>, vector<32x256xf32> -> vector<32x512xf32>
    %c0_4 = arith.constant 0 : index
    %c0_5 = arith.constant 0 : index
    %5 = vector.load %arg1[%c0_4, %c0_5] : memref<1x512xi32, #tpu.memory_space<vmem>>, vector<1x512xi32>
    %c0_6 = arith.constant 0 : index
    %c0_7 = arith.constant 0 : index
    %6 = vector.load %arg2[%c0_6, %c0_7] : memref<1x512xi32, #tpu.memory_space<vmem>>, vector<1x512xi32>
    %c-1_i32 = arith.constant -1 : i32
    %7 = vector.broadcast %c-1_i32 : i32 to vector<1x512xi32>
    %8 = arith.addi %5, %7 : vector<1x512xi32>
    %c0_i32 = arith.constant 0 : i32
    %9 = vector.broadcast %c0_i32 : i32 to vector<1x512xi32>
    %10 = arith.cmpi sge, %8, %9 : vector<1x512xi32>
    %c-1_i32_8 = arith.constant -1 : i32
    %11 = vector.broadcast %c-1_i32_8 : i32 to vector<1x512xi32>
    %12 = arith.addi %5, %11 : vector<1x512xi32>
    %c16_i32 = arith.constant 16 : i32
    %13 = vector.broadcast %c16_i32 : i32 to vector<1x512xi32>
    %14 = arith.cmpi slt, %12, %13 : vector<1x512xi32>
    %15 = arith.andi %10, %14 : vector<1x512xi1>
    %c-1_i32_9 = arith.constant -1 : i32
    %16 = vector.broadcast %c-1_i32_9 : i32 to vector<1x512xi32>
    %17 = arith.addi %6, %16 : vector<1x512xi32>
    %c0_i32_10 = arith.constant 0 : i32
    %18 = vector.broadcast %c0_i32_10 : i32 to vector<1x512xi32>
    %19 = arith.cmpi sge, %17, %18 : vector<1x512xi32>
    %20 = arith.andi %15, %19 : vector<1x512xi1>
    %c-1_i32_11 = arith.constant -1 : i32
    %21 = vector.broadcast %c-1_i32_11 : i32 to vector<1x512xi32>
    %22 = arith.addi %6, %21 : vector<1x512xi32>
    %c16_i32_12 = arith.constant 16 : i32
    %23 = vector.broadcast %c16_i32_12 : i32 to vector<1x512xi32>
    %24 = arith.cmpi slt, %22, %23 : vector<1x512xi32>
    %25 = arith.andi %20, %24 : vector<1x512xi1>
    %c-1_i32_13 = arith.constant -1 : i32
    %26 = vector.broadcast %c-1_i32_13 : i32 to vector<1x512xi32>
    %27 = arith.addi %5, %26 : vector<1x512xi32>
    %c0_i32_14 = arith.constant 0 : i32
    %28 = vector.broadcast %c0_i32_14 : i32 to vector<1x512xi32>
    %29 = arith.cmpi sge, %27, %28 : vector<1x512xi32>
    %c-1_i32_15 = arith.constant -1 : i32
    %30 = vector.broadcast %c-1_i32_15 : i32 to vector<1x512xi32>
    %31 = arith.addi %5, %30 : vector<1x512xi32>
    %c16_i32_16 = arith.constant 16 : i32
    %32 = vector.broadcast %c16_i32_16 : i32 to vector<1x512xi32>
    %33 = arith.cmpi slt, %31, %32 : vector<1x512xi32>
    %34 = arith.andi %29, %33 : vector<1x512xi1>
    %c0_i32_17 = arith.constant 0 : i32
    %35 = vector.broadcast %c0_i32_17 : i32 to vector<1x512xi32>
    %36 = arith.addi %6, %35 : vector<1x512xi32>
    %c0_i32_18 = arith.constant 0 : i32
    %37 = vector.broadcast %c0_i32_18 : i32 to vector<1x512xi32>
    %38 = arith.cmpi sge, %36, %37 : vector<1x512xi32>
    %39 = arith.andi %34, %38 : vector<1x512xi1>
    %c0_i32_19 = arith.constant 0 : i32
    %40 = vector.broadcast %c0_i32_19 : i32 to vector<1x512xi32>
    %41 = arith.addi %6, %40 : vector<1x512xi32>
    %c16_i32_20 = arith.constant 16 : i32
    %42 = vector.broadcast %c16_i32_20 : i32 to vector<1x512xi32>
    %43 = arith.cmpi slt, %41, %42 : vector<1x512xi32>
    %44 = arith.andi %39, %43 : vector<1x512xi1>
    %c-1_i32_21 = arith.constant -1 : i32
    %45 = vector.broadcast %c-1_i32_21 : i32 to vector<1x512xi32>
    %46 = arith.addi %5, %45 : vector<1x512xi32>
    %c0_i32_22 = arith.constant 0 : i32
    %47 = vector.broadcast %c0_i32_22 : i32 to vector<1x512xi32>
    %48 = arith.cmpi sge, %46, %47 : vector<1x512xi32>
    %c-1_i32_23 = arith.constant -1 : i32
    %49 = vector.broadcast %c-1_i32_23 : i32 to vector<1x512xi32>
    %50 = arith.addi %5, %49 : vector<1x512xi32>
    %c16_i32_24 = arith.constant 16 : i32
    %51 = vector.broadcast %c16_i32_24 : i32 to vector<1x512xi32>
    %52 = arith.cmpi slt, %50, %51 : vector<1x512xi32>
    %53 = arith.andi %48, %52 : vector<1x512xi1>
    %c1_i32 = arith.constant 1 : i32
    %54 = vector.broadcast %c1_i32 : i32 to vector<1x512xi32>
    %55 = arith.addi %6, %54 : vector<1x512xi32>
    %c0_i32_25 = arith.constant 0 : i32
    %56 = vector.broadcast %c0_i32_25 : i32 to vector<1x512xi32>
    %57 = arith.cmpi sge, %55, %56 : vector<1x512xi32>
    %58 = arith.andi %53, %57 : vector<1x512xi1>
    %c1_i32_26 = arith.constant 1 : i32
    %59 = vector.broadcast %c1_i32_26 : i32 to vector<1x512xi32>
    %60 = arith.addi %6, %59 : vector<1x512xi32>
    %c16_i32_27 = arith.constant 16 : i32
    %61 = vector.broadcast %c16_i32_27 : i32 to vector<1x512xi32>
    %62 = arith.cmpi slt, %60, %61 : vector<1x512xi32>
    %63 = arith.andi %58, %62 : vector<1x512xi1>
    %c0_i32_28 = arith.constant 0 : i32
    %64 = vector.broadcast %c0_i32_28 : i32 to vector<1x512xi32>
    %65 = arith.addi %5, %64 : vector<1x512xi32>
    %c0_i32_29 = arith.constant 0 : i32
    %66 = vector.broadcast %c0_i32_29 : i32 to vector<1x512xi32>
    %67 = arith.cmpi sge, %65, %66 : vector<1x512xi32>
    %c0_i32_30 = arith.constant 0 : i32
    %68 = vector.broadcast %c0_i32_30 : i32 to vector<1x512xi32>
    %69 = arith.addi %5, %68 : vector<1x512xi32>
    %c16_i32_31 = arith.constant 16 : i32
    %70 = vector.broadcast %c16_i32_31 : i32 to vector<1x512xi32>
    %71 = arith.cmpi slt, %69, %70 : vector<1x512xi32>
    %72 = arith.andi %67, %71 : vector<1x512xi1>
    %c-1_i32_32 = arith.constant -1 : i32
    %73 = vector.broadcast %c-1_i32_32 : i32 to vector<1x512xi32>
    %74 = arith.addi %6, %73 : vector<1x512xi32>
    %c0_i32_33 = arith.constant 0 : i32
    %75 = vector.broadcast %c0_i32_33 : i32 to vector<1x512xi32>
    %76 = arith.cmpi sge, %74, %75 : vector<1x512xi32>
    %77 = arith.andi %72, %76 : vector<1x512xi1>
    %c-1_i32_34 = arith.constant -1 : i32
    %78 = vector.broadcast %c-1_i32_34 : i32 to vector<1x512xi32>
    %79 = arith.addi %6, %78 : vector<1x512xi32>
    %c16_i32_35 = arith.constant 16 : i32
    %80 = vector.broadcast %c16_i32_35 : i32 to vector<1x512xi32>
    %81 = arith.cmpi slt, %79, %80 : vector<1x512xi32>
    %82 = arith.andi %77, %81 : vector<1x512xi1>
    %c0_i32_36 = arith.constant 0 : i32
    %83 = vector.broadcast %c0_i32_36 : i32 to vector<1x512xi32>
    %84 = arith.addi %5, %83 : vector<1x512xi32>
    %c0_i32_37 = arith.constant 0 : i32
    %85 = vector.broadcast %c0_i32_37 : i32 to vector<1x512xi32>
    %86 = arith.cmpi sge, %84, %85 : vector<1x512xi32>
    %c0_i32_38 = arith.constant 0 : i32
    %87 = vector.broadcast %c0_i32_38 : i32 to vector<1x512xi32>
    %88 = arith.addi %5, %87 : vector<1x512xi32>
    %c16_i32_39 = arith.constant 16 : i32
    %89 = vector.broadcast %c16_i32_39 : i32 to vector<1x512xi32>
    %90 = arith.cmpi slt, %88, %89 : vector<1x512xi32>
    %91 = arith.andi %86, %90 : vector<1x512xi1>
    %c1_i32_40 = arith.constant 1 : i32
    %92 = vector.broadcast %c1_i32_40 : i32 to vector<1x512xi32>
    %93 = arith.addi %6, %92 : vector<1x512xi32>
    %c0_i32_41 = arith.constant 0 : i32
    %94 = vector.broadcast %c0_i32_41 : i32 to vector<1x512xi32>
    %95 = arith.cmpi sge, %93, %94 : vector<1x512xi32>
    %96 = arith.andi %91, %95 : vector<1x512xi1>
    %c1_i32_42 = arith.constant 1 : i32
    %97 = vector.broadcast %c1_i32_42 : i32 to vector<1x512xi32>
    %98 = arith.addi %6, %97 : vector<1x512xi32>
    %c16_i32_43 = arith.constant 16 : i32
    %99 = vector.broadcast %c16_i32_43 : i32 to vector<1x512xi32>
    %100 = arith.cmpi slt, %98, %99 : vector<1x512xi32>
    %101 = arith.andi %96, %100 : vector<1x512xi1>
    %c1_i32_44 = arith.constant 1 : i32
    %102 = vector.broadcast %c1_i32_44 : i32 to vector<1x512xi32>
    %103 = arith.addi %5, %102 : vector<1x512xi32>
    %c0_i32_45 = arith.constant 0 : i32
    %104 = vector.broadcast %c0_i32_45 : i32 to vector<1x512xi32>
    %105 = arith.cmpi sge, %103, %104 : vector<1x512xi32>
    %c1_i32_46 = arith.constant 1 : i32
    %106 = vector.broadcast %c1_i32_46 : i32 to vector<1x512xi32>
    %107 = arith.addi %5, %106 : vector<1x512xi32>
    %c16_i32_47 = arith.constant 16 : i32
    %108 = vector.broadcast %c16_i32_47 : i32 to vector<1x512xi32>
    %109 = arith.cmpi slt, %107, %108 : vector<1x512xi32>
    %110 = arith.andi %105, %109 : vector<1x512xi1>
    %c-1_i32_48 = arith.constant -1 : i32
    %111 = vector.broadcast %c-1_i32_48 : i32 to vector<1x512xi32>
    %112 = arith.addi %6, %111 : vector<1x512xi32>
    %c0_i32_49 = arith.constant 0 : i32
    %113 = vector.broadcast %c0_i32_49 : i32 to vector<1x512xi32>
    %114 = arith.cmpi sge, %112, %113 : vector<1x512xi32>
    %115 = arith.andi %110, %114 : vector<1x512xi1>
    %c-1_i32_50 = arith.constant -1 : i32
    %116 = vector.broadcast %c-1_i32_50 : i32 to vector<1x512xi32>
    %117 = arith.addi %6, %116 : vector<1x512xi32>
    %c16_i32_51 = arith.constant 16 : i32
    %118 = vector.broadcast %c16_i32_51 : i32 to vector<1x512xi32>
    %119 = arith.cmpi slt, %117, %118 : vector<1x512xi32>
    %120 = arith.andi %115, %119 : vector<1x512xi1>
    %c1_i32_52 = arith.constant 1 : i32
    %121 = vector.broadcast %c1_i32_52 : i32 to vector<1x512xi32>
    %122 = arith.addi %5, %121 : vector<1x512xi32>
    %c0_i32_53 = arith.constant 0 : i32
    %123 = vector.broadcast %c0_i32_53 : i32 to vector<1x512xi32>
    %124 = arith.cmpi sge, %122, %123 : vector<1x512xi32>
    %c1_i32_54 = arith.constant 1 : i32
    %125 = vector.broadcast %c1_i32_54 : i32 to vector<1x512xi32>
    %126 = arith.addi %5, %125 : vector<1x512xi32>
    %c16_i32_55 = arith.constant 16 : i32
    %127 = vector.broadcast %c16_i32_55 : i32 to vector<1x512xi32>
    %128 = arith.cmpi slt, %126, %127 : vector<1x512xi32>
    %129 = arith.andi %124, %128 : vector<1x512xi1>
    %c0_i32_56 = arith.constant 0 : i32
    %130 = vector.broadcast %c0_i32_56 : i32 to vector<1x512xi32>
    %131 = arith.addi %6, %130 : vector<1x512xi32>
    %c0_i32_57 = arith.constant 0 : i32
    %132 = vector.broadcast %c0_i32_57 : i32 to vector<1x512xi32>
    %133 = arith.cmpi sge, %131, %132 : vector<1x512xi32>
    %134 = arith.andi %129, %133 : vector<1x512xi1>
    %c0_i32_58 = arith.constant 0 : i32
    %135 = vector.broadcast %c0_i32_58 : i32 to vector<1x512xi32>
    %136 = arith.addi %6, %135 : vector<1x512xi32>
    %c16_i32_59 = arith.constant 16 : i32
    %137 = vector.broadcast %c16_i32_59 : i32 to vector<1x512xi32>
    %138 = arith.cmpi slt, %136, %137 : vector<1x512xi32>
    %139 = arith.andi %134, %138 : vector<1x512xi1>
    %c1_i32_60 = arith.constant 1 : i32
    %140 = vector.broadcast %c1_i32_60 : i32 to vector<1x512xi32>
    %141 = arith.addi %5, %140 : vector<1x512xi32>
    %c0_i32_61 = arith.constant 0 : i32
    %142 = vector.broadcast %c0_i32_61 : i32 to vector<1x512xi32>
    %143 = arith.cmpi sge, %141, %142 : vector<1x512xi32>
    %c1_i32_62 = arith.constant 1 : i32
    %144 = vector.broadcast %c1_i32_62 : i32 to vector<1x512xi32>
    %145 = arith.addi %5, %144 : vector<1x512xi32>
    %c16_i32_63 = arith.constant 16 : i32
    %146 = vector.broadcast %c16_i32_63 : i32 to vector<1x512xi32>
    %147 = arith.cmpi slt, %145, %146 : vector<1x512xi32>
    %148 = arith.andi %143, %147 : vector<1x512xi1>
    %c1_i32_64 = arith.constant 1 : i32
    %149 = vector.broadcast %c1_i32_64 : i32 to vector<1x512xi32>
    %150 = arith.addi %6, %149 : vector<1x512xi32>
    %c0_i32_65 = arith.constant 0 : i32
    %151 = vector.broadcast %c0_i32_65 : i32 to vector<1x512xi32>
    %152 = arith.cmpi sge, %150, %151 : vector<1x512xi32>
    %153 = arith.andi %148, %152 : vector<1x512xi1>
    %c1_i32_66 = arith.constant 1 : i32
    %154 = vector.broadcast %c1_i32_66 : i32 to vector<1x512xi32>
    %155 = arith.addi %6, %154 : vector<1x512xi32>
    %c16_i32_67 = arith.constant 16 : i32
    %156 = vector.broadcast %c16_i32_67 : i32 to vector<1x512xi32>
    %157 = arith.cmpi slt, %155, %156 : vector<1x512xi32>
    %158 = arith.andi %153, %157 : vector<1x512xi1>
    %c0_68 = arith.constant 0 : index
    %c0_69 = arith.constant 0 : index
    %159 = vector.load %arg3[%c0_68, %c0_69] : memref<32x288xbf16, #tpu.memory_space<vmem>>, vector<32x288xbf16>
    %c17_i32 = arith.constant 17 : i32
    %160 = tpu.dynamic_rotate %4 by %c17_i32 dim 1 : vector<32x512xf32>, i32 -> vector<32x512xf32>
    %cst = arith.constant 0.000000e+00 : f32
    %161 = vector.shape_cast %25 : vector<1x512xi1> to vector<1x512xi1>
    %162 = vector.broadcast %161 : vector<1x512xi1> to vector<32x512xi1>
    %163 = vector.broadcast %cst : f32 to vector<32x512xf32>
    %164 = arith.select %162, %160, %163 : vector<32x512xi1>, vector<32x512xf32>
    %165 = arith.truncf %164 : vector<32x512xf32> to vector<32x512xbf16>
    %c16_i32_70 = arith.constant 16 : i32
    %166 = tpu.dynamic_rotate %4 by %c16_i32_70 dim 1 : vector<32x512xf32>, i32 -> vector<32x512xf32>
    %cst_71 = arith.constant 0.000000e+00 : f32
    %167 = vector.shape_cast %44 : vector<1x512xi1> to vector<1x512xi1>
    %168 = vector.broadcast %167 : vector<1x512xi1> to vector<32x512xi1>
    %169 = vector.broadcast %cst_71 : f32 to vector<32x512xf32>
    %170 = arith.select %168, %166, %169 : vector<32x512xi1>, vector<32x512xf32>
    %171 = arith.truncf %170 : vector<32x512xf32> to vector<32x512xbf16>
    %c15_i32 = arith.constant 15 : i32
    %172 = tpu.dynamic_rotate %4 by %c15_i32 dim 1 : vector<32x512xf32>, i32 -> vector<32x512xf32>
    %cst_72 = arith.constant 0.000000e+00 : f32
    %173 = vector.shape_cast %63 : vector<1x512xi1> to vector<1x512xi1>
    %174 = vector.broadcast %173 : vector<1x512xi1> to vector<32x512xi1>
    %175 = vector.broadcast %cst_72 : f32 to vector<32x512xf32>
    %176 = arith.select %174, %172, %175 : vector<32x512xi1>, vector<32x512xf32>
    %177 = arith.truncf %176 : vector<32x512xf32> to vector<32x512xbf16>
    %c1_i32_73 = arith.constant 1 : i32
    %178 = tpu.dynamic_rotate %4 by %c1_i32_73 dim 1 : vector<32x512xf32>, i32 -> vector<32x512xf32>
    %cst_74 = arith.constant 0.000000e+00 : f32
    %179 = vector.shape_cast %82 : vector<1x512xi1> to vector<1x512xi1>
    %180 = vector.broadcast %179 : vector<1x512xi1> to vector<32x512xi1>
    %181 = vector.broadcast %cst_74 : f32 to vector<32x512xf32>
    %182 = arith.select %180, %178, %181 : vector<32x512xi1>, vector<32x512xf32>
    %183 = arith.truncf %182 : vector<32x512xf32> to vector<32x512xbf16>
    %184 = arith.truncf %4 : vector<32x512xf32> to vector<32x512xbf16>
    %c511_i32 = arith.constant 511 : i32
    %185 = tpu.dynamic_rotate %4 by %c511_i32 dim 1 : vector<32x512xf32>, i32 -> vector<32x512xf32>
    %cst_75 = arith.constant 0.000000e+00 : f32
    %186 = vector.shape_cast %101 : vector<1x512xi1> to vector<1x512xi1>
    %187 = vector.broadcast %186 : vector<1x512xi1> to vector<32x512xi1>
    %188 = vector.broadcast %cst_75 : f32 to vector<32x512xf32>
    %189 = arith.select %187, %185, %188 : vector<32x512xi1>, vector<32x512xf32>
    %190 = arith.truncf %189 : vector<32x512xf32> to vector<32x512xbf16>
    %c497_i32 = arith.constant 497 : i32
    %191 = tpu.dynamic_rotate %4 by %c497_i32 dim 1 : vector<32x512xf32>, i32 -> vector<32x512xf32>
    %cst_76 = arith.constant 0.000000e+00 : f32
    %192 = vector.shape_cast %120 : vector<1x512xi1> to vector<1x512xi1>
    %193 = vector.broadcast %192 : vector<1x512xi1> to vector<32x512xi1>
    %194 = vector.broadcast %cst_76 : f32 to vector<32x512xf32>
    %195 = arith.select %193, %191, %194 : vector<32x512xi1>, vector<32x512xf32>
    %196 = arith.truncf %195 : vector<32x512xf32> to vector<32x512xbf16>
    %c496_i32 = arith.constant 496 : i32
    %197 = tpu.dynamic_rotate %4 by %c496_i32 dim 1 : vector<32x512xf32>, i32 -> vector<32x512xf32>
    %cst_77 = arith.constant 0.000000e+00 : f32
    %198 = vector.shape_cast %139 : vector<1x512xi1> to vector<1x512xi1>
    %199 = vector.broadcast %198 : vector<1x512xi1> to vector<32x512xi1>
    %200 = vector.broadcast %cst_77 : f32 to vector<32x512xf32>
    %201 = arith.select %199, %197, %200 : vector<32x512xi1>, vector<32x512xf32>
    %202 = arith.truncf %201 : vector<32x512xf32> to vector<32x512xbf16>
    %c495_i32 = arith.constant 495 : i32
    %203 = tpu.dynamic_rotate %4 by %c495_i32 dim 1 : vector<32x512xf32>, i32 -> vector<32x512xf32>
    %cst_78 = arith.constant 0.000000e+00 : f32
    %204 = vector.shape_cast %158 : vector<1x512xi1> to vector<1x512xi1>
    %205 = vector.broadcast %204 : vector<1x512xi1> to vector<32x512xi1>
    %206 = vector.broadcast %cst_78 : f32 to vector<32x512xf32>
    %207 = arith.select %205, %203, %206 : vector<32x512xi1>, vector<32x512xf32>
    %208 = arith.truncf %207 : vector<32x512xf32> to vector<32x512xbf16>
    %209 = tpu.concatenate %165, %171, %177, %183, %184, %190, %196, %202, %208 in 0 : vector<32x512xbf16>, vector<32x512xbf16>, vector<32x512xbf16>, vector<32x512xbf16>, vector<32x512xbf16>, vector<32x512xbf16>, vector<32x512xbf16>, vector<32x512xbf16>, vector<32x512xbf16> -> vector<288x512xbf16>
    %cst_79 = arith.constant dense<0.000000e+00> : vector<32x512xf32>
    %210 = tpu.matmul %159, %209, %cst_79 {dimension_numbers = #tpu.dot_dimension_numbers<[1], [0], [0], [1], [0, 0, 1, 1], [], []>} : vector<32x288xbf16>, vector<288x512xbf16>, vector<32x512xf32> -> vector<32x512xf32>
    %cst_80 = arith.constant dense<0.000000e+00> : vector<32xf32>
    %211 = vector.multi_reduction <add>, %210, %cst_80 [1] : vector<32x512xf32> to vector<32xf32>
    %212 = vector.shape_cast %211 : vector<32xf32> to vector<32x1xf32>
    %213 = arith.mulf %210, %210 : vector<32x512xf32>
    %cst_81 = arith.constant dense<0.000000e+00> : vector<32xf32>
    %214 = vector.multi_reduction <add>, %213, %cst_81 [1] : vector<32x512xf32> to vector<32xf32>
    %215 = vector.shape_cast %214 : vector<32xf32> to vector<32x1xf32>
    %cst_82 = arith.constant 0.001953125 : f32
    %216 = vector.broadcast %cst_82 : f32 to vector<32x1xf32>
    %217 = arith.mulf %212, %216 : vector<32x1xf32>
    %cst_83 = arith.constant 0.001953125 : f32
    %218 = vector.broadcast %cst_83 : f32 to vector<32x1xf32>
    %219 = arith.mulf %215, %218 : vector<32x1xf32>
    %220 = arith.mulf %217, %217 : vector<32x1xf32>
    %221 = arith.subf %219, %220 : vector<32x1xf32>
    %c0_84 = arith.constant 0 : index
    %c0_85 = arith.constant 0 : index
    %222 = vector.load %arg4[%c0_84, %c0_85] : memref<32x1xf32, #tpu.memory_space<vmem>>, vector<32x1xf32>
    %cst_86 = arith.constant 9.99999974E-6 : f32
    %223 = vector.broadcast %cst_86 : f32 to vector<32x1xf32>
    %224 = arith.addf %221, %223 : vector<32x1xf32>
    %225 = math.rsqrt %224 : vector<32x1xf32>
    %226 = arith.mulf %222, %225 : vector<32x1xf32>
    %c0_87 = arith.constant 0 : index
    %c0_88 = arith.constant 0 : index
    %227 = vector.load %arg5[%c0_87, %c0_88] : memref<32x1xf32, #tpu.memory_space<vmem>>, vector<32x1xf32>
    %228 = arith.mulf %217, %226 : vector<32x1xf32>
    %229 = arith.subf %227, %228 : vector<32x1xf32>
    %230 = vector.broadcast %226 : vector<32x1xf32> to vector<32x512xf32>
    %231 = arith.mulf %210, %230 : vector<32x512xf32>
    %232 = vector.broadcast %229 : vector<32x1xf32> to vector<32x512xf32>
    %233 = arith.addf %231, %232 : vector<32x512xf32>
    %cst_89 = arith.constant 0.000000e+00 : f32
    %234 = vector.broadcast %cst_89 : f32 to vector<32x512xf32>
    %235 = arith.maximumf %233, %234 : vector<32x512xf32>
    %c0_90 = arith.constant 0 : index
    %c0_91 = arith.constant 0 : index
    %236 = vector.load %arg6[%c0_90, %c0_91] : memref<32x288xbf16, #tpu.memory_space<vmem>>, vector<32x288xbf16>
    %c17_i32_92 = arith.constant 17 : i32
    %237 = tpu.dynamic_rotate %235 by %c17_i32_92 dim 1 : vector<32x512xf32>, i32 -> vector<32x512xf32>
    %cst_93 = arith.constant 0.000000e+00 : f32
    %238 = vector.shape_cast %25 : vector<1x512xi1> to vector<1x512xi1>
    %239 = vector.broadcast %238 : vector<1x512xi1> to vector<32x512xi1>
    %240 = vector.broadcast %cst_93 : f32 to vector<32x512xf32>
    %241 = arith.select %239, %237, %240 : vector<32x512xi1>, vector<32x512xf32>
    %242 = arith.truncf %241 : vector<32x512xf32> to vector<32x512xbf16>
    %c16_i32_94 = arith.constant 16 : i32
    %243 = tpu.dynamic_rotate %235 by %c16_i32_94 dim 1 : vector<32x512xf32>, i32 -> vector<32x512xf32>
    %cst_95 = arith.constant 0.000000e+00 : f32
    %244 = vector.shape_cast %44 : vector<1x512xi1> to vector<1x512xi1>
    %245 = vector.broadcast %244 : vector<1x512xi1> to vector<32x512xi1>
    %246 = vector.broadcast %cst_95 : f32 to vector<32x512xf32>
    %247 = arith.select %245, %243, %246 : vector<32x512xi1>, vector<32x512xf32>
    %248 = arith.truncf %247 : vector<32x512xf32> to vector<32x512xbf16>
    %c15_i32_96 = arith.constant 15 : i32
    %249 = tpu.dynamic_rotate %235 by %c15_i32_96 dim 1 : vector<32x512xf32>, i32 -> vector<32x512xf32>
    %cst_97 = arith.constant 0.000000e+00 : f32
    %250 = vector.shape_cast %63 : vector<1x512xi1> to vector<1x512xi1>
    %251 = vector.broadcast %250 : vector<1x512xi1> to vector<32x512xi1>
    %252 = vector.broadcast %cst_97 : f32 to vector<32x512xf32>
    %253 = arith.select %251, %249, %252 : vector<32x512xi1>, vector<32x512xf32>
    %254 = arith.truncf %253 : vector<32x512xf32> to vector<32x512xbf16>
    %c1_i32_98 = arith.constant 1 : i32
    %255 = tpu.dynamic_rotate %235 by %c1_i32_98 dim 1 : vector<32x512xf32>, i32 -> vector<32x512xf32>
    %cst_99 = arith.constant 0.000000e+00 : f32
    %256 = vector.shape_cast %82 : vector<1x512xi1> to vector<1x512xi1>
    %257 = vector.broadcast %256 : vector<1x512xi1> to vector<32x512xi1>
    %258 = vector.broadcast %cst_99 : f32 to vector<32x512xf32>
    %259 = arith.select %257, %255, %258 : vector<32x512xi1>, vector<32x512xf32>
    %260 = arith.truncf %259 : vector<32x512xf32> to vector<32x512xbf16>
    %261 = arith.truncf %235 : vector<32x512xf32> to vector<32x512xbf16>
    %c511_i32_100 = arith.constant 511 : i32
    %262 = tpu.dynamic_rotate %235 by %c511_i32_100 dim 1 : vector<32x512xf32>, i32 -> vector<32x512xf32>
    %cst_101 = arith.constant 0.000000e+00 : f32
    %263 = vector.shape_cast %101 : vector<1x512xi1> to vector<1x512xi1>
    %264 = vector.broadcast %263 : vector<1x512xi1> to vector<32x512xi1>
    %265 = vector.broadcast %cst_101 : f32 to vector<32x512xf32>
    %266 = arith.select %264, %262, %265 : vector<32x512xi1>, vector<32x512xf32>
    %267 = arith.truncf %266 : vector<32x512xf32> to vector<32x512xbf16>
    %c497_i32_102 = arith.constant 497 : i32
    %268 = tpu.dynamic_rotate %235 by %c497_i32_102 dim 1 : vector<32x512xf32>, i32 -> vector<32x512xf32>
    %cst_103 = arith.constant 0.000000e+00 : f32
    %269 = vector.shape_cast %120 : vector<1x512xi1> to vector<1x512xi1>
    %270 = vector.broadcast %269 : vector<1x512xi1> to vector<32x512xi1>
    %271 = vector.broadcast %cst_103 : f32 to vector<32x512xf32>
    %272 = arith.select %270, %268, %271 : vector<32x512xi1>, vector<32x512xf32>
    %273 = arith.truncf %272 : vector<32x512xf32> to vector<32x512xbf16>
    %c496_i32_104 = arith.constant 496 : i32
    %274 = tpu.dynamic_rotate %235 by %c496_i32_104 dim 1 : vector<32x512xf32>, i32 -> vector<32x512xf32>
    %cst_105 = arith.constant 0.000000e+00 : f32
    %275 = vector.shape_cast %139 : vector<1x512xi1> to vector<1x512xi1>
    %276 = vector.broadcast %275 : vector<1x512xi1> to vector<32x512xi1>
    %277 = vector.broadcast %cst_105 : f32 to vector<32x512xf32>
    %278 = arith.select %276, %274, %277 : vector<32x512xi1>, vector<32x512xf32>
    %279 = arith.truncf %278 : vector<32x512xf32> to vector<32x512xbf16>
    %c495_i32_106 = arith.constant 495 : i32
    %280 = tpu.dynamic_rotate %235 by %c495_i32_106 dim 1 : vector<32x512xf32>, i32 -> vector<32x512xf32>
    %cst_107 = arith.constant 0.000000e+00 : f32
    %281 = vector.shape_cast %158 : vector<1x512xi1> to vector<1x512xi1>
    %282 = vector.broadcast %281 : vector<1x512xi1> to vector<32x512xi1>
    %283 = vector.broadcast %cst_107 : f32 to vector<32x512xf32>
    %284 = arith.select %282, %280, %283 : vector<32x512xi1>, vector<32x512xf32>
    %285 = arith.truncf %284 : vector<32x512xf32> to vector<32x512xbf16>
    %286 = tpu.concatenate %242, %248, %254, %260, %261, %267, %273, %279, %285 in 0 : vector<32x512xbf16>, vector<32x512xbf16>, vector<32x512xbf16>, vector<32x512xbf16>, vector<32x512xbf16>, vector<32x512xbf16>, vector<32x512xbf16>, vector<32x512xbf16>, vector<32x512xbf16> -> vector<288x512xbf16>
    %cst_108 = arith.constant dense<0.000000e+00> : vector<32x512xf32>
    %287 = tpu.matmul %236, %286, %cst_108 {dimension_numbers = #tpu.dot_dimension_numbers<[1], [0], [0], [1], [0, 0, 1, 1], [], []>} : vector<32x288xbf16>, vector<288x512xbf16>, vector<32x512xf32> -> vector<32x512xf32>
    %cst_109 = arith.constant dense<0.000000e+00> : vector<32xf32>
    %288 = vector.multi_reduction <add>, %287, %cst_109 [1] : vector<32x512xf32> to vector<32xf32>
    %289 = vector.shape_cast %288 : vector<32xf32> to vector<32x1xf32>
    %290 = arith.mulf %287, %287 : vector<32x512xf32>
    %cst_110 = arith.constant dense<0.000000e+00> : vector<32xf32>
    %291 = vector.multi_reduction <add>, %290, %cst_110 [1] : vector<32x512xf32> to vector<32xf32>
    %292 = vector.shape_cast %291 : vector<32xf32> to vector<32x1xf32>
    %cst_111 = arith.constant 0.001953125 : f32
    %293 = vector.broadcast %cst_111 : f32 to vector<32x1xf32>
    %294 = arith.mulf %289, %293 : vector<32x1xf32>
    %cst_112 = arith.constant 0.001953125 : f32
    %295 = vector.broadcast %cst_112 : f32 to vector<32x1xf32>
    %296 = arith.mulf %292, %295 : vector<32x1xf32>
    %297 = arith.mulf %294, %294 : vector<32x1xf32>
    %298 = arith.subf %296, %297 : vector<32x1xf32>
    %c0_113 = arith.constant 0 : index
    %c0_114 = arith.constant 0 : index
    %299 = vector.load %arg7[%c0_113, %c0_114] : memref<32x1xf32, #tpu.memory_space<vmem>>, vector<32x1xf32>
    %cst_115 = arith.constant 9.99999974E-6 : f32
    %300 = vector.broadcast %cst_115 : f32 to vector<32x1xf32>
    %301 = arith.addf %298, %300 : vector<32x1xf32>
    %302 = math.rsqrt %301 : vector<32x1xf32>
    %303 = arith.mulf %299, %302 : vector<32x1xf32>
    %c0_116 = arith.constant 0 : index
    %c0_117 = arith.constant 0 : index
    %304 = vector.load %arg8[%c0_116, %c0_117] : memref<32x1xf32, #tpu.memory_space<vmem>>, vector<32x1xf32>
    %305 = arith.mulf %294, %303 : vector<32x1xf32>
    %306 = arith.subf %304, %305 : vector<32x1xf32>
    %307 = vector.broadcast %303 : vector<32x1xf32> to vector<32x512xf32>
    %308 = arith.mulf %287, %307 : vector<32x512xf32>
    %309 = vector.broadcast %306 : vector<32x1xf32> to vector<32x512xf32>
    %310 = arith.addf %308, %309 : vector<32x512xf32>
    %311 = vector.extract_strided_slice %310 {offsets = [0, 0], sizes = [32, 256], strides = [1, 1]} : vector<32x512xf32> to vector<32x256xf32>
    %cst_118 = arith.constant dense<0.000000e+00> : vector<32xf32>
    %312 = vector.multi_reduction <add>, %311, %cst_118 [1] : vector<32x256xf32> to vector<32xf32>
    %313 = vector.shape_cast %312 : vector<32xf32> to vector<32x1xf32>
    %cst_119 = arith.constant 3.906250e-03 : f32
    %314 = vector.broadcast %cst_119 : f32 to vector<32x1xf32>
    %315 = arith.mulf %313, %314 : vector<32x1xf32>
    %316 = vector.extract_strided_slice %310 {offsets = [0, 256], sizes = [32, 256], strides = [1, 1]} : vector<32x512xf32> to vector<32x256xf32>
    %cst_120 = arith.constant dense<0.000000e+00> : vector<32xf32>
    %317 = vector.multi_reduction <add>, %316, %cst_120 [1] : vector<32x256xf32> to vector<32xf32>
    %318 = vector.shape_cast %317 : vector<32xf32> to vector<32x1xf32>
    %cst_121 = arith.constant 3.906250e-03 : f32
    %319 = vector.broadcast %cst_121 : f32 to vector<32x1xf32>
    %320 = arith.mulf %318, %319 : vector<32x1xf32>
    %321 = tpu.concatenate %315, %320 in 1 : vector<32x1xf32>, vector<32x1xf32> -> vector<32x2xf32>
    %322 = arith.truncf %321 : vector<32x2xf32> to vector<32x2xbf16>
    %c0_122 = arith.constant 0 : index
    %c0_123 = arith.constant 0 : index
    %323 = vector.load %arg9[%c0_122, %c0_123] : memref<4x32xbf16, #tpu.memory_space<vmem>>, vector<4x32xbf16>
    %cst_124 = arith.constant dense<0.000000e+00> : vector<4x2xf32>
    %324 = tpu.matmul %323, %322, %cst_124 {dimension_numbers = #tpu.dot_dimension_numbers<[1], [0], [0], [1], [0, 0, 1, 1], [], []>} : vector<4x32xbf16>, vector<32x2xbf16>, vector<4x2xf32> -> vector<4x2xf32>
    %cst_125 = arith.constant 0.000000e+00 : f32
    %325 = vector.broadcast %cst_125 : f32 to vector<4x2xf32>
    %326 = arith.maximumf %324, %325 : vector<4x2xf32>
    %c0_126 = arith.constant 0 : index
    %c0_127 = arith.constant 0 : index
    %327 = vector.load %arg10[%c0_126, %c0_127] : memref<32x4xbf16, #tpu.memory_space<vmem>>, vector<32x4xbf16>
    %328 = arith.truncf %326 : vector<4x2xf32> to vector<4x2xbf16>
    %cst_128 = arith.constant dense<0.000000e+00> : vector<32x2xf32>
    %329 = tpu.matmul %327, %328, %cst_128 {dimension_numbers = #tpu.dot_dimension_numbers<[1], [0], [0], [1], [0, 0, 1, 1], [], []>} : vector<32x4xbf16>, vector<4x2xbf16>, vector<32x2xf32> -> vector<32x2xf32>
    %330 = arith.negf %329 : vector<32x2xf32>
    %331 = math.exp %330 : vector<32x2xf32>
    %cst_129 = arith.constant 1.000000e+00 : f32
    %332 = vector.broadcast %cst_129 : f32 to vector<32x2xf32>
    %333 = arith.addf %332, %331 : vector<32x2xf32>
    %334 = arith.divf %332, %333 : vector<32x2xf32>
    %335 = vector.extract_strided_slice %310 {offsets = [0, 0], sizes = [32, 256], strides = [1, 1]} : vector<32x512xf32> to vector<32x256xf32>
    %336 = vector.extract_strided_slice %334 {offsets = [0, 0], sizes = [32, 1], strides = [1, 1]} : vector<32x2xf32> to vector<32x1xf32>
    %337 = vector.broadcast %336 : vector<32x1xf32> to vector<32x256xf32>
    %338 = arith.mulf %335, %337 : vector<32x256xf32>
    %c0_130 = arith.constant 0 : index
    %c0_131 = arith.constant 0 : index
    %c0_132 = arith.constant 0 : index
    %339 = vector.load %arg0[%c0_130, %c0_131, %c0_132] : memref<2x32x256xf32, #tpu.memory_space<vmem>>, vector<1x32x256xf32>
    %340 = vector.shape_cast %339 : vector<1x32x256xf32> to vector<32x256xf32>
    %341 = arith.addf %338, %340 : vector<32x256xf32>
    %cst_133 = arith.constant 0.000000e+00 : f32
    %342 = vector.broadcast %cst_133 : f32 to vector<32x256xf32>
    %343 = arith.maximumf %341, %342 : vector<32x256xf32>
    %c0_134 = arith.constant 0 : index
    %c0_135 = arith.constant 0 : index
    %c0_136 = arith.constant 0 : index
    %344 = vector.load %arg11[%c0_134, %c0_135, %c0_136] : memref<2x32x256xf32, #tpu.memory_space<vmem>>, vector<1x32x256xf32>
    %345 = vector.shape_cast %344 : vector<1x32x256xf32> to vector<32x256xf32>
    %346 = vector.shape_cast %343 : vector<32x256xf32> to vector<1x32x256xf32>
    tpu.vector_store %arg11[%c0_134, %c0_135, %c0_136], %346 {strides = array<i32>} : memref<2x32x256xf32, #tpu.memory_space<vmem>>, vector<1x32x256xf32>,
    %347 = vector.extract_strided_slice %310 {offsets = [0, 256], sizes = [32, 256], strides = [1, 1]} : vector<32x512xf32> to vector<32x256xf32>
    %348 = vector.extract_strided_slice %334 {offsets = [0, 1], sizes = [32, 1], strides = [1, 1]} : vector<32x2xf32> to vector<32x1xf32>
    %349 = vector.broadcast %348 : vector<32x1xf32> to vector<32x256xf32>
    %350 = arith.mulf %347, %349 : vector<32x256xf32>
    %c1_137 = arith.constant 1 : index
    %c0_138 = arith.constant 0 : index
    %c0_139 = arith.constant 0 : index
    %351 = vector.load %arg0[%c1_137, %c0_138, %c0_139] : memref<2x32x256xf32, #tpu.memory_space<vmem>>, vector<1x32x256xf32>
    %352 = vector.shape_cast %351 : vector<1x32x256xf32> to vector<32x256xf32>
    %353 = arith.addf %350, %352 : vector<32x256xf32>
    %cst_140 = arith.constant 0.000000e+00 : f32
    %354 = vector.broadcast %cst_140 : f32 to vector<32x256xf32>
    %355 = arith.maximumf %353, %354 : vector<32x256xf32>
    %c1_141 = arith.constant 1 : index
    %c0_142 = arith.constant 0 : index
    %c0_143 = arith.constant 0 : index
    %356 = vector.load %arg11[%c1_141, %c0_142, %c0_143] : memref<2x32x256xf32, #tpu.memory_space<vmem>>, vector<1x32x256xf32>
    %357 = vector.shape_cast %356 : vector<1x32x256xf32> to vector<32x256xf32>
    %358 = vector.shape_cast %355 : vector<32x256xf32> to vector<1x32x256xf32>
    tpu.vector_store %arg11[%c1_141, %c0_142, %c0_143], %358 {strides = array<i32>} : memref<2x32x256xf32, #tpu.memory_space<vmem>>, vector<1x32x256xf32>,
    return
  }
}

</mosaic_0001>

<bundles_post_ra>
// kernel: tpu_custom_call.1
= control target key start
LH: loop header
LB: loop body
LE: loop exit
PB: predicated region body
PF: predicated region fallthrough
CT: control target
= control target key end

     0   :  { %16 = vsyncpa [#allocation3], 0  ;;  %s7031_s0 = inlined_call_operand.vmem [shape: f32[2,32,256], index: 0, kind: input, shape index: {}]   ;;  %s7032_s1 = inlined_call_operand.vmem [shape: s32[1,512], index: 1, kind: input, shape index: {}]   ;;  %s7033_s2 = inlined_call_operand.vmem [shape: s32[1,512], index: 2, kind: input, shape index: {}]   ;;  %s7034_s3 = inlined_call_operand.hbm [shape: bf16[32,288], index: 3, kind: input, shape index: {}]   ;;  %s7035_s4 = inlined_call_operand.vmem [shape: f32[32,1], index: 4, kind: input, shape index: {}]   ;;  %s7036_s5 = inlined_call_operand.vmem [shape: f32[32,1], index: 5, kind: input, shape index: {}]   ;;  %s7037_s6 = inlined_call_operand.hbm [shape: bf16[32,288], index: 6, kind: input, shape index: {}]   ;;  %s7038_s7 = inlined_call_operand.vmem [shape: f32[32,1], index: 7, kind: input, shape index: {}]   ;;  %s7039_s8 = inlined_call_operand.vmem [shape: f32[32,1], index: 8, kind: input, shape index: {}]   ;;  %s7040_s9 = inlined_call_operand.vmem [shape: bf16[4,32], index: 9, kind: input, shape index: {}]   ;;  %s7041_s10 = inlined_call_operand.vmem [shape: bf16[32,4], index: 10, kind: input, shape index: {}]   ;;  %s7042_s11 = inlined_call_operand.hbm [shape: f32[2,32,256], index: 11, kind: output, shape index: {}]  }
   0x1   :  { %17 = vsyncpa [#allocation6], 0 }
   0x2   :  { %18 = vsyncpa [#allocation4], 0  ;;  %s3905_s17 = smov [#allocation2]  }
   0x3   :  { %s30_s18 = sshll.u32 %s3905_s17, 4  ;;  %s31_s18 = int_to_ptr.vmem [resolvable:$true] %s30_s18 }
   0x4   :  { %s3847_s19 = scalar_lea.vmem %s31_s18, 768  ;;  %p3852_p1 = scmp.lt.s32.totalorder %s31_s18, %s31_s18 }
   0x5   :  { %p3848_p0 = scmp.ne.s32.totalorder %s31_s18, %s3847_s19  ;;  %p3853_p2 = scmp.lt.s32.totalorder %s3847_s19, %s3847_s19 }
   0x7   :  { %p3854_p3 = por %p3853_p2, %p3852_p1 }
   0x9   :  { %p3855_p4 = pnand %p3854_p3, %p3848_p0 }
   0xb   :  { %3858 = shalt.err (!%p3855_p4)
}
   0xc   :  { %s3906_s20 = smov 192   ;;  %s3907_s21 = smov 12  }
   0xd   :  { %36 = dma.hbm_to_vmem [thread:$0]  %s7034_s3, 768, %s31_s18, [#allocation3], %s3906_s20, %s3906_s20, %s3907_s21  }
   0xe   :  { %s3908_s24 = smov [#allocation5]  }
   0xf   :  { %s46_s25 = sshll.u32 %s3908_s24, 4  ;;  %s47_s25 = int_to_ptr.vmem [resolvable:$true] %s46_s25 }
  0x10   :  { %s3867_s26 = scalar_lea.vmem %s47_s25, 768  ;;  %p3872_p6 = scmp.lt.s32.totalorder %s47_s25, %s47_s25 }
  0x11   :  { %p3868_p5 = scmp.ne.s32.totalorder %s47_s25, %s3867_s26  ;;  %p3873_p7 = scmp.lt.s32.totalorder %s3867_s26, %s3867_s26 }
  0x13   :  { %p3874_p8 = por %p3873_p7, %p3872_p6 }
  0x15   :  { %p3875_p9 = pnand %p3874_p8, %p3868_p5 }
  0x17   :  { %3878 = shalt.err (!%p3875_p9)
}
  0x18   :  { %52 = dma.hbm_to_vmem [thread:$0]  %s7037_s6, 768, %s47_s25, [#allocation6], %s3906_s20, %s3906_s20, %s3907_s21  }
  0x19   :  { %3899 = dma.done.wait [#allocation3], 768  }
  0x1a   :  { %3900 = vsyncadd [#allocation3], 4294966528 }
  0x1b   :  { %3901 = dma.done.wait [#allocation6], 768  }
  0x1c   :  { %3902 = vsyncadd [#allocation6], 4294966528  ;;  %v7079_v0 = vmov 0   ;;  %v2656_v1 = vld [vmem:[%s7031_s0 + $0x68] sm:$0xff]  ;;  %v2658_v2 = vld [vmem:[%s7031_s0 + $0x78] sm:$0xff]  ;;  %s3910_s24 = smov 1   ;;  %v162_v33 = vlaneseq }
  0x1d   :  { %1014 = vmatprep.mubr.bf16.mxu1 %v7079_v0  ;;  %3439 = vset.pattern.permute.xlu1 %v7079_v0  ;;  %v72_v3 = vld [vmem:[%s7031_s0 + $0x20] sm:$0xff]  ;;  %v4001_v4 = vpack.i.bf16 %v2658_v2, %v2656_v1  ;;  %v74_v5 = vld [vmem:[%s7031_s0 + $0x30] sm:$0xff]  ;;  %v73_v6 = vld [vmem:[%s7031_s0 + $0x28] sm:$0xff]  ;;  %s3911_s16 = smov 15   ;;  %s3912_s17 = smov 111  }
  0x1e   :  { %3440 = vset.pattern.permute.xlu0 %v7079_v0  ;;  %v75_v7 = vld [vmem:[%s7031_s0 + $0x38] sm:$0xff]  ;;  %v4012_v8 = vpack.i.bf16 %v74_v5, %v72_v3  ;;  %v68_v9 = vld [vmem:[%s7031_s0] sm:$0xff]  ;;  %v70_v10 = vld [vmem:[%s7031_s0 + $0x10] sm:$0xff]  ;;  %s3913_s22 = smov 16   ;;  %s3914_s23 = smov 17   ;;  %v4202_v35 = vshrl.u32 %v162_v33, 7 }
  0x1f   :  { %3130 = vrot.lane.b32.xlu1 %v4001_v4, %s3910_s24  ;;  %v4022_v11 = vpack.i.bf16 %v70_v10, %v68_v9  ;;  %v4026_v12 = vpack.i.bf16 %v75_v7, %v73_v6  ;;  %v2652_v13 = vld [vmem:[%s7031_s0 + $0x48] sm:$0xff]  ;;  %v2654_v14 = vld [vmem:[%s7031_s0 + $0x58] sm:$0xff]  ;;  %v2655_v19 = vld [vmem:[%s7031_s0 + $0x60] sm:$0xff]  ;;  %s3915_s3 = smov 112   ;;  %v4235_v41 = vand.u32 127, %v162_v33  ;;  %s3921_s29 = smov [#allocation7]  }
  0x20   :  { %3120 = vrot.lane.b32.xlu0 %v4012_v8, %s3910_s24  ;;  %v69_v15 = vld [vmem:[%s7031_s0 + $0x8] sm:$0xff]  ;;  %v71_v16 = vld [vmem:[%s7031_s0 + $0x18] sm:$0xff]  ;;  %v4042_v17 = vpack.i.bf16 %v2654_v14, %v2652_v13  ;;  %v2657_v20 = vld [vmem:[%s7031_s0 + $0x70] sm:$0xff]  ;;  %v4216_v37 = vsub.s32 1, %v4202_v35  ;;  %v4224_v39 = vsub.s32 0, %v4202_v35  ;;  %s2638_s30 = sshll.u32 %s3921_s29, 4  ;;  %s2639_s30 = int_to_ptr.vmem [resolvable:$true] %s2638_s30 }
  0x21   :  { %v4046_v18 = vpack.i.bf16 %v71_v16, %v69_v15  ;;  %v4060_v21 = vpack.i.bf16 %v2657_v20, %v2655_v19  ;;  %v2651_v22 = vld [vmem:[%s7031_s0 + $0x40] sm:$0xff]  ;;  %v2653_v23 = vld [vmem:[%s7031_s0 + $0x50] sm:$0xff]  ;;  %p3884_p11 = scmp.lt.s32.totalorder %s2639_s30, %s2639_s30 }
  0x22   :  { %v4080_v24 = vpack.i.bf16 %v2653_v23, %v2651_v22  ;;  %v85_v25 = vld [vmem:[%s7032_s1] sm:$0xf]  ;;  %s3916_s1 = smov 113   ;;  %v4237_v42 = vld [vmem:[#allocation2 + $0x4] ss:$12 sps:$4 sm:$0xff]  }
  0x23   :  { %3135 = vrot.lane.b32.xlu1 %v4022_v11, %s3910_s24  ;;  %v4130_v26 = vld [vmem:[%s7033_s2] sm:$0xf]  ;;  %v112_v27 = vadd.s32 1, %v85_v25  ;;  %s3917_s2 = smov 127   ;;  %vm105_vm7 = vcmp.ge.s32.totalorder %v85_v25, 0  ;;  %vm106_vm8 = vcmp.lt.s32.totalorder %v85_v25, 16  ;;  %961 = vmatprep.mubr.bf16.mxu0 %v4237_v42 }
  0x24   :  { %3125 = vrot.lane.b32.xlu0 %v4026_v12, %s3910_s24  ;;  %v4137_v28 = vadd.s32 4294967295, %v4130_v26  ;;  %vm4187_vm9 = vmand %vm105_vm7, %vm106_vm8  ;;  %v87_v32 = vadd.s32 4294967295, %v85_v25  ;;  %v4200_v34 = vadd.s32 1, %v4130_v26  ;;  %vm7045_vm7 = vcmp.lt.s32.totalorder %v4235_v41, 1 }
  0x25   :  { %vm113_vm0 = vcmp.ge.s32.totalorder %v112_v27, 0  ;;  %vm114_vm1 = vcmp.lt.s32.totalorder %v112_v27, 16 }
  0x26   :  { %vm7048_vm2 = vcmp.ge.s32.totalorder %v4137_v28, 0  ;;  %vm4144_vm3 = vmand %vm113_vm0, %vm114_vm1  ;;  %vm7046_vm4 = vcmp.lt.s32.totalorder %v4137_v28, 16  ;;  %vm88_vm11 = vcmp.ge.s32.totalorder %v87_v32, 0  ;;  %vm89_vm12 = vcmp.lt.s32.totalorder %v87_v32, 16 }
  0x27   :  { %3145 = vrot.lane.b32.xlu1 %v4042_v17, %s3910_s24  ;;  %vm116_vm5 = vmand %vm4144_vm3, %vm7048_vm2  ;;  %vm7044_vm15 = vcmp.ge.s32.totalorder %v4200_v34, 0  ;;  %vm7043_vm1 = vcmp.lt.s32.totalorder %v4200_v34, 16 }
  0x28   :  { %3140 = vrot.lane.b32.xlu0 %v4046_v18, %s3910_s24  ;;  %vm4157_vm6 = vmand %vm116_vm5, %vm7046_vm4 }
  0x29   :  { %vm108_vm10 = vmand %vm4187_vm9, %vm7048_vm2 }
  0x2a   :  { %vm109_vm13 = vmand %vm108_vm10, %vm7046_vm4 }
  0x2b   :  { %3155 = vrot.lane.b32.xlu1 %v4026_v12, %s3911_s16  ;;  %vm4210_vm14 = vmand %vm88_vm11, %vm89_vm12  ;;  %v4221_v38 = vsel %vm109_vm13, 1, %v7079_v0 }
  0x2c   :  { %3150 = vrot.lane.b32.xlu0 %v4012_v8, %s3911_s16  ;;  %vm102_vm0 = vmand %vm4210_vm14, %vm7044_vm15  ;;  %v471_v44 = vrot.slane %v4221_v38, %v4216_v37  ;;  %v467_v45 = vrot.slane %v4221_v38, %v4224_v39 }
  0x2d   :  { %vm104_vm5 = vmand %vm102_vm0, %vm7043_vm1 }
  0x2e   :  { %vm120_vm8 = vmand %vm4144_vm3, %vm7044_vm15  ;;  %vm481_vm10 = vcmp.eq.s32.totalorder %v471_v44, 1  ;;  %v4260_v52 = vsel %vm104_vm5, 1, %v7079_v0  ;;  %vm4266_vm11 = vcmp.eq.s32.totalorder %v467_v45, 1  ;;  %vm7062_vm5 = vcmp.lt.s32.totalorder %v4235_v41, 15 }
  0x2f   :  { %3165 = vrot.lane.b32.xlu1 %v4060_v21, %s3912_s17  ;;  %vm4282_vm12 = vmand %vm120_vm8, %vm7043_vm1  ;;  %v377_v1 = vrot.slane %v4260_v52, %v4216_v37 }
  0x30   :  { %3160 = vrot.lane.b32.xlu0 %v4026_v12, %s3912_s17  ;;  %vm4296_vm13 = vmpackc.low %vm481_vm10, %vm481_vm10  ;;  %vm7060_vm10 = vcmp.lt.s32.totalorder %v4235_v41, 111 }
  0x31   :  { %vm4309_vm0 = vmpackc.low %vm4266_vm11, %vm4266_vm11  ;;  %vm387_vm8 = vcmp.eq.s32.totalorder %v377_v1, 1 }
  0x32   :  { %vm4366_vm11 = vmpackc.low %vm387_vm8, %vm387_vm8  ;;  %vm7047_vm8 = vcmp.ge.s32.totalorder %v4130_v26, 0 }
  0x33   :  { %3175 = vrot.lane.b32.xlu1 %v4012_v8, %s3912_s17 }
  0x34   :  { %3170 = vrot.lane.b32.xlu0 %v4001_v4, %s3911_s16 }
  0x37   :  { %3185 = vrot.lane.b32.xlu1 %v4046_v18, %s3911_s16 }
  0x38   :  { %3180 = vrot.lane.b32.xlu0 %v4022_v11, %s3911_s16 }
  0x3b   :  { %3195 = vrot.lane.b32.xlu1 %v4080_v24, %s3912_s17 }
  0x3c   :  { %3190 = vrot.lane.b32.xlu0 %v4046_v18, %s3912_s17 }
  0x3f   :  { %3205 = vrot.lane.b32.xlu1 %v4022_v11, %s3912_s17 }
  0x40   :  { %3200 = vrot.lane.b32.xlu0 %v4042_v17, %s3911_s16 }
  0x43   :  { %3215 = vrot.lane.b32.xlu1 %v4026_v12, %s3913_s22 }
  0x44   :  { %3210 = vrot.lane.b32.xlu0 %v4012_v8, %s3913_s22 }
  0x47   :  { %3225 = vrot.lane.b32.xlu1 %v4001_v4, %s3913_s22 }
  0x48   :  { %3220 = vrot.lane.b32.xlu0 %v4060_v21, %s3910_s24 }
  0x4b   :  { %3235 = vrot.lane.b32.xlu1 %v4046_v18, %s3913_s22 }
  0x4c   :  { %3230 = vrot.lane.b32.xlu0 %v4022_v11, %s3913_s22 }
  0x4f   :  { %3245 = vrot.lane.b32.xlu1 %v4042_v17, %s3913_s22 }
  0x50   :  { %3240 = vrot.lane.b32.xlu0 %v4080_v24, %s3910_s24 }
  0x53   :  { %3255 = vrot.lane.b32.xlu1 %v4026_v12, %s3914_s23 }
  0x54   :  { %3250 = vrot.lane.b32.xlu0 %v4012_v8, %s3914_s23 }
  0x57   :  { %3265 = vrot.lane.b32.xlu1 %v4001_v4, %s3914_s23 }
  0x58   :  { %3260 = vrot.lane.b32.xlu0 %v4060_v21, %s3911_s16 }
  0x5b   :  { %3275 = vrot.lane.b32.xlu1 %v4046_v18, %s3914_s23 }
  0x5c   :  { %3270 = vrot.lane.b32.xlu0 %v4022_v11, %s3914_s23 }
  0x5f   :  { %3285 = vrot.lane.b32.xlu1 %v4042_v17, %s3914_s23 }
  0x60   :  { %3280 = vrot.lane.b32.xlu0 %v4080_v24, %s3911_s16 }
  0x63   :  { %3295 = vrot.lane.b32.xlu1 %v4026_v12, %s3915_s3 }
  0x64   :  { %3290 = vrot.lane.b32.xlu0 %v4060_v21, %s3913_s22 }
  0x67   :  { %3305 = vrot.lane.b32.xlu1 %v4012_v8, %s3915_s3 }
  0x68   :  { %3300 = vrot.lane.b32.xlu0 %v4060_v21, %s3915_s3 }
  0x6b   :  { %3315 = vrot.lane.b32.xlu1 %v4046_v18, %s3915_s3 }
  0x6c   :  { %3310 = vrot.lane.b32.xlu0 %v4080_v24, %s3913_s22 }
  0x6f   :  { %3325 = vrot.lane.b32.xlu1 %v4022_v11, %s3915_s3 }
  0x70   :  { %3320 = vrot.lane.b32.xlu0 %v4080_v24, %s3915_s3 }
  0x73   :  { %3335 = vrot.lane.b32.xlu1 %v4026_v12, %s3916_s1 }
  0x74   :  { %3330 = vrot.lane.b32.xlu0 %v4060_v21, %s3914_s23 }
  0x77   :  { %3345 = vrot.lane.b32.xlu1 %v4012_v8, %s3916_s1 }
  0x78   :  { %3340 = vrot.lane.b32.xlu0 %v4060_v21, %s3916_s1 }
  0x7b   :  { %3355 = vrot.lane.b32.xlu1 %v4046_v18, %s3916_s1 }
  0x7c   :  { %3350 = vrot.lane.b32.xlu0 %v4080_v24, %s3914_s23 }
  0x7f   :  { %3365 = vrot.lane.b32.xlu1 %v4022_v11, %s3916_s1 }
  0x80   :  { %3360 = vrot.lane.b32.xlu0 %v4080_v24, %s3916_s1 }
  0x83   :  { %3375 = vrot.lane.b32.xlu1 %v4060_v21, %s3917_s2 }
  0x84   :  { %3370 = vrot.lane.b32.xlu0 %v4026_v12, %s3917_s2  ;;  %v4320_v12 = vsel %vm4282_vm12, 1, %v7079_v0 }
  0x85   :  { %v855_v22 = vrot.slane %v4320_v12, %v4216_v37  ;;  %v851_v44 = vrot.slane %v4320_v12, %v4224_v39 }
  0x87   :  { %3385 = vrot.lane.b32.xlu1 %v4012_v8, %s3917_s2  ;;  %vm865_vm12 = vcmp.eq.s32.totalorder %v855_v22, 1  ;;  %vm864_vm15 = vcmp.eq.s32.totalorder %v851_v44, 1 }
  0x88   :  { %3380 = vrot.lane.b32.xlu0 %v4001_v4, %s3915_s3  ;;  %vm4389_vm1 = vmpackc.low %vm865_vm12, %vm865_vm12 }
  0x89   :  { %vm4403_vm12 = vmand %vm4210_vm14, %vm7047_vm8  ;;  %vm7061_vm8 = vcmp.lt.s32.totalorder %v4130_v26, 16 }
  0x8a   :  { %vm4417_vm4 = vmpackc.low %vm864_vm15, %vm864_vm15 }
  0x8b   :  { %3395 = vrot.lane.b32.xlu1 %v4080_v24, %s3917_s2  ;;  %vm99_vm15 = vmand %vm4403_vm12, %vm7061_vm8  ;;  %vm7068_vm8 = vcmask 261120  }
  0x8c   :  { %3390 = vrot.lane.b32.xlu0 %v4046_v18, %s3917_s2 }
  0x8f   :  { %3405 = vrot.lane.b32.xlu1 %v4022_v11, %s3917_s2 }
  0x90   :  { %3400 = vrot.lane.b32.xlu0 %v4042_v17, %s3915_s3 }
  0x91   :  { %v4233_v40 = vpop.permute.xlu1 %3130 }
  0x92   :  { %v3121_v43 = vpop.permute.xlu0 %3120  ;;  %v3133_v46 = vunpack.i.h.bf16 %v4233_v40  ;;  %v3132_v47 = vunpack.i.l.bf16 %v4233_v40 }
  0x93   :  { %3415 = vrot.lane.b32.xlu1 %v4042_v17, %s3916_s1  ;;  %v3123_v48 = vunpack.i.h.bf16 %v3121_v43  ;;  %v3122_v49 = vunpack.i.l.bf16 %v3121_v43  ;;  %v373_v43 = vrot.slane %v4260_v52, %v4224_v39 }
  0x94   :  { %3410 = vrot.lane.b32.xlu0 %v4001_v4, %s3916_s1 }
  0x95   :  { %v3136_v50 = vpop.permute.xlu1 %3135  ;;  %v461_v56 = vsel %vm7045_vm7, %v3132_v47, %v3122_v49  ;;  %v462_v57 = vsel %vm7045_vm7, %v3133_v46, %v3123_v48 }
  0x96   :  { %v4257_v51 = vpop.permute.xlu0 %3125  ;;  %v3138_v59 = vunpack.i.h.bf16 %v3136_v50  ;;  %v3137_v2 = vunpack.i.l.bf16 %v3136_v50  ;;  %v2669_v11 = vpack.c.bf16 %v462_v57, %v461_v56 }
  0x97   :  { %v3128_v53 = vunpack.i.h.bf16 %v4257_v51  ;;  %v3127_v54 = vunpack.i.l.bf16 %v4257_v51  ;;  %3425 = vrot.lane.b32.xlu1 %v4042_v17, %s3917_s2  ;;  %v7265_v51 = vmov 0 }
  0x98   :  { %3420 = vrot.lane.b32.xlu0 %v4001_v4, %s3917_s2 }
  0x99   :  { %v4286_v60 = vpop.permute.xlu1 %3145  ;;  %v457_v61 = vsel %vm7045_vm7, %v3122_v49, %v3127_v54  ;;  %v458_v62 = vsel %vm7045_vm7, %v3123_v48, %v3128_v53 }
  0x9a   :  { %v4302_v3 = vpop.permute.xlu0 %3140  ;;  %v3148_v5 = vunpack.i.h.bf16 %v4286_v60  ;;  %v3147_v6 = vunpack.i.l.bf16 %v4286_v60  ;;  %v2666_v7 = vpack.c.bf16 %v458_v62, %v457_v61 }
  0x9b   :  { %v3143_v9 = vunpack.i.h.bf16 %v4302_v3  ;;  %v3142_v10 = vunpack.i.l.bf16 %v4302_v3  ;;  %3435 = vrot.lane.b32.xlu1 %v4042_v17, %s3912_s17 }
  0x9c   :  { %v459_v13 = vsel %vm7045_vm7, %v3147_v6, %v3137_v2  ;;  %v460_v14 = vsel %vm7045_vm7, %v3148_v5, %v3138_v59  ;;  %2667 = vmatprep.subr.msk.bf16.mxu0 %vm4296_vm13, %v2666_v7  ;;  %3430 = vrot.lane.b32.xlu0 %v4001_v4, %s3912_s17 }
  0x9d   :  { %v455_v15 = vsel %vm7045_vm7, %v3137_v2, %v3142_v10  ;;  %v456_v16 = vsel %vm7045_vm7, %v3138_v59, %v3143_v9  ;;  %2670 = vmatpush1.bf16.msk.msra.mxu0 %vm4309_vm0, %v2669_v11  ;;  %v4345_v17 = vpop.permute.xlu1 %3155  ;;  %v2675_v18 = vpack.c.bf16 %v460_v14, %v459_v13  ;;  %vm386_vm7 = vcmp.eq.s32.totalorder %v373_v43, 1 }
  0x9e   :  { %v3151_v19 = vpop.permute.xlu0 %3150  ;;  %v7059_v4 = vunpack.i.h.bf16 %v4345_v17  ;;  %v3157_v20 = vunpack.i.l.bf16 %v4345_v17  ;;  %v2672_v21 = vpack.c.bf16 %v456_v16, %v455_v15  ;;  %vm4432_vm2 = vmpackc.low %vm386_vm7, %vm386_vm7  ;;  %vm7066_vm7 = vcmp.lt.s32.totalorder %v4235_v41, 16 }
  0x9f   :  { %v3153_v23 = vunpack.i.h.bf16 %v3151_v19  ;;  %v3152_v24 = vunpack.i.l.bf16 %v3151_v19 }
  0xa0   :  { %2673 = vmatprep.subr.msk.bf16.mxu0 %vm4296_vm13, %v2672_v21 }
  0xa1   :  { %v364_v25 = vsel %vm7062_vm5, %v3153_v23, %v7059_v4  ;;  %v363_v27 = vsel %vm7062_vm5, %v3152_v24, %v3157_v20  ;;  %2676 = vmatpush1.bf16.msk.msra.mxu0 %vm4309_vm0, %v2675_v18  ;;  %v4364_v32 = vpop.permute.xlu1 %3165  ;;  %v7243_v18 = vmov 0  ;;  %v4512_v4 = vld [vmem:[#allocation2 + $0x8] ss:$12 sps:$4 sm:$0xff]  }
  0xa2   :  { %v3161_v45 = vpop.permute.xlu0 %3160  ;;  %v7052_v48 = vunpack.i.h.bf16 %v4364_v32  ;;  %v7054_v49 = vunpack.i.l.bf16 %v4364_v32  ;;  %v2678_v50 = vpack.c.bf16 %v364_v25, %v363_v27  ;;  %v7244_v18 = vsel %vm4417_vm4, 4294967295, %v7243_v18 }
  0xa3   :  { %v3163_v55 = vunpack.i.h.bf16 %v3161_v45  ;;  %v3162_v56 = vunpack.i.l.bf16 %v3161_v45  ;;  %v7245_v25 = vmov 0 }
  0xa4   :  { %2679 = vmatprep.subr.msk.bf16.mxu0 %vm4366_vm11, %v2678_v50  ;;  %v7246_v25 = vsel %vm4432_vm2, 4294967295, %v7245_v25 }
  0xa5   :  { %v4379_v57 = vpop.permute.xlu1 %3175  ;;  %v837_v58 = vsel %vm7060_vm10, %v3162_v56, %v7054_v49  ;;  %v838_v59 = vsel %vm7060_vm10, %v3163_v55, %v7052_v48  ;;  %v4482_v48 = vsub.s32 3, %v4202_v35 }
  0xa6   :  { %v4393_v62 = vpop.permute.xlu0 %3170  ;;  %v7049_v1 = vunpack.i.h.bf16 %v4379_v57  ;;  %v7050_v2 = vunpack.i.l.bf16 %v4379_v57  ;;  %v2750_v7 = vpack.c.bf16 %v838_v59, %v837_v58 }
  0xa7   :  { %v3173_v11 = vunpack.i.h.bf16 %v4393_v62  ;;  %v3172_v13 = vunpack.i.l.bf16 %v4393_v62 }
  0xa8   :  { %2751 = vmatprep.subr.msk.bf16.mxu1 %vm4389_vm1, %v2750_v7  ;;  %v841_v15 = vsel %vm7060_vm10, %v7050_v2, %v3162_v56  ;;  %v842_v16 = vsel %vm7060_vm10, %v7049_v1, %v3163_v55 }
  0xa9   :  { %v367_v19 = vsel %vm7062_vm5, %v3172_v13, %v3152_v24  ;;  %v368_v21 = vsel %vm7062_vm5, %v3173_v11, %v3153_v23  ;;  %v4430_v22 = vpop.permute.xlu1 %3185  ;;  %v2753_v27 = vpack.c.bf16 %v842_v16, %v841_v15  ;;  %v4459_v16 = vsel %vm99_vm15, 1, %v7079_v0 }
  0xaa   :  { %v3181_v43 = vpop.permute.xlu0 %3180  ;;  %v7056_v44 = vunpack.i.h.bf16 %v4430_v22  ;;  %v7058_v45 = vunpack.i.l.bf16 %v4430_v22  ;;  %v2681_v50 = vpack.c.bf16 %v368_v21, %v367_v19  ;;  %vm7247_vm15 = vcmp.ge.s32.totalorder %v4137_v28, 0 }
  0xab   :  { %v3183_v55 = vunpack.i.h.bf16 %v3181_v43  ;;  %v3182_v24 = vunpack.i.l.bf16 %v3181_v43  ;;  %2754 = vmatpush1.bf16.msk.msra.mxu1 %vm4417_vm4, %v2753_v27 }
  0xac   :  { %2682 = vmatpush1.bf16.msk.msra.mxu0 %vm4432_vm2, %v2681_v50 }
  0xad   :  { %v362_v23 = vsel %vm7062_vm5, %v3183_v55, %v7056_v44  ;;  %v361_v56 = vsel %vm7062_vm5, %v3182_v24, %v7058_v45  ;;  %v4454_v58 = vpop.permute.xlu1 %3195  ;;  %v279_v45 = vrot.slane %v4459_v16, %v4224_v39 }
  0xae   :  { %v3191_v59 = vpop.permute.xlu0 %3190  ;;  %v7051_v7 = vunpack.i.h.bf16 %v4454_v58  ;;  %v7053_v14 = vunpack.i.l.bf16 %v4454_v58  ;;  %v2684_v15 = vpack.c.bf16 %v362_v23, %v361_v56  ;;  %v283_v23 = vrot.slane %v4459_v16, %v4216_v37 }
  0xaf   :  { %v3193_v19 = vunpack.i.h.bf16 %v3191_v59  ;;  %v3192_v21 = vunpack.i.l.bf16 %v3191_v59 }
  0xb0   :  { %2685 = vmatprep.subr.msk.bf16.mxu0 %vm4366_vm11, %v2684_v15  ;;  %vm293_vm12 = vcmp.eq.s32.totalorder %v283_v23, 1 }
  0xb1   :  { %v836_v27 = vsel %vm7060_vm10, %v3193_v19, %v7051_v7  ;;  %v835_v43 = vsel %vm7060_vm10, %v3192_v21, %v7053_v14  ;;  %v4471_v50 = vpop.permute.xlu1 %3205 }
  0xb2   :  { %v4475_v56 = vpop.permute.xlu0 %3200  ;;  %v7055_v59 = vunpack.i.h.bf16 %v4471_v50  ;;  %v7057_v15 = vunpack.i.l.bf16 %v4471_v50  ;;  %v2756_v1 = vpack.c.bf16 %v836_v27, %v835_v43  ;;  %v4496_v27 = vsub.s32 2, %v4202_v35 }
  0xb3   :  { %v7063_v2 = vunpack.i.h.bf16 %v4475_v56  ;;  %v7067_v7 = vunpack.i.l.bf16 %v4475_v56 }
  0xb4   :  { %v840_v14 = vsel %vm7060_vm10, %v7055_v59, %v3193_v19  ;;  %v839_v49 = vsel %vm7060_vm10, %v7057_v15, %v3192_v21  ;;  %2757 = vmatprep.subr.msk.bf16.mxu1 %vm4389_vm1, %v2756_v1  ;;  %vm93_vm10 = vmand %vm4210_vm14, %vm7247_vm15  ;;  %v475_v36 = vrot.slane %v4221_v38, %v4496_v27  ;;  %vm7250_vm14 = vcmp.lt.s32.totalorder %v4137_v28, 16 }
  0xb5   :  { %v365_v43 = vsel %vm7062_vm5, %v7067_v7, %v3182_v24  ;;  %v366_v19 = vsel %vm7062_vm5, %v7063_v2, %v3183_v55  ;;  %v4506_v59 = vpop.permute.xlu1 %3215  ;;  %v2759_v44 = vpack.c.bf16 %v840_v14, %v839_v49  ;;  %v479_v49 = vrot.slane %v4221_v38, %v4482_v48  ;;  %vm4524_vm5 = vmpackc.low %vm293_vm12, %vm293_vm12 }
  0xb6   :  { %v3211_v21 = vpop.permute.xlu0 %3210  ;;  %v7064_v1 = vunpack.i.h.bf16 %v4506_v59  ;;  %v7065_v35 = vunpack.i.l.bf16 %v4506_v59  ;;  %v2687_v15 = vpack.c.bf16 %v366_v19, %v365_v43  ;;  %v7248_v14 = vmov 0  ;;  %vm95_vm12 = vmand %vm93_vm10, %vm7250_vm14 }
  0xb7   :  { %v3213_v55 = vunpack.i.h.bf16 %v3211_v21  ;;  %v3212_v24 = vunpack.i.l.bf16 %v3211_v21  ;;  %2760 = vmatpush1.bf16.msk.msra.mxu1 %vm4417_vm4, %v2759_v44  ;;  %v7249_v14 = vsel %vm4524_vm5, 4294967295, %v7248_v14  ;;  %vm4544_vm15 = vcmp.eq.s32.totalorder %v279_v45, 1 }
  0xb8   :  { %2688 = vmatpush1.bf16.msk.msra.mxu0 %vm4432_vm2, %v2687_v15  ;;  %vm7255_vm10 = vcmp.lt.s32.totalorder %v4235_v41, 16  ;;  %vm7259_vm4 = vcmp.lt.s32.totalorder %v4235_v41, 1  ;;  %v381_v3 = vrot.slane %v4260_v52, %v4496_v27 }
  0xb9   :  { %v270_v23 = vsel %vm7066_vm7, %v3213_v55, %v7064_v1  ;;  %v269_v44 = vsel %vm7066_vm7, %v3212_v24, %v7065_v35  ;;  %v4538_v43 = vpop.permute.xlu1 %3225  ;;  %vm4550_vm7 = vcmp.eq.s32.totalorder %v479_v49, 1  ;;  %vm7256_vm14 = vmmov %vm7255_vm10 }
  0xba   :  { %v3221_v15 = vpop.permute.xlu0 %3220  ;;  %v7072_v19 = vunpack.i.h.bf16 %v4538_v43  ;;  %v7078_v38 = vunpack.i.l.bf16 %v4538_v43  ;;  %v2690_v21 = vpack.c.bf16 %v270_v23, %v269_v44  ;;  %2761 = vmatmul.mubr.msk.bf16.vlgmr.msra.gmra.mxu1 %vm7068_vm8, %v4512_v4  ;;  %vm4565_vm8 = vcmp.eq.s32.totalorder %v475_v36, 1 }
  0xbb   :  { %v3223_v1 = vunpack.i.h.bf16 %v3221_v15  ;;  %v3222_v35 = vunpack.i.l.bf16 %v3221_v15  ;;  %1024 = vmatprep.mubr.bf16.mxu1 %v7079_v0  ;;  %v4570_v23 = vsel %vm95_vm12, 1, %v7079_v0  ;;  %vm7262_vm12 = vmmov %vm7259_vm4 }
  0xbc   :  { %v274_v28 = vsel %vm7255_vm10, %v7072_v19, %v3213_v55  ;;  %v273_v45 = vsel %vm7256_vm14, %v7078_v38, %v3212_v24  ;;  %2691 = vmatprep.subr.msk.bf16.mxu0 %vm4524_vm5, %v2690_v21  ;;  %vm7260_vm10 = vmmov %vm7259_vm4  ;;  %v189_v7 = vrot.slane %v4570_v23, %v4216_v37 }
  0xbd   :  { %v450_v55 = vsel %vm7259_vm4, %v3223_v1, %v3133_v46  ;;  %v454_v24 = vsel %vm7260_vm10, %v3128_v53, %v3223_v1  ;;  %vm7261_vm14 = vmmov %vm7259_vm4  ;;  %v453_v44 = vsel %vm7262_vm12, %v3127_v54, %v3222_v35  ;;  %v4588_v15 = vpop.permute.xlu1 %3235  ;;  %v7263_v46 = vmov 0 }
  0xbe   :  { %v449_v36 = vsel %vm7261_vm14, %v3222_v35, %v3132_v47  ;;  %vm4593_vm4 = vmpackc.low %vm4544_vm15, %vm4544_vm15  ;;  %v2767_v53 = vpack.c.bf16 %v454_v24, %v453_v44  ;;  %v3231_v1 = vpop.permute.xlu0 %3230  ;;  %v7071_v40 = vunpack.i.h.bf16 %v4588_v15  ;;  %v7073_v47 = vunpack.i.l.bf16 %v4588_v15  ;;  %v4613_v44 = vld [vmem:[#allocation2 + $0x20] ss:$12 sps:$4 sm:$0xff]  }
  0xbf   :  { %v7264_v46 = vsel %vm4593_vm4, 4294967295, %v7263_v46  ;;  %v2693_v21 = vpack.c.bf16 %v274_v28, %v273_v45  ;;  %vm4602_vm10 = vmpackc.low %vm4550_vm7, %vm4550_vm7  ;;  %v3233_v54 = vunpack.i.h.bf16 %v3231_v1  ;;  %v3232_v2 = vunpack.i.l.bf16 %v3231_v1 }
  0xc0   :  { %v7266_v51 = vsel %vm4602_vm10, 4294967295, %v7265_v51  ;;  %v2764_v35 = vpack.c.bf16 %v450_v55, %v449_v36  ;;  %vm4609_vm15 = vmpackc.low %vm4565_vm8, %vm4565_vm8  ;;  %v7267_v24 = vmov 0  ;;  %vm7269_vm7 = vcmp.lt.s32.totalorder %v4235_v41, 16 }
  0xc1   :  { %v7268_v24 = vsel %vm4609_vm15, 4294967295, %v7267_v24  ;;  %2694 = vmatpush1.bf16.msk.msra.mxu0 %vm4593_vm4, %v2693_v21  ;;  %v268_v28 = vsel %vm7269_vm7, %v3233_v54, %v7071_v40  ;;  %vm7270_vm8 = vmmov %vm7269_vm7  ;;  %v4629_v49 = vpop.permute.xlu1 %3245  ;;  %vm7271_vm12 = vcmask 261120   ;;  %vm4650_vm14 = vcmp.eq.s32.totalorder %v189_v7, 1 }
  0xc2   :  { %v267_v45 = vsel %vm7270_vm8, %v3232_v2, %v7073_v47  ;;  %2765 = vmatprep.subr.msk.bf16.mxu1 %vm4602_vm10, %v2764_v35  ;;  %v3241_v55 = vpop.permute.xlu0 %3240  ;;  %v7076_v36 = vunpack.i.h.bf16 %v4629_v49  ;;  %v7077_v1 = vunpack.i.l.bf16 %v4629_v49  ;;  %v185_v47 = vrot.slane %v4570_v23, %v4224_v39  ;;  %2762 = vmatmul.mubr.msk.bf16.gmra.mxu1 %vm7271_vm12, %v4613_v44  ;;  %vm7272_vm8 = vmmov %vm7269_vm7 }
  0xc3   :  { %2768 = vmatpush1.bf16.msk.msra.mxu1 %vm4609_vm15, %v2767_v53  ;;  %v2696_v21 = vpack.c.bf16 %v268_v28, %v267_v45  ;;  %v3243_v40 = vunpack.i.h.bf16 %v3241_v55  ;;  %v3242_v19 = vunpack.i.l.bf16 %v3241_v55  ;;  %v385_v45 = vrot.slane %v4260_v52, %v4482_v48  ;;  %1067 = vmatprep.mubr.bf16.mxu1 %v4237_v42 }
  0xc4   :  { %v272_v53 = vsel %vm7269_vm7, %v7076_v36, %v3233_v54  ;;  %v271_v35 = vsel %vm7272_vm8, %v7077_v1, %v3232_v2  ;;  %vm7275_vm12 = vcmp.lt.s32.totalorder %v4235_v41, 1  ;;  %v7307_v28 = vmov 0  }
  0xc5   :  { %2697 = vmatprep.subr.msk.bf16.mxu0 %vm4524_vm5, %v2696_v21  ;;  %v452_v54 = vsel %vm7275_vm12, %v3143_v9, %v3243_v40  ;;  %vm7276_vm7 = vmmov %vm7275_vm12  ;;  %v4673_v55 = vpop.permute.xlu1 %3255  ;;  %v2699_v38 = vpack.c.bf16 %v272_v53, %v271_v35 }
  0xc6   :  { %v447_v2 = vsel %vm7276_vm7, %v3242_v19, %v3147_v6  ;;  %vm7277_vm8 = vmmov %vm7276_vm7  ;;  %v3251_v36 = vpop.permute.xlu0 %3250  ;;  %v7093_v9 = vunpack.i.h.bf16 %v4673_v55  ;;  %v7094_v1 = vunpack.i.l.bf16 %v4673_v55 }
  0xc7   :  { %v448_v7 = vsel %vm7277_vm8, %v3243_v40, %v3148_v5  ;;  %vm7278_vm5 = vmmov %vm7276_vm7  ;;  %v3253_v6 = vunpack.i.h.bf16 %v3251_v36  ;;  %v3252_v0 = vunpack.i.l.bf16 %v3251_v36  ;;  %2700 = vmatpush1.bf16.msk.msra.mxu0 %vm4593_vm4, %v2699_v38  ;;  %vm198_vm8 = vcmp.eq.s32.totalorder %v185_v47, 1 }
  0xc8   :  { %v451_v42 = vsel %vm7278_vm5, %v3142_v10, %v3242_v19  ;;  %v2770_v60 = vpack.c.bf16 %v448_v7, %v447_v2  ;;  %vm7279_vm5 = vcmp.lt.s32.totalorder %v4235_v41, 17  ;;  %vm4696_vm7 = vmpackc.low %vm4650_vm14, %vm4650_vm14  ;;  %v7288_v2 = vmov 0 }
  0xc9   :  { %v2773_v21 = vpack.c.bf16 %v452_v54, %v451_v42  ;;  %v176_v5 = vsel %vm7279_vm5, %v3253_v6, %v7093_v9  ;;  %vm7280_vm12 = vmmov %vm7279_vm5  ;;  %v4691_v19 = vpop.permute.xlu1 %3265  ;;  %vm389_vm5 = vcmp.eq.s32.totalorder %v385_v45, 1 }
  0xca   :  { %v175_v10 = vsel %vm7280_vm12, %v3252_v0, %v7094_v1  ;;  %2771 = vmatprep.subr.msk.bf16.mxu1 %vm4602_vm10, %v2770_v60  ;;  %v3261_v38 = vpop.permute.xlu0 %3260  ;;  %v3268_v40 = vunpack.i.h.bf16 %v4691_v19  ;;  %v3267_v36 = vunpack.i.l.bf16 %v4691_v19  ;;  %vm7283_vm12 = vcmp.ge.s32.totalorder %v4130_v26, 0  ;;  %vm4722_vm10 = vmpackc.low %vm198_vm8, %vm198_vm8 }
  0xcb   :  { %2774 = vmatpush1.bf16.msk.msra.mxu1 %vm4609_vm15, %v2773_v21  ;;  %v2702_v53 = vpack.c.bf16 %v176_v5, %v175_v10  ;;  %v3263_v35 = vunpack.i.h.bf16 %v3261_v38  ;;  %v3262_v54 = vunpack.i.l.bf16 %v3261_v38  ;;  %vm4708_vm14 = vmand %vm4144_vm3, %vm7283_vm12  ;;  %vm7286_vm15 = vcmp.lt.s32.totalorder %v4235_v41, 17 }
  0xcc   :  { %v180_v47 = vsel %vm7286_vm15, %v3268_v40, %v3253_v6  ;;  %vm7287_vm4 = vmmov %vm7286_vm15  ;;  %v7289_v2 = vsel %vm4722_vm10, 4294967295, %v7288_v2  ;;  %vm4726_vm3 = vcmp.eq.s32.totalorder %v381_v3, 1  ;;  %vm7293_vm15 = vcmp.lt.s32.totalorder %v4235_v41, 15 }
  0xcd   :  { %v179_v45 = vsel %vm7287_vm4, %v3267_v36, %v3252_v0  ;;  %2703 = vmatprep.subr.msk.bf16.mxu0 %vm4696_vm7, %v2702_v53  ;;  %7290 = vst [vmem:[#allocation11_spill] sm:$0xff] %v7289_v2  ;;  %v356_v7 = vsel %vm7293_vm15, %v3263_v35, %v3173_v11  ;;  %vm7294_vm4 = vmmov %vm7293_vm15  ;;  %v7296_v21 = vunpack.i.h.bf16 %v4345_v17  ;;  %v4746_v60 = vpop.permute.xlu1 %3275  ;;  %v7298_v3 = vmov 0 }
  0xce   :  { %v355_v0 = vsel %vm7294_vm4, %v3262_v54, %v3172_v13  ;;  %vm7295_vm8 = vmmov %vm7294_vm4  ;;  %v3271_v11 = vpop.permute.xlu0 %3270  ;;  %v7089_v13 = vunpack.i.h.bf16 %v4746_v60  ;;  %v7090_v5 = vunpack.i.l.bf16 %v4746_v60  ;;  %v2705_v10 = vpack.c.bf16 %v180_v47, %v179_v45 }
  0xcf   :  { %v359_v42 = vsel %vm7295_vm8, %v3157_v20, %v3262_v54  ;;  %vm7297_vm12 = vmmov %vm7294_vm4  ;;  %vm7301_vm15 = vcmp.lt.s32.totalorder %v4130_v26, 16  ;;  %v3273_v17 = vunpack.i.h.bf16 %v3271_v11  ;;  %v3272_v20 = vunpack.i.l.bf16 %v3271_v11 }
  0xd0   :  { %v360_v6 = vsel %vm7297_vm12, %v7296_v21, %v3263_v35  ;;  %vm4748_vm2 = vmpackc.low %vm389_vm5, %vm389_vm5  ;;  %v2776_v38 = vpack.c.bf16 %v356_v7, %v355_v0  ;;  %v7302_v53 = vmov 0  ;;  %2706 = vmatpush1.bf16.msk.msra.mxu0 %vm4722_vm10, %v2705_v10  ;;  %vm7305_vm8 = vcmp.lt.s32.totalorder %v4235_v41, 17 }
  0xd1   :  { %v7299_v3 = vsel %vm4748_vm2, 4294967295, %v7298_v3  ;;  %v2779_v62 = vpack.c.bf16 %v360_v6, %v359_v42  ;;  %vm119_vm4 = vmand %vm4708_vm14, %vm7301_vm15  ;;  %v174_v26 = vsel %vm7305_vm8, %v3273_v17, %v7089_v13  ;;  %v4777_v54 = vpop.permute.xlu1 %3285  ;;  %v291_v42 = vrot.slane %v4459_v16, %v4482_v48 }
  0xd2   :  { %7300 = vst [vmem:[#allocation12_spill] sm:$0xff] %v7299_v3  ;;  %vm4761_vm5 = vmpackc.low %vm4726_vm3, %vm4726_vm3  ;;  %2777 = vmatprep.subr.msk.bf16.mxu1 %vm4748_vm2, %v2776_v38  ;;  %v4780_v47 = vsel %vm119_vm4, 1, %v7307_v28  ;;  %v3281_v45 = vpop.permute.xlu0 %3280  ;;  %v7091_v29 = vunpack.i.h.bf16 %v4777_v54  ;;  %v7092_v7 = vunpack.i.l.bf16 %v4777_v54  ;;  %v287_v10 = vrot.slane %v4459_v16, %v4496_v27 }
  0xd3   :  { %v7303_v53 = vsel %vm4761_vm5, 4294967295, %v7302_v53  ;;  %vm7306_vm14 = vmmov %vm7305_vm8  ;;  %2780 = vmatpush1.bf16.msk.msra.mxu1 %vm4761_vm5, %v2779_v62  ;;  %v3283_v21 = vunpack.i.h.bf16 %v3281_v45  ;;  %v3282_v6 = vunpack.i.l.bf16 %v3281_v45  ;;  %v761_v38 = vrot.slane %v4780_v47, %v4216_v37 }
  0xd4   :  { %7304 = vst [vmem:[#allocation13_spill] sm:$0xff] %v7303_v53  ;;  %v173_v35 = vsel %vm7306_vm14, %v3272_v20, %v7090_v5  ;;  %vm7308_vm3 = vmmov %vm7305_vm8  ;;  %vm7311_vm15 = vcmp.lt.s32.totalorder %v4235_v41, 15  ;;  %v7316_v16 = vunpack.i.h.bf16 %v4430_v22  ;;  %v7375_v19 = vmov 0 }
  0xd5   :  { %v2708_v0 = vpack.c.bf16 %v174_v26, %v173_v35  ;;  %v178_v11 = vsel %vm7308_vm3, %v7091_v29, %v3273_v17  ;;  %vm7309_vm12 = vmmov %vm7308_vm3  ;;  %v7310_v26 = vunpack.i.l.bf16 %v4475_v56  ;;  %v7312_v17 = vunpack.i.h.bf16 %v4475_v56  ;;  %v3296_v5 = vpop.permute.xlu1 %3295 }
  0xd6   :  { %v177_v62 = vsel %vm7309_vm12, %v7092_v7, %v3272_v20  ;;  %vm7313_vm4 = vmmov %vm7311_vm15  ;;  %v7314_v20 = vunpack.i.l.bf16 %v4430_v22  ;;  %vm4819_vm12 = vcmp.eq.s32.totalorder %v291_v42, 1  ;;  %v3298_v22 = vunpack.i.h.bf16 %v3296_v5 }
  0xd7   :  { %2709 = vmatprep.subr.msk.bf16.mxu0 %vm4696_vm7, %v2708_v0  ;;  %v353_v35 = vsel %vm7311_vm15, %v3282_v6, %v7310_v26  ;;  %v354_v45 = vsel %vm7313_vm4, %v3283_v21, %v7312_v17  ;;  %vm7315_vm8 = vmmov %vm7313_vm4  ;;  %v3291_v26 = vpop.permute.xlu0 %3290  ;;  %v2711_v7 = vpack.c.bf16 %v178_v11, %v177_v62  ;;  %vm4827_vm15 = vcmp.eq.s32.totalorder %v287_v10, 1 }
  0xd8   :  { %v357_v0 = vsel %vm7315_vm8, %v7314_v20, %v3282_v6  ;;  %vm7317_vm14 = vmmov %vm7313_vm4  ;;  %v3293_v17 = vunpack.i.h.bf16 %v3291_v26  ;;  %v3292_v9 = vunpack.i.l.bf16 %v3291_v26  ;;  %v2782_v1 = vpack.c.bf16 %v354_v45, %v353_v35 }
  0xd9   :  { %v358_v13 = vsel %vm7317_vm14, %v7316_v16, %v3283_v21  ;;  %v757_v6 = vrot.slane %v4780_v47, %v4224_v39  ;;  %v3297_v20 = vunpack.i.l.bf16 %v3296_v5  ;;  %2712 = vmatpush1.bf16.msk.msra.mxu0 %vm4722_vm10, %v2711_v7  ;;  %vm4831_vm4 = vcmp.eq.s32.totalorder %v761_v38, 1  ;;  %v4853_v45 = vpop.permute.xlu1 %3305 }
  0xda   :  { %v2785_v29 = vpack.c.bf16 %v358_v13, %v357_v0  ;;  %v7324_v42 = vunpack.i.l.bf16 %v4538_v43  ;;  %vm7325_vm8 = vcmp.lt.s32.totalorder %v4235_v41, 16  ;;  %v7326_v62 = vunpack.i.h.bf16 %v4538_v43  ;;  %2783 = vmatprep.subr.msk.bf16.mxu1 %vm4748_vm2, %v2782_v1 }
  0xdb   :  { %vm7327_vm14 = vmmov %vm7325_vm8  ;;  %v7328_v7 = vunpack.i.l.bf16 %v4506_v59  ;;  %v7330_v38 = vunpack.i.h.bf16 %v4506_v59  ;;  %v7332_v43 = vmov 0  ;;  %v4864_v59 = vpop.permute.xlu0 %3300  ;;  %v7100_v16 = vunpack.i.l.bf16 %v4853_v45 }
  0xdc   :  { %v261_v11 = vsel %vm7325_vm8, %v3292_v9, %v7324_v42  ;;  %v262_v5 = vsel %vm7327_vm14, %v3293_v17, %v7326_v62  ;;  %vm7329_vm3 = vmmov %vm7325_vm8  ;;  %2786 = vmatpush1.bf16.msk.msra.mxu1 %vm4761_vm5, %v2785_v29  ;;  %v7101_v26 = vunpack.i.h.bf16 %v4864_v59  ;;  %v7104_v56 = vunpack.i.l.bf16 %v4864_v59 }
  0xdd   :  { %v265_v10 = vsel %vm7329_vm3, %v7328_v7, %v3292_v9  ;;  %vm7331_vm10 = vmmov %vm7329_vm3  ;;  %v7099_v9 = vunpack.i.h.bf16 %v4853_v45  ;;  %v2788_v1 = vpack.c.bf16 %v262_v5, %v261_v11  ;;  %vm770_vm3 = vcmp.eq.s32.totalorder %v757_v6, 1  ;;  %v3316_v11 = vpop.permute.xlu1 %3315 }
  0xde   :  { %v266_v35 = vsel %vm7331_vm10, %v7330_v38, %v3293_v17  ;;  %vm4858_vm8 = vmpackc.low %vm4819_vm12, %vm4819_vm12  ;;  %v7335_v17 = vmov 0  ;;  %vm7338_vm12 = vcmp.lt.s32.totalorder %v4235_v41, 112  ;;  %v7342_v62 = vmov 0 }
  0xdf   :  { %v7333_v43 = vsel %vm4858_vm8, 4294967295, %v7332_v43  ;;  %v2791_v0 = vpack.c.bf16 %v266_v35, %v265_v10  ;;  %vm4873_vm10 = vmpackc.low %vm4827_vm15, %vm4827_vm15  ;;  %v747_v29 = vsel %vm7338_vm12, %v7100_v16, %v3297_v20  ;;  %2789 = vmatprep.subr.msk.bf16.mxu1 %vm4858_vm8, %v2788_v1  ;;  %v3311_v7 = vpop.permute.xlu0 %3310  ;;  %v197_v13 = vrot.slane %v4570_v23, %v4482_v48 }
  0xe0   :  { %7334 = vst [vmem:[#allocation14_spill] sm:$0xff] %v7333_v43  ;;  %v7336_v17 = vsel %vm4873_vm10, 4294967295, %v7335_v17  ;;  %vm7339_vm14 = vmmov %vm7338_vm12  ;;  %v3313_v38 = vunpack.i.h.bf16 %v3311_v7  ;;  %v3318_v35 = vunpack.i.h.bf16 %v3316_v11  ;;  %v3317_v1 = vunpack.i.l.bf16 %v3316_v11 }
  0xe1   :  { %7337 = vst [vmem:[#allocation15_spill] sm:$0xff] %v7336_v17  ;;  %v748_v42 = vsel %vm7339_vm14, %v7099_v9, %v3298_v22  ;;  %vm7340_vm15 = vmmov %vm7338_vm12  ;;  %2792 = vmatpush1.bf16.msk.msra.mxu1 %vm4873_vm10, %v2791_v0  ;;  %v4917_v0 = vsel %vm4157_vm6, 1, %v7307_v28  ;;  %v4937_v9 = vpop.permute.xlu1 %3325 }
  0xe2   :  { %v743_v21 = vsel %vm7340_vm15, %v3297_v20, %v7104_v56  ;;  %vm7341_vm5 = vmmov %vm7338_vm12  ;;  %v2717_v5 = vpack.c.bf16 %v748_v42, %v747_v29  ;;  %v7345_v20 = vmov 0  ;;  %v193_v29 = vrot.slane %v4570_v23, %v4496_v27 }
  0xe3   :  { %v744_v6 = vsel %vm7341_vm5, %v3298_v22, %v7101_v26  ;;  %vm4898_vm12 = vmpackc.low %vm4831_vm4, %vm4831_vm4  ;;  %v3312_v22 = vunpack.i.l.bf16 %v3311_v7  ;;  %v7348_v42 = vunpack.i.l.bf16 %v4629_v49  ;;  %vm7349_vm5 = vcmp.lt.s32.totalorder %v4235_v41, 16 }
  0xe4   :  { %v7343_v62 = vsel %vm4898_vm12, 4294967295, %v7342_v62  ;;  %v2714_v10 = vpack.c.bf16 %v744_v6, %v743_v21  ;;  %vm4904_vm14 = vmpackc.low %vm770_vm3, %vm770_vm3  ;;  %v7350_v6 = vunpack.i.h.bf16 %v4629_v49  ;;  %v7352_v7 = vunpack.i.l.bf16 %v4588_v15  ;;  %v4939_v49 = vpop.permute.xlu0 %3320 }
  0xe5   :  { %7344 = vst [vmem:[#allocation16_spill] sm:$0xff] %v7343_v62  ;;  %v7346_v20 = vsel %vm4904_vm14, 4294967295, %v7345_v20  ;;  %v259_v21 = vsel %vm7349_vm5, %v3312_v22, %v7348_v42  ;;  %vm7351_vm4 = vmmov %vm7349_vm5  ;;  %v7103_v16 = vunpack.i.l.bf16 %v4937_v9 }
  0xe6   :  { %7347 = vst [vmem:[#allocation17_spill] sm:$0xff] %v7346_v20  ;;  %2715 = vmatprep.subr.msk.bf16.mxu0 %vm4898_vm12, %v2714_v10  ;;  %v260_v11 = vsel %vm7351_vm4, %v3313_v38, %v7350_v6  ;;  %vm7353_vm3 = vmmov %vm7351_vm4  ;;  %v7354_v10 = vunpack.i.h.bf16 %v4588_v15  ;;  %v7102_v6 = vunpack.i.h.bf16 %v4937_v9  ;;  %v7133_v15 = vunpack.i.l.bf16 %v4939_v49 }
  0xe7   :  { %v263_v23 = vsel %vm7353_vm3, %v7352_v7, %v3312_v22  ;;  %vm7355_vm6 = vmmov %vm7353_vm3  ;;  %2718 = vmatpush2.bf16.msk.msra.mxu0 %vm4904_vm14, %v2717_v5  ;;  %v2794_v26 = vpack.c.bf16 %v260_v11, %v259_v21  ;;  %v7132_v22 = vunpack.i.h.bf16 %v4939_v49  ;;  %v667_v21 = vrot.slane %v4917_v0, %v4216_v37 }
  0xe8   :  { %v264_v30 = vsel %vm7355_vm6, %v7354_v10, %v3313_v38  ;;  %v745_v38 = vsel %vm7340_vm15, %v7103_v16, %v3317_v1  ;;  %vm7356_vm5 = vmmov %vm7340_vm15  ;;  %vm201_vm6 = vcmp.eq.s32.totalorder %v197_v13, 1  ;;  %vm4967_vm15 = vcmp.eq.s32.totalorder %v193_v29, 1 }
  0xe9   :  { %v2797_v42 = vpack.c.bf16 %v264_v30, %v263_v23  ;;  %v746_v5 = vsel %vm7356_vm5, %v7102_v6, %v3318_v35  ;;  %2795 = vmatprep.subr.msk.bf16.mxu1 %vm4858_vm8, %v2794_v26  ;;  %vm7357_vm4 = vmmov %vm7356_vm5  ;;  %v3336_v23 = vpop.permute.xlu1 %3335  ;;  %v3331_v26 = vpop.permute.xlu0 %3330  ;;  %vm7361_vm5 = vcmp.ge.s32.totalorder %v4200_v34, 0  ;;  %vm4988_vm8 = vcmp.eq.s32.totalorder %v667_v21, 1 }
  0xea   :  { %v741_v11 = vsel %vm7357_vm4, %v3317_v1, %v7133_v15  ;;  %vm7358_vm3 = vmmov %vm7357_vm4  ;;  %v2723_v10 = vpack.c.bf16 %v746_v5, %v745_v38  ;;  %v3333_v16 = vunpack.i.h.bf16 %v3331_v26  ;;  %v3332_v56 = vunpack.i.l.bf16 %v3331_v26 }
  0xeb   :  { %v742_v7 = vsel %vm7358_vm3, %v3318_v35, %v7132_v22  ;;  %2798 = vmatpush1.bf16.msk.msra.mxu1 %vm4873_vm10, %v2797_v42  ;;  %v663_v1 = vrot.slane %v4917_v0, %v4224_v39  ;;  %vm4977_vm4 = vmand %vm4187_vm9, %vm7361_vm5  ;;  %v3338_v13 = vunpack.i.h.bf16 %v3336_v23  ;;  %v3337_v29 = vunpack.i.l.bf16 %v3336_v23 }
  0xec   :  { %v2720_v30 = vpack.c.bf16 %v742_v7, %v741_v11  ;;  %vm4984_vm10 = vmpackc.low %vm201_vm6, %vm201_vm6  ;;  %v7364_v42 = vmov 0  ;;  %vm7369_vm9 = vcmp.lt.s32.totalorder %v4235_v41, 17  ;;  %v7371_v11 = vunpack.i.l.bf16 %v4673_v55 }
  0xed   :  { %v7365_v42 = vsel %vm4984_vm10, 4294967295, %v7364_v42  ;;  %v167_v31 = vsel %vm7369_vm9, %v3332_v56, %v3267_v36  ;;  %vm7370_vm5 = vmmov %vm7369_vm9  ;;  %v7373_v21 = vunpack.i.h.bf16 %v4673_v55  ;;  %v5010_v26 = vpop.permute.xlu1 %3345  ;;  %v5019_v36 = vpop.permute.xlu0 %3340 }
  0xee   :  { %2721 = vmatprep.subr.msk.bf16.mxu0 %vm4898_vm12, %v2720_v30  ;;  %7366 = vst [vmem:[#allocation18_spill] sm:$0xff] %v7365_v42  ;;  %v168_v5 = vsel %vm7370_vm5, %v3333_v16, %v3268_v40  ;;  %vm7372_vm6 = vmmov %vm7370_vm5  ;;  %v7111_v55 = vunpack.i.h.bf16 %v5010_v26  ;;  %v7113_v6 = vunpack.i.h.bf16 %v5019_v36 }
  0xef   :  { %v171_v7 = vsel %vm7372_vm6, %v7371_v11, %v3332_v56  ;;  %vm7374_vm3 = vmmov %vm7370_vm5  ;;  %2724 = vmatpush2.bf16.msk.msra.mxu0 %vm4904_vm14, %v2723_v10  ;;  %v7112_v56 = vunpack.i.l.bf16 %v5010_v26  ;;  %v7114_v10 = vunpack.i.l.bf16 %v5019_v36  ;;  %vm7379_vm6 = vcmp.lt.s32.totalorder %v4235_v41, 113 }
  0xf0   :  { %v172_v23 = vsel %vm7374_vm3, %v7373_v21, %v3333_v16  ;;  %vm5015_vm9 = vmpackc.low %vm4967_vm15, %vm4967_vm15  ;;  %v2800_v16 = vpack.c.bf16 %v168_v5, %v167_v31  ;;  %vm7378_vm3 = vcmp.lt.s32.totalorder %v4200_v34, 16  ;;  %vm676_vm15 = vcmp.eq.s32.totalorder %v663_v1, 1 }
  0xf1   :  { %v7376_v19 = vsel %vm5015_vm9, 4294967295, %v7375_v19  ;;  %v2803_v40 = vpack.c.bf16 %v172_v23, %v171_v7  ;;  %vm111_vm5 = vmand %vm4977_vm4, %vm7378_vm3  ;;  %v653_v30 = vsel %vm7379_vm6, %v7112_v56, %v3337_v29  ;;  %v3356_v35 = vpop.permute.xlu1 %3355  ;;  %v7383_v5 = vmov 0 }
  0xf2   :  { %7377 = vst [vmem:[#allocation19_spill] sm:$0xff] %v7376_v19  ;;  %vm7380_vm14 = vmmov %vm7379_vm6  ;;  %2801 = vmatprep.subr.msk.bf16.mxu1 %vm4984_vm10, %v2800_v16  ;;  %v5057_v7 = vsel %vm111_vm5, 1, %v7307_v28  ;;  %v7386_v23 = vmov 0  ;;  %v3358_v16 = vunpack.i.h.bf16 %v3356_v35 }
  0xf3   :  { %v654_v31 = vsel %vm7380_vm14, %v7111_v55, %v3338_v13  ;;  %vm7381_vm4 = vmmov %vm7379_vm6  ;;  %2804 = vmatpush1.bf16.msk.msra.mxu1 %vm5015_vm9, %v2803_v40  ;;  %v3357_v55 = vunpack.i.l.bf16 %v3356_v35  ;;  %v573_v38 = vrot.slane %v5057_v7, %v4216_v37 }
  0xf4   :  { %v649_v34 = vsel %vm7381_vm4, %v3337_v29, %v7114_v10  ;;  %vm7382_vm3 = vmmov %vm7381_vm4  ;;  %v2729_v11 = vpack.c.bf16 %v654_v31, %v653_v30  ;;  %v3351_v29 = vpop.permute.xlu0 %3350  ;;  %v7389_v30 = vunpack.i.l.bf16 %v4777_v54 }
  0xf5   :  { %v650_v1 = vsel %vm7382_vm3, %v3338_v13, %v7113_v6  ;;  %vm5052_vm14 = vmpackc.low %vm4988_vm8, %vm4988_vm8  ;;  %v3353_v13 = vunpack.i.h.bf16 %v3351_v29  ;;  %v3352_v40 = vunpack.i.l.bf16 %v3351_v29  ;;  %vm7390_vm8 = vcmp.lt.s32.totalorder %v4235_v41, 17  ;;  %v5085_v56 = vpop.permute.xlu1 %3365 }
  0xf6   :  { %v7384_v5 = vsel %vm5052_vm14, 4294967295, %v7383_v5  ;;  %v2726_v21 = vpack.c.bf16 %v650_v1, %v649_v34  ;;  %vm5059_vm6 = vmpackc.low %vm676_vm15, %vm676_vm15  ;;  %v7391_v34 = vunpack.i.h.bf16 %v4777_v54  ;;  %v7393_v29 = vunpack.i.l.bf16 %v4746_v60 }
  0xf7   :  { %7385 = vst [vmem:[#allocation20_spill] sm:$0xff] %v7384_v5  ;;  %v7387_v23 = vsel %vm5059_vm6, 4294967295, %v7386_v23  ;;  %v165_v31 = vsel %vm7390_vm8, %v3352_v40, %v7389_v30  ;;  %vm7392_vm5 = vmmov %vm7390_vm8  ;;  %v7117_v6 = vunpack.i.l.bf16 %v5085_v56  ;;  %vm7125_vm3 = vcmp.lt.s32.totalorder %v4235_v41, 127 }
  0xf8   :  { %7388 = vst [vmem:[#allocation21_spill] sm:$0xff] %v7387_v23  ;;  %2727 = vmatprep.subr.msk.bf16.mxu0 %vm5052_vm14, %v2726_v21  ;;  %v166_v1 = vsel %vm7392_vm5, %v3353_v13, %v7391_v34  ;;  %vm7394_vm15 = vmmov %vm7392_vm5  ;;  %v7395_v21 = vunpack.i.h.bf16 %v4746_v60  ;;  %v5087_v54 = vpop.permute.xlu0 %3360  ;;  %v7115_v34 = vunpack.i.h.bf16 %v5085_v56  ;;  %vm7397_vm8 = vcmp.lt.s32.totalorder %v4235_v41, 113 }
  0xf9   :  { %v169_v35 = vsel %vm7394_vm15, %v7393_v29, %v3352_v40  ;;  %vm7396_vm4 = vmmov %vm7392_vm5  ;;  %2730 = vmatpush2.bf16.msk.msra.mxu0 %vm5059_vm6, %v2729_v11  ;;  %v2806_v10 = vpack.c.bf16 %v166_v1, %v165_v31  ;;  %v7120_v40 = vunpack.i.h.bf16 %v5087_v54  ;;  %v7116_v60 = vunpack.i.l.bf16 %v5087_v54  ;;  %v5114_v29 = vpop.permute.xlu1 %3375 }
  0xfa   :  { %v170_v37 = vsel %vm7396_vm4, %v7395_v21, %v3353_v13  ;;  %v651_v11 = vsel %vm7397_vm8, %v7117_v6, %v3357_v55  ;;  %vm7398_vm5 = vmmov %vm7397_vm8  ;;  %vm583_vm8 = vcmp.eq.s32.totalorder %v573_v38, 1  ;;  %v765_v38 = vrot.slane %v4780_v47, %v4496_v27 }
  0xfb   :  { %v2809_v30 = vpack.c.bf16 %v170_v37, %v169_v35  ;;  %v652_v13 = vsel %vm7398_vm5, %v7115_v34, %v3358_v16  ;;  %2807 = vmatprep.subr.msk.bf16.mxu1 %vm4984_vm10, %v2806_v10  ;;  %vm7399_vm15 = vmmov %vm7398_vm5  ;;  %v7118_v10 = vunpack.i.h.bf16 %v5114_v29  ;;  %v7119_v37 = vunpack.i.l.bf16 %v5114_v29 }
  0xfc   :  { %v647_v31 = vsel %vm7399_vm15, %v3357_v55, %v7116_v60  ;;  %vm7400_vm4 = vmmov %vm7398_vm5  ;;  %v2735_v35 = vpack.c.bf16 %v652_v13, %v651_v11  ;;  %v3371_v21 = vpop.permute.xlu0 %3370  ;;  %v569_v55 = vrot.slane %v5057_v7, %v4224_v39 }
  0xfd   :  { %v648_v1 = vsel %vm7400_vm4, %v3358_v16, %v7120_v40  ;;  %2810 = vmatpush1.bf16.msk.msra.mxu1 %vm5015_vm9, %v2809_v30  ;;  %v3373_v60 = vunpack.i.h.bf16 %v3371_v21  ;;  %v3372_v6 = vunpack.i.l.bf16 %v3371_v21  ;;  %v769_v16 = vrot.slane %v4780_v47, %v4482_v48  ;;  %v5136_v11 = vpop.permute.xlu1 %3385  ;;  %vm5138_vm5 = vmpackc.low %vm583_vm8, %vm583_vm8 }
  0xfe   :  { %v2732_v34 = vpack.c.bf16 %v648_v1, %v647_v31  ;;  %v7128_v13 = vunpack.i.h.bf16 %v5136_v11  ;;  %v7131_v31 = vunpack.i.l.bf16 %v5136_v11  ;;  %vm582_vm15 = vcmp.eq.s32.totalorder %v569_v55, 1 }
  0xff   :  { %v556_v30 = vsel %vm7125_vm3, %v3373_v60, %v7118_v10  ;;  %v555_v39 = vsel %vm7125_vm3, %v3372_v6, %v7119_v37  ;;  %vm5144_vm4 = vcmp.eq.s32.totalorder %v769_v16, 1  ;;  %vm5158_vm8 = vcmp.eq.s32.totalorder %v765_v38, 1 }
 0x100   :  { %2733 = vmatprep.subr.msk.bf16.mxu0 %vm5052_vm14, %v2732_v34  ;;  %v7401_v34 = vmov 0  ;;  %v3381_v47 = vpop.permute.xlu0 %3380  ;;  %v2738_v1 = vpack.c.bf16 %v556_v30, %v555_v39  ;;  %v559_v40 = vsel %vm7125_vm3, %v7131_v31, %v3372_v6  ;;  %v7408_v16 = vunpack.i.l.bf16 %v4864_v59  ;;  %vm5180_vm14 = vmpackc.low %vm582_vm15, %vm582_vm15 }
 0x101   :  { %2736 = vmatpush2.bf16.msk.msra.mxu0 %vm5059_vm6, %v2735_v35  ;;  %v7402_v34 = vsel %vm5138_vm5, 4294967295, %v7401_v34  ;;  %v3383_v21 = vunpack.i.h.bf16 %v3381_v47  ;;  %v3382_v10 = vunpack.i.l.bf16 %v3381_v47  ;;  %v560_v35 = vsel %vm7125_vm3, %v7128_v13, %v3373_v60  ;;  %v5178_v13 = vpop.permute.xlu1 %3395 }
 0x102   :  { %7403 = vst [vmem:[#allocation22_spill] sm:$0xff] %v7402_v34  ;;  %2739 = vmatprep.subr.msk.bf16.mxu0 %vm5138_vm5, %v2738_v1  ;;  %vm7409_vm9 = vcmp.lt.s32.totalorder %v4235_v41, 112  ;;  %v7410_v39 = vunpack.i.h.bf16 %v4864_v59  ;;  %v7412_v47 = vunpack.i.l.bf16 %v4853_v45  ;;  %v7414_v38 = vunpack.i.h.bf16 %v4853_v45 }
 0x103   :  { %v739_v30 = vsel %vm7409_vm9, %v7408_v16, %v3382_v10  ;;  %vm7411_vm6 = vmmov %vm7409_vm9  ;;  %v7416_v31 = vmov 0  ;;  %v7135_v22 = vunpack.i.l.bf16 %v5178_v13  ;;  %v2741_v15 = vpack.c.bf16 %v560_v35, %v559_v40 }
 0x104   :  { %v740_v60 = vsel %vm7411_vm6, %v7410_v39, %v3383_v21  ;;  %vm7413_vm3 = vmmov %vm7411_vm6  ;;  %v7417_v31 = vsel %vm5180_vm14, 4294967295, %v7416_v31  ;;  %v3391_v16 = vpop.permute.xlu0 %3390  ;;  %v7134_v39 = vunpack.i.h.bf16 %v5178_v13  ;;  %v7419_v45 = vmov 0 }
 0x105   :  { %v751_v6 = vsel %vm7413_vm3, %v3382_v10, %v7412_v47  ;;  %vm7415_vm10 = vmmov %vm7413_vm3  ;;  %7418 = vst [vmem:[#allocation23_spill] sm:$0xff] %v7417_v31  ;;  %v2815_v59 = vpack.c.bf16 %v740_v60, %v739_v30  ;;  %v3393_v10 = vunpack.i.h.bf16 %v3391_v16  ;;  %v7422_v30 = vmov 0  ;;  %2742 = vmatpush2.bf16.msk.msra.mxu0 %vm5180_vm14, %v2741_v15  ;;  %v5216_v60 = vpop.permute.xlu1 %3405 }
 0x106   :  { %v752_v1 = vsel %vm7415_vm10, %v3383_v21, %v7414_v38  ;;  %vm5189_vm9 = vmpackc.low %vm5144_vm4, %vm5144_vm4  ;;  %v3392_v21 = vunpack.i.l.bf16 %v3391_v16  ;;  %v675_v40 = vrot.slane %v4917_v0, %v4482_v48  ;;  %v671_v37 = vrot.slane %v4917_v0, %v4496_v27  ;;  %v3816_v16 = vld [vmem:[%s7031_s0 + $0x38] sm:$0xff] }
 0x107   :  { %v7420_v45 = vsel %vm5189_vm9, 4294967295, %v7419_v45  ;;  %v2812_v47 = vpack.c.bf16 %v752_v1, %v751_v6  ;;  %vm5196_vm10 = vmpackc.low %vm5158_vm8, %vm5158_vm8  ;;  %vm7425_vm6 = vcmp.lt.s32.totalorder %v4235_v41, 127  ;;  %v7138_v0 = vunpack.i.h.bf16 %v5216_v60  ;;  %v3815_v1 = vld [vmem:[%s7031_s0 + $0x28] sm:$0xff]  ;;  %v3818_v6 = vld [vmem:[%s7031_s0 + $0x30] sm:$0xff] }
 0x108   :  { %7421 = vst [vmem:[#allocation24_spill] sm:$0xff] %v7420_v45  ;;  %v7423_v30 = vsel %vm5196_vm10, 4294967295, %v7422_v30  ;;  %v554_v35 = vsel %vm7425_vm6, %v3393_v10, %v7134_v39  ;;  %vm7426_vm3 = vmmov %vm7425_vm6  ;;  %v3401_v15 = vpop.permute.xlu0 %3400  ;;  %vm5234_vm15 = vcmp.eq.s32.totalorder %v675_v40, 1  ;;  %vm5248_vm6 = vcmp.eq.s32.totalorder %v671_v37, 1  ;;  %v3819_v40 = vld [vmem:[%s7031_s0 + $0x8] sm:$0xff] }
 0x109   :  { %7424 = vst [vmem:[#allocation25_spill] sm:$0xff] %v7423_v30  ;;  %v553_v55 = vsel %vm7426_vm3, %v3392_v21, %v7135_v22  ;;  %2813 = vmatprep.subr.msk.bf16.mxu1 %vm5189_vm9, %v2812_v47  ;;  %v513_v47 = vpack.c.bf16 %v3816_v16, %v3815_v1  ;;  %v3403_v39 = vunpack.i.h.bf16 %v3401_v15  ;;  %v3402_v22 = vunpack.i.l.bf16 %v3401_v15  ;;  %vm7429_vm4 = vmmov %vm7426_vm3 }
 0x10a   :  { %2816 = vmatpush2.bf16.msk.msra.mxu1 %vm5196_vm10, %v2815_v59  ;;  %v2744_v38 = vpack.c.bf16 %v554_v35, %v553_v55  ;;  %v3817_v59 = vld [vmem:[%s7031_s0 + $0x20] sm:$0xff]  ;;  %v558_v1 = vsel %vm7429_vm4, %v7138_v0, %v3393_v10  ;;  %v7430_v15 = vunpack.i.l.bf16 %v5216_v60  ;;  %vm7431_vm8 = vmmov %vm7426_vm3  ;;  %v3820_v10 = vld [vmem:[%s7031_s0 + $0x18] sm:$0xff]  ;;  %vm7435_vm3 = vcmp.lt.s32.totalorder %v4235_v41, 112 }
 0x10b   :  { %v512_v35 = vpack.c.bf16 %v3818_v6, %v3817_v59  ;;  %v509_v6 = vpack.c.bf16 %v3820_v10, %v3819_v40  ;;  %v7434_v59 = vunpack.i.l.bf16 %v4939_v49  ;;  %vm7437_vm4 = vmmov %vm7435_vm3  ;;  %v7440_v34 = vunpack.i.h.bf16 %v4937_v9  ;;  %v3416_v10 = vpop.permute.xlu1 %3415 }
 0x10c   :  { %v557_v16 = vsel %vm7431_vm8, %v7430_v15, %v3392_v21  ;;  %2745 = vmatprep.subr.msk.bf16.mxu0 %vm5138_vm5, %v2744_v38  ;;  %v7436_v38 = vunpack.i.h.bf16 %v4939_v49  ;;  %v7438_v15 = vunpack.i.l.bf16 %v4937_v9  ;;  %vm7439_vm8 = vmmov %vm7435_vm3  ;;  %v3411_v42 = vpop.permute.xlu0 %3410  ;;  %v3418_v5 = vunpack.i.h.bf16 %v3416_v10  ;;  %v3821_v9 = vld [vmem:[%s7031_s0] sm:$0xff] }
 0x10d   :  { %v737_v21 = vsel %vm7435_vm3, %v7434_v59, %v3402_v22  ;;  %vm7441_vm5 = vmmov %vm7435_vm3  ;;  %v3417_v59 = vunpack.i.l.bf16 %v3416_v10  ;;  %v2747_v17 = vpack.c.bf16 %v558_v1, %v557_v16  ;;  %v3413_v49 = vunpack.i.h.bf16 %v3411_v42 }
 0x10e   :  { %v738_v37 = vsel %vm7437_vm4, %v7436_v38, %v3403_v39  ;;  %v749_v0 = vsel %vm7439_vm8, %v3402_v22, %v7438_v15  ;;  %v750_v40 = vsel %vm7441_vm5, %v3403_v39, %v7440_v34  ;;  %v3412_v20 = vunpack.i.l.bf16 %v3411_v42  ;;  %v3822_v22 = vld [vmem:[%s7031_s0 + $0x10] sm:$0xff] }
 0x10f   :  { %v2821_v23 = vpack.c.bf16 %v738_v37, %v737_v21  ;;  %v2818_v43 = vpack.c.bf16 %v750_v40, %v749_v0  ;;  %v581_v38 = vrot.slane %v5057_v7, %v4482_v48  ;;  %2748 = vmatpush2.bf16.msk.msra.mxu0 %vm5180_vm14, %v2747_v17  ;;  %v508_v34 = vpack.c.bf16 %v3822_v22, %v3821_v9 }
 0x110   :  { %v863_v39 = vrot.slane %v4320_v12, %v4482_v48  ;;  %v577_v42 = vrot.slane %v5057_v7, %v4496_v27  ;;  %v859_v0 = vrot.slane %v4320_v12, %v4496_v27  ;;  %v7442_v17 = vunpack.i.l.bf16 %v5019_v36  ;;  %v5308_v27 = vpop.permute.xlu1 %3425  ;;  %957 = vmatprep.subr.bf16.mxu0 %v513_v47 }
 0x111   :  { %vm7443_vm5 = vcmp.lt.s32.totalorder %v4235_v41, 113  ;;  %v7444_v16 = vunpack.i.h.bf16 %v5019_v36  ;;  %v7446_v37 = vunpack.i.l.bf16 %v5010_v26  ;;  %v7448_v7 = vunpack.i.h.bf16 %v5010_v26  ;;  %2819 = vmatprep.subr.msk.bf16.mxu1 %vm5189_vm9, %v2818_v43  ;;  %v3421_v26 = vpop.permute.xlu0 %3420 }
 0x112   :  { %v645_v1 = vsel %vm7443_vm5, %v7442_v17, %v3412_v20  ;;  %vm7445_vm3 = vmmov %vm7443_vm5  ;;  %v7450_v36 = vunpack.i.l.bf16 %v5085_v56  ;;  %v7452_v10 = vunpack.i.h.bf16 %v5085_v56  ;;  %2822 = vmatpush2.bf16.msk.msra.mxu1 %vm5196_vm10, %v2821_v23  ;;  %v7453_v43 = vmov 0 }
 0x113   :  { %v646_v21 = vsel %vm7445_vm3, %v7444_v16, %v3413_v49  ;;  %vm7447_vm4 = vmmov %vm7445_vm3  ;;  %v3422_v9 = vunpack.i.l.bf16 %v3421_v26  ;;  %v7456_v56 = vmov 0  ;;  %v7461_v47 = vunpack.i.h.bf16 %v5087_v54  ;;  %958 = vmatpush2.bf16.msra.mxu0 %v512_v35 }
 0x114   :  { %v657_v48 = vsel %vm7447_vm4, %v3412_v20, %v7446_v37  ;;  %vm7449_vm8 = vmmov %vm7445_vm3  ;;  %v2827_v15 = vpack.c.bf16 %v646_v21, %v645_v1  ;;  %v656_v20 = vsel %vm7445_vm3, %v3418_v5, %v7452_v10  ;;  %v7463_v17 = vunpack.i.l.bf16 %v5087_v54  ;;  %v3436_v35 = vpop.permute.xlu1 %3435  ;;  %959 = vmatprep.subr.bf16.mxu0 %v509_v6 }
 0x115   :  { %v658_v12 = vsel %vm7449_vm8, %v3413_v49, %v7448_v7  ;;  %vm7451_vm5 = vmmov %vm7445_vm3  ;;  %v3423_v49 = vunpack.i.h.bf16 %v3421_v26  ;;  %vm5346_vm10 = vcmp.eq.s32.totalorder %v863_v39, 1  ;;  %v7468_v16 = vunpack.i.l.bf16 %v5136_v11 }
 0x116   :  { %v655_v40 = vsel %vm7451_vm5, %v3417_v59, %v7450_v36  ;;  %vm5323_vm4 = vmpackc.low %vm5234_vm15, %vm5234_vm15  ;;  %v2824_v22 = vpack.c.bf16 %v658_v12, %v657_v48  ;;  %vm5334_vm5 = vcmp.eq.s32.totalorder %v581_v38, 1  ;;  %v643_v1 = vsel %vm7445_vm3, %v7463_v17, %v3417_v59 }
 0x117   :  { %v7454_v43 = vsel %vm5323_vm4, 4294967295, %v7453_v43  ;;  %vm5330_vm8 = vmpackc.low %vm5248_vm6, %vm5248_vm6  ;;  %vm5350_vm6 = vcmp.eq.s32.totalorder %v577_v42, 1  ;;  %vm7469_vm14 = vcmp.lt.s32.totalorder %v4235_v41, 127  ;;  %v2830_v59 = vpack.c.bf16 %v656_v20, %v655_v40  ;;  %v3766_v20 = vld [vmem:[#allocation2] ss:$12 sps:$4 sm:$0xff]   ;;  %960 = vmatpush2.bf16.msra.mxu0 %v508_v34 }
 0x118   :  { %7455 = vst [vmem:[#allocation26_spill] sm:$0xff] %v7454_v43  ;;  %v7457_v56 = vsel %vm5330_vm8, 4294967295, %v7456_v56  ;;  %vm7462_vm15 = vmmov %vm7445_vm3  ;;  %v563_v21 = vsel %vm7469_vm14, %v3422_v9, %v7468_v16  ;;  %2825 = vmatprep.subr.msk.bf16.mxu1 %vm5323_vm4, %v2824_v22  ;;  %vm5364_vm3 = vcmp.eq.s32.totalorder %v859_v0, 1  ;;  %v3428_v42 = vunpack.i.h.bf16 %v5308_v27 }
 0x119   :  { %7458 = vst [vmem:[#allocation27_spill] sm:$0xff] %v7457_v56  ;;  %v644_v55 = vsel %vm7462_vm15, %v7461_v47, %v3418_v5  ;;  %v7470_v5 = vunpack.i.h.bf16 %v5136_v11  ;;  %vm7471_vm15 = vmmov %vm7469_vm14  ;;  %v3427_v37 = vunpack.i.l.bf16 %v5308_v27  ;;  %2828 = vmatpush2.bf16.msk.msra.mxu1 %vm5330_vm8, %v2827_v15  ;;  %v3431_v11 = vpop.permute.xlu0 %3430  ;;  %v3438_v48 = vunpack.i.h.bf16 %v3436_v35 }
 0x11a   :  { %v3437_v7 = vunpack.i.l.bf16 %v3436_v35  ;;  %v2833_v12 = vpack.c.bf16 %v644_v55, %v643_v1  ;;  %v7474_v36 = vunpack.i.l.bf16 %v5114_v29  ;;  %v3433_v40 = vunpack.i.h.bf16 %v3431_v11  ;;  %2831 = vmatprep.subr.msk.bf16.mxu1 %vm5323_vm4, %v2830_v59  ;;  %vm5393_vm4 = vmpackc.low %vm5334_vm5, %vm5334_vm5  ;;  %962 = vmatmul.mubr.bf16.vlgmr.msra.gmra.mxu0 %v3766_v20 }
 0x11b   :  { %v564_v54 = vsel %vm7471_vm15, %v3423_v49, %v7470_v5  ;;  %v3432_v10 = vunpack.i.l.bf16 %v3431_v11  ;;  %v7475_v27 = vunpack.i.h.bf16 %v5114_v29  ;;  %vm7476_vm15 = vmmov %vm7469_vm14  ;;  %v7477_v26 = vunpack.i.l.bf16 %v4471_v50 }
 0x11c   :  { %v551_v0 = vsel %vm7469_vm14, %v7474_v36, %v3422_v9  ;;  %vm7478_vm9 = vcmp.lt.s32.totalorder %v4235_v41, 111  ;;  %v7479_v22 = vunpack.i.h.bf16 %v4471_v50  ;;  %v7481_v47 = vmov 0  ;;  %vm5416_vm12 = vmpackc.low %vm5346_vm10, %vm5346_vm10 }
 0x11d   :  { %v552_v15 = vsel %vm7476_vm15, %v7475_v27, %v3423_v49  ;;  %v843_v6 = vsel %vm7478_vm9, %v3437_v7, %v7477_v26  ;;  %vm7480_vm14 = vmmov %vm7478_vm9  ;;  %v7482_v47 = vsel %vm5393_vm4, 4294967295, %v7481_v47  ;;  %v2836_v29 = vpack.c.bf16 %v564_v54, %v563_v21  ;;  %v3770_v49 = vld [vmem:[#allocation2 + $0x1c] ss:$12 sps:$4 sm:$0xff]   ;;  %2834 = vmatpush2.bf16.msk.msra.mxu1 %vm5330_vm8, %v2833_v12 }
 0x11e   :  { %v844_v9 = vsel %vm7480_vm14, %v3438_v48, %v7479_v22  ;;  %7483 = vst [vmem:[#allocation28_spill] sm:$0xff] %v7482_v47  ;;  %v7484_v55 = vunpack.i.l.bf16 %v4364_v32  ;;  %vm7485_vm15 = vmmov %vm7478_vm9  ;;  %v7486_v50 = vunpack.i.h.bf16 %v4364_v32  ;;  %v7487_v34 = vunpack.i.l.bf16 %v4379_v57  ;;  %971 = vmatprep.mubr.bf16.mxu0 %v3770_v49  ;;  %v3825_v22 = vld [vmem:[%s7031_s0 + $0x60] sm:$0xff] }
 0x11f   :  { %vm7488_vm14 = vmmov %vm7478_vm9  ;;  %v7489_v16 = vunpack.i.h.bf16 %v4379_v57  ;;  %v7491_v5 = vmov 0  ;;  %v7494_v32 = vunpack.i.l.bf16 %v5216_v60  ;;  %v7496_v35 = vunpack.i.h.bf16 %v5216_v60  ;;  %2837 = vmatprep.subr.msk.bf16.mxu1 %vm5393_vm4, %v2836_v29 }
 0x120   :  { %v833_v17 = vsel %vm7485_vm15, %v7484_v55, %v3432_v10  ;;  %v834_v1 = vsel %vm7478_vm9, %v7486_v50, %v3433_v40  ;;  %v845_v23 = vsel %vm7488_vm14, %v3432_v10, %v7487_v34  ;;  %vm7490_vm5 = vmmov %vm7478_vm9  ;;  %v7492_v5 = vsel %vm5416_vm12, 4294967295, %v7491_v5  ;;  %v3827_v55 = vld [vmem:[%s7031_s0 + $0x48] sm:$0xff]  ;;  %v3830_v34 = vld [vmem:[%s7031_s0 + $0x50] sm:$0xff] }
 0x121   :  { %v846_v21 = vsel %vm7490_vm5, %v3433_v40, %v7489_v16  ;;  %7493 = vst [vmem:[#allocation29_spill] sm:$0xff] %v7492_v5  ;;  %vm7495_vm15 = vcmp.lt.s32.totalorder %v4235_v41, 127  ;;  %v2851_v59 = vpack.c.bf16 %v834_v1, %v833_v17  ;;  %vm5433_vm10 = vmpackc.low %vm5364_vm3, %vm5364_vm3  ;;  %v7498_v11 = vmov 0  ;;  %v3828_v17 = vld [vmem:[%s7031_s0 + $0x58] sm:$0xff]  ;;  %v3829_v1 = vld [vmem:[%s7031_s0 + $0x40] sm:$0xff] }
 0x122   :  { %v561_v54 = vsel %vm7495_vm15, %v3427_v37, %v7494_v32  ;;  %vm7497_vm9 = vmmov %vm7495_vm15  ;;  %v2848_v19 = vpack.c.bf16 %v846_v21, %v845_v23  ;;  %v7499_v11 = vsel %vm5433_vm10, 4294967295, %v7498_v11  ;;  %v2839_v36 = vpack.c.bf16 %v552_v15, %v551_v0 }
 0x123   :  { %v562_v57 = vsel %vm7497_vm9, %v3428_v42, %v7496_v35  ;;  %7500 = vst [vmem:[#allocation30_spill] sm:$0xff] %v7499_v11  ;;  %vm5442_vm14 = vmpackc.low %vm5350_vm6, %vm5350_vm6  ;;  %v7501_v60 = vmov 0  ;;  %v7504_v12 = vunpack.i.l.bf16 %v4454_v58  ;;  %v7505_v40 = vunpack.i.h.bf16 %v4454_v58 }
 0x124   :  { %v7502_v60 = vsel %vm5442_vm14, 4294967295, %v7501_v60  ;;  %vm7506_vm3 = vmmov %vm7490_vm5  ;;  %2849 = vmatprep.subr.msk.bf16.mxu0 %vm5416_vm12, %v2848_v19  ;;  %v2854_v10 = vpack.c.bf16 %v844_v9, %v843_v6  ;;  %v7507_v38 = vunpack.i.l.bf16 %v5178_v13  ;;  %v7509_v15 = vunpack.i.h.bf16 %v5178_v13  ;;  %2840 = vmatpush2.bf16.msk.msra.mxu1 %vm5442_vm14, %v2839_v36  ;;  %v3823_v13 = vld [vmem:[%s7031_s0 + $0x68] sm:$0xff]  ;;  %v3826_v9 = vld [vmem:[%s7031_s0 + $0x70] sm:$0xff] }
 0x125   :  { %7503 = vst [vmem:[#allocation31_spill] sm:$0xff] %v7502_v60  ;;  %v831_v39 = vsel %vm7490_vm5, %v7504_v12, %v3437_v7  ;;  %v832_v0 = vsel %vm7506_vm3, %v7505_v40, %v3438_v48  ;;  %vm7508_vm6 = vmmov %vm7497_vm9  ;;  %2852 = vmatpush1.bf16.msk.msra.mxu0 %vm5433_vm10, %v2851_v59  ;;  %v2842_v58 = vpack.c.bf16 %v562_v57, %v561_v54  ;;  %vm7511_vm9 = vcmask 261120  }
 0x126   :  { %v549_v27 = vsel %vm7508_vm6, %v7507_v38, %v3427_v37  ;;  %vm7510_vm15 = vmmov %vm7508_vm6  ;;  %2855 = vmatprep.subr.msk.bf16.mxu0 %vm5416_vm12, %v2854_v10  ;;  %v2857_v48 = vpack.c.bf16 %v832_v0, %v831_v39  ;;  %v3772_v37 = vld [vmem:[#allocation2 + $0x18] ss:$12 sps:$4 sm:$0xff]   ;;  %v514_v29 = vpack.c.bf16 %v3826_v9, %v3825_v22  ;;  %v511_v50 = vpack.c.bf16 %v3828_v17, %v3827_v55 }
 0x127   :  { %v550_v7 = vsel %vm7510_vm15, %v7509_v15, %v3428_v42  ;;  %2843 = vmatprep.subr.msk.bf16.mxu1 %vm5393_vm4, %v2842_v58  ;;  %v3824_v42 = vld [vmem:[%s7031_s0 + $0x78] sm:$0xff]  ;;  %972 = vmatmul.mubr.bf16.gmra.mxu0 %v3772_v37  ;;  %v510_v23 = vpack.c.bf16 %v3830_v34, %v3829_v1  ;;  %vm7512_vm5 = vmmov %vm7511_vm9  ;;  %vm7529_vm3 = vcmp.lt.s32.totalorder %v4235_v41, 1 }
 0x128   :  { %v515_v26 = vpack.c.bf16 %v3824_v42, %v3823_v13  ;;  %v2845_v6 = vpack.c.bf16 %v550_v7, %v549_v27  ;;  %1120 = vmatprep.mubr.bf16.mxu0 %v7307_v28  ;;  %vm7530_vm6 = vmmov %vm7529_vm3 }
 0x129   :  { %2858 = vmatpush1.bf16.msk.msra.mxu0 %vm5433_vm10, %v2857_v48  ;;  %vm7532_vm15 = vmmov %vm7529_vm3 }
 0x12a   :  { %2846 = vmatpush2.bf16.msk.msra.mxu1 %vm5442_vm14, %v2845_v6 }
 0x12b   :  { %1063 = vmatprep.subr.bf16.mxu1 %v515_v26 }
 0x12e   :  { %1064 = vmatpush2.bf16.msra.mxu1 %v514_v29 }
 0x12f   :  { %1065 = vmatprep.subr.bf16.mxu1 %v511_v50  ;;  %2859 = vmatmul.mubr.msk.bf16.vlgmr.msra.gmra.mxu0 %vm7511_vm9, %v4512_v4  ;;  %vm7534_vm9 = vmmov %vm7529_vm3 }
 0x130   :  { %1130 = vmatprep.mubr.bf16.mxu0 %v7307_v28 }
 0x132   :  { %1066 = vmatpush2.bf16.msra.mxu1 %v510_v23 }
 0x135   :  { %1068 = vmatmul.mubr.bf16.vlgmr.msra.gmra.mxu1 %v3766_v20 }
 0x136   :  { %1077 = vmatprep.mubr.bf16.mxu1 %v3770_v49 }
 0x137   :  { %2860 = vmatmul.mubr.msk.bf16.gmra.mxu0 %vm7512_vm5, %v4613_v44  ;;  %vm7536_vm5 = vcmp.lt.s32.totalorder %v4235_v41, 15 }
 0x138   :  { %2042 = vmatprep.mubr.bf16.mxu0 %v7307_v28 }
 0x13d   :  { %1078 = vmatmul.mubr.bf16.gmra.mxu1 %v3772_v37 }
 0x17a   :  { %v1016_v16 = vpop.f32.mrf.mxu1 }
 0x17c   :  { %v1018_v21 = vpop.f32.mrf.mxu1 }
 0x17e   :  { %v1020_v32 = vpop.f32.mrf.mxu1 }
 0x180   :  { %v1022_v35 = vpop.f32.mrf.mxu1 }
 0x182   :  { %v1026_v59 = vpop.f32.mrf.mxu1 }
 0x184   :  { %v1028_v4 = vpop.f32.mrf.mxu1 }
 0x186   :  { %v1030_v20 = vpop.f32.mrf.mxu1 }
 0x188   :  { %v1032_v0 = vpop.f32.mrf.mxu1 }
 0x1da   :  { %v963_v54 = vpop.f32.mrf.mxu0 }
 0x1db   :  { %v5521_v50 = vadd.f32 %v1016_v16, %v963_v54 }
 0x1dc   :  { %v965_v57 = vpop.f32.mrf.mxu0 }
 0x1dd   :  { %v5523_v1 = vadd.f32 %v1018_v21, %v965_v57 }
 0x1de   :  { %v967_v19 = vpop.f32.mrf.mxu0 }
 0x1e0   :  { %v969_v36 = vpop.f32.mrf.mxu0 }
 0x1e1   :  { %v5525_v34 = vadd.f32 %v1022_v35, %v969_v36 }
 0x1e7   :  { %v973_v12 = vpop.f32.mrf.mxu0 }
 0x1e8   :  { %v5507_v7 = vadd.f32 %v1026_v59, %v973_v12 }
 0x1e9   :  { %v975_v39 = vpop.f32.mrf.mxu0 }
 0x1ea   :  { %v5509_v58 = vadd.f32 %v1028_v4, %v975_v39  ;;  %v1169_v26 = vmul.f32 %v5507_v7, %v5507_v7 }
 0x1eb   :  { %v977_v49 = vpop.f32.mrf.mxu0 }
 0x1ec   :  { %v1170_v6 = vmul.f32 %v5509_v58, %v5509_v58  ;;  %v1151_v55 = vadd.f32 %v5509_v58, %v5507_v7  ;;  %v5527_v23 = vadd.f32 %v1030_v20, %v977_v49 }
 0x1ed   :  { %v979_v40 = vpop.f32.mrf.mxu0 }
 0x1ee   :  { %v5515_v22 = vadd.f32 %v1032_v0, %v979_v40  ;;  %v1187_v0 = vadd.f32 %v1170_v6, %v1169_v26 }
 0x1ef   :  { %v1122_v44 = vpop.f32.mrf.mxu0 }
 0x1f0   :  { %v1156_v16 = vadd.f32 %v5515_v22, %v5527_v23  ;;  %v1174_v26 = vmul.f32 %v5515_v22, %v5515_v22 }
 0x1f1   :  { %v1124_v38 = vpop.f32.mrf.mxu0 }
 0x1f3   :  { %v1126_v15 = vpop.f32.mrf.mxu0 }
 0x1f5   :  { %v1069_v10 = vpop.f32.mrf.mxu1  ;;  %v1128_v37 = vpop.f32.mrf.mxu0 }
 0x1f6   :  { %v5538_v21 = vadd.f32 %v1122_v44, %v1069_v10  ;;  %v1162_v44 = vmul.f32 %v5523_v1, %v5523_v1 }
 0x1f7   :  { %v1071_v27 = vpop.f32.mrf.mxu1  ;;  %v1132_v42 = vpop.f32.mrf.mxu0 }
 0x1f9   :  { %v1073_v48 = vpop.f32.mrf.mxu1  ;;  %v1134_v29 = vpop.f32.mrf.mxu0 }
 0x1fa   :  { %v5540_v54 = vadd.f32 %v1126_v15, %v1073_v48  ;;  %v1173_v48 = vmul.f32 %v5527_v23, %v5527_v23 }
 0x1fb   :  { %v1075_v13 = vpop.f32.mrf.mxu1  ;;  %v1136_v4 = vpop.f32.mrf.mxu0 }
 0x1fd   :  { %v1079_v9 = vpop.f32.mrf.mxu1  ;;  %v1138_v57 = vpop.f32.mrf.mxu0 }
 0x1fe   :  { %v5519_v17 = vadd.f32 %v1132_v42, %v1079_v9  ;;  %v5534_v42 = vadd.f32 %v1020_v32, %v967_v19  ;;  %v1161_v32 = vmul.f32 %v5521_v50, %v5521_v50  ;;  %v1141_v19 = vadd.f32 %v5523_v1, %v5521_v50 }
 0x1ff   :  { %v1081_v59 = vpop.f32.mrf.mxu1 }
 0x200   :  { %v1171_v12 = vmul.f32 %v5519_v17, %v5519_v17  ;;  %v5531_v39 = vadd.f32 %v1134_v29, %v1081_v59  ;;  %v1152_v40 = vadd.f32 %v1151_v55, %v5519_v17  ;;  %v1146_v10 = vadd.f32 %v5525_v34, %v5534_v42 }
 0x201   :  { %v1083_v35 = vpop.f32.mrf.mxu1  ;;  %v1163_v55 = vmul.f32 %v5538_v21, %v5538_v21  ;;  %v5564_v59 = vadd.f32 %v1124_v38, %v1071_v27  ;;  %v1192_v38 = vadd.f32 %v1174_v26, %v1173_v48  ;;  %v1165_v27 = vmul.f32 %v5534_v42, %v5534_v42 }
 0x202   :  { %v5542_v36 = vadd.f32 %v1136_v4, %v1083_v35  ;;  %v1153_v20 = vadd.f32 %v1152_v40, %v5531_v39  ;;  %v1172_v49 = vmul.f32 %v5531_v39, %v5531_v39  ;;  %v1188_v9 = vadd.f32 %v1187_v0, %v1171_v12 }
 0x203   :  { %v1085_v15 = vpop.f32.mrf.mxu1  ;;  %v5566_v4 = vadd.f32 %v1128_v37, %v1075_v13  ;;  %v1142_v12 = vadd.f32 %v1141_v19, %v5538_v21  ;;  %v1164_v13 = vmul.f32 %v5564_v59, %v5564_v59 }
 0x204   :  { %v5559_v6 = vadd.f32 %v1138_v57, %v1085_v15  ;;  %1154 = vadd.xlane.f32.xlu0 %v1153_v20  ;;  %v1157_v29 = vadd.f32 %v1156_v16, %v5542_v36  ;;  %v1175_v40 = vmul.f32 %v5542_v36, %v5542_v36  ;;  %v1189_v0 = vadd.f32 %v1188_v9, %v1172_v49 }
 0x205   :  { %v1147_v57 = vadd.f32 %v1146_v10, %v5540_v54  ;;  %v1177_v20 = vadd.f32 %v1162_v44, %v1161_v32  ;;  %v1166_v16 = vmul.f32 %v5525_v34, %v5525_v34  ;;  %v1143_v37 = vadd.f32 %v1142_v12, %v5564_v59 }
 0x206   :  { %v1158_v35 = vadd.f32 %v1157_v29, %v5559_v6  ;;  %v1167_v9 = vmul.f32 %v5540_v54, %v5540_v54  ;;  %v1176_v19 = vmul.f32 %v5559_v6, %v5559_v6  ;;  %v1193_v44 = vadd.f32 %v1192_v38, %v1175_v40 }
 0x207   :  { %v1178_v49 = vadd.f32 %v1177_v20, %v1163_v55  ;;  %v1148_v32 = vadd.f32 %v1147_v57, %v5566_v4  ;;  %v1182_v10 = vadd.f32 %v1166_v16, %v1165_v27  ;;  %v1168_v26 = vmul.f32 %v5566_v4, %v5566_v4 }
 0x208   :  { %1190 = vadd.xlane.f32.xlu0 %v1189_v0  ;;  %1159 = vadd.xlane.f32.xlu1 %v1158_v35  ;;  %v1194_v15 = vadd.f32 %v1193_v44, %v1176_v19 }
 0x209   :  { %v1179_v48 = vadd.f32 %v1178_v49, %v1164_v13  ;;  %v1183_v29 = vadd.f32 %v1182_v10, %v1167_v9 }
 0x20b   :  { %v1184_v55 = vadd.f32 %v1183_v29, %v1168_v26 }
 0x20c   :  { %1149 = vadd.xlane.f32.xlu0 %v1148_v32  ;;  %1144 = vadd.xlane.f32.xlu1 %v1143_v37 }
 0x210   :  { %1195 = vadd.xlane.f32.xlu0 %v1194_v15  ;;  %1180 = vadd.xlane.f32.xlu1 %v1179_v48 }
 0x214   :  { %1185 = vadd.xlane.f32.xlu0 %v1184_v55 }
 0x28d   :  { %v1155_v12 = vpop.xlane.xlu0 %1154 }
 0x28e   :  { %v1199_v0 = vmul.f32 0.001953125, %v1155_v12 }
 0x290   :  { %v1207_v20 = vmul.f32 %v1199_v0, %v1199_v0 }
 0x291   :  { %v1191_v35 = vpop.xlane.xlu0 %1190  ;;  %v1160_v57 = vpop.xlane.xlu1 %1159 }
 0x292   :  { %v1203_v60 = vmul.f32 0.001953125, %v1191_v35  ;;  %v1200_v38 = vmul.f32 0.001953125, %v1160_v57 }
 0x294   :  { %v1211_v40 = vsub.f32 %v1203_v60, %v1207_v20  ;;  %v1208_v49 = vmul.f32 %v1200_v38, %v1200_v38 }
 0x295   :  { %v1150_v37 = vpop.xlane.xlu0 %1149  ;;  %v1145_v16 = vpop.xlane.xlu1 %1144 }
 0x296   :  { %v1219_v27 = vadd.f32 1e-05, %v1211_v40  ;;  %v1197_v13 = vmul.f32 0.001953125, %v1145_v16  ;;  %v1198_v19 = vmul.f32 0.001953125, %v1150_v37  ;;  %v1215_v40 = vld [vmem:[%s7035_s4 + $0x10] sm:$0xff] }
 0x298   :  { %3783 = vrsqrt.f32 %v1219_v27  ;;  %v1205_v44 = vmul.f32 %v1197_v13, %v1197_v13  ;;  %v1206_v55 = vmul.f32 %v1198_v19, %v1198_v19  ;;  %v1216_v27 = vld [vmem:[%s7035_s4 + $0x18] sm:$0xff] }
 0x299   :  { %v1196_v32 = vpop.xlane.xlu0 %1195  ;;  %v1181_v9 = vpop.xlane.xlu1 %1180 }
 0x29a   :  { %v1204_v10 = vmul.f32 0.001953125, %v1196_v32  ;;  %v1201_v15 = vmul.f32 0.001953125, %v1181_v9 }
 0x29c   :  { %v1212_v48 = vsub.f32 %v1204_v10, %v1208_v49  ;;  %v1209_v26 = vsub.f32 %v1201_v15, %v1205_v44  ;;  %v1213_v49 = vld [vmem:[%s7035_s4] sm:$0xff]  ;;  %v1214_v15 = vld [vmem:[%s7035_s4 + $0x8] sm:$0xff] }
 0x29d   :  { %v1186_v29 = vpop.xlane.xlu0 %1185 }
 0x29e   :  { %v1220_v12 = vadd.f32 1e-05, %v1212_v48  ;;  %v1217_v35 = vadd.f32 1e-05, %v1209_v26  ;;  %v1202_v60 = vmul.f32 0.001953125, %v1186_v29 }
 0x2a0   :  { %3785 = vrsqrt.f32 %v1220_v12  ;;  %v1210_v57 = vsub.f32 %v1202_v60, %v1206_v55  ;;  %v1229_v55 = vld [vmem:[%s7036_s5] sm:$0xff]  ;;  %v1230_v60 = vld [vmem:[%s7036_s5 + $0x8] sm:$0xff] }
 0x2a1   :  { %3787 = vrsqrt.f32 %v1217_v35 }
 0x2a2   :  { %v1218_v20 = vadd.f32 1e-05, %v1210_v57 }
 0x2a4   :  { %3789 = vrsqrt.f32 %v1218_v20 }
 0x2a5   :  { %v3784_v37 = vpop.eup %3783 }
 0x2a6   :  { %v1227_v16 = vmul.f32 %v3784_v37, %v1215_v40  ;;  %v1231_v40 = vld [vmem:[%s7036_s5 + $0x10] sm:$0xff] }
 0x2a8   :  { %1253 = vperm.xlu1 %3439, %v1227_v16   ;;  %v1235_v20 = vmul.f32 %v1227_v16, %v1199_v0 }
 0x2ad   :  { %v3786_v32 = vpop.eup %3785 }
 0x2ae   :  { %v3788_v9 = vpop.eup %3787  ;;  %v1228_v44 = vmul.f32 %v3786_v32, %v1216_v27  ;;  %v1232_v27 = vld [vmem:[%s7036_s5 + $0x18] sm:$0xff] }
 0x2af   :  { %v1225_v10 = vmul.f32 %v3788_v9, %v1213_v49 }
 0x2b0   :  { %1258 = vperm.xlu0 %3440, %v1228_v44   ;;  %v1236_v37 = vmul.f32 %v1228_v44, %v1200_v38 }
 0x2b1   :  { %v3790_v48 = vpop.eup %3789  ;;  %1243 = vperm.xlu1 %3439, %v1225_v10   ;;  %v1233_v29 = vmul.f32 %v1225_v10, %v1197_v13  ;;  %v1239_v13 = vsub.f32 %v1231_v40, %v1235_v20 }
 0x2b2   :  { %v1226_v26 = vmul.f32 %v3790_v48, %v1214_v15 }
 0x2b3   :  { %v1237_v12 = vsub.f32 %v1229_v55, %v1233_v29 }
 0x2b4   :  { %v1234_v35 = vmul.f32 %v1226_v26, %v1198_v19  ;;  %v1240_v19 = vsub.f32 %v1232_v27, %v1236_v37 }
 0x2b5   :  { %1248 = vperm.xlu1 %3439, %v1226_v26  }
 0x2b6   :  { %v1238_v57 = vsub.f32 %v1230_v60, %v1234_v35 }
 0x2b9   :  { %1279 = vperm.xlu1 %3439, %v1237_v12  }
 0x2bd   :  { %1284 = vperm.xlu1 %3439, %v1238_v57  }
 0x2c1   :  { %1289 = vperm.xlu1 %3439, %v1239_v13  }
 0x2c5   :  { %1294 = vperm.xlu1 %3439, %v1240_v19  }
 0x323   :  { %v1254_v49 = vpop.permute.xlu1 %1253 }
 0x32c   :  { %v1244_v32 = vpop.permute.xlu1 %1243 }
 0x32d   :  { %v1261_v0 = vmul.f32 %v1244_v32, %v5521_v50  ;;  %v1262_v16 = vmul.f32 %v1244_v32, %v5523_v1  ;;  %v1264_v35 = vmul.f32 %v1244_v32, %v5564_v59  ;;  %v1263_v27 = vmul.f32 %v1244_v32, %v5538_v21 }
 0x330   :  { %v1249_v9 = vpop.permute.xlu1 %1248 }
 0x331   :  { %v1265_v15 = vmul.f32 %v1249_v9, %v5534_v42  ;;  %v1266_v48 = vmul.f32 %v1249_v9, %v5525_v34  ;;  %v1268_v38 = vmul.f32 %v1249_v9, %v5566_v4  ;;  %v1267_v37 = vmul.f32 %v1249_v9, %v5540_v54 }
 0x334   :  { %v1280_v10 = vpop.permute.xlu1 %1279 }
 0x335   :  { %v5616_v44 = vadd.f32 %v1280_v10, %v1261_v0  ;;  %v5618_v26 = vadd.f32 %v1280_v10, %v1262_v16  ;;  %v1300_v42 = vadd.f32 %v1280_v10, %v1264_v35  ;;  %v1259_v16 = vpop.permute.xlu0 %1258 }
 0x336   :  { %v1276_v9 = vmul.f32 %v1259_v16, %v5559_v6  ;;  %v1273_v21 = vmul.f32 %v1259_v16, %v5527_v23  ;;  %v1274_v32 = vmul.f32 %v1259_v16, %v5515_v22  ;;  %v1271_v6 = vmul.f32 %v1254_v49, %v5519_v17 }
 0x337   :  { %v1313_v34 = vmax.f32 %v5616_v44, 0.0  ;;  %v1314_v4 = vmax.f32 %v5618_v26, 0.0  ;;  %v1316_v59 = vmax.f32 %v1300_v42, 0.0  ;;  %v1272_v44 = vmul.f32 %v1254_v49, %v5531_v39 }
 0x338   :  { %v1285_v29 = vpop.permute.xlu1 %1284 }
 0x339   :  { %v5620_v55 = vadd.f32 %v1285_v29, %v1265_v15  ;;  %v1302_v12 = vadd.f32 %v1285_v29, %v1266_v48  ;;  %v5623_v60 = vadd.f32 %v1285_v29, %v1268_v38  ;;  %v1303_v19 = vadd.f32 %v1285_v29, %v1267_v37 }
 0x33a   :  { %v1299_v15 = vadd.f32 %v1280_v10, %v1263_v27  ;;  %v1269_v38 = vmul.f32 %v1254_v49, %v5507_v7  ;;  %v1270_v29 = vmul.f32 %v1254_v49, %v5509_v58  ;;  %v1275_v7 = vmul.f32 %v1259_v16, %v5542_v36 }
 0x33b   :  { %v1317_v50 = vmax.f32 %v5620_v55, 0.0  ;;  %v1318_v1 = vmax.f32 %v1302_v12, 0.0  ;;  %v1320_v57 = vmax.f32 %v5623_v60, 0.0  ;;  %v1319_v48 = vmax.f32 %v1303_v19, 0.0 }
 0x33c   :  { %v1290_v13 = vpop.permute.xlu1 %1289  ;;  %v1315_v26 = vmax.f32 %v1299_v15, 0.0 }
 0x33d   :  { %v5629_v20 = vpack.i.bf16 %v1318_v1, %v1314_v4  ;;  %v5631_v40 = vpack.i.bf16 %v1317_v50, %v1313_v34  ;;  %v5639_v0 = vpack.i.bf16 %v1320_v57, %v1316_v59  ;;  %v1308_v55 = vadd.f32 %v1290_v13, %v1272_v44 }
 0x33e   :  { %v3471_v23 = vpack.i.bf16 %v1319_v48, %v1315_v26  ;;  %v1305_v35 = vadd.f32 %v1290_v13, %v1269_v38  ;;  %v1306_v22 = vadd.f32 %v1290_v13, %v1270_v29  ;;  %v1307_v42 = vadd.f32 %v1290_v13, %v1271_v6 }
 0x33f   :  { %3447 = vrot.lane.b32.xlu0 %v5629_v20, %s3910_s24  ;;  %3442 = vrot.lane.b32.xlu1 %v5631_v40, %s3910_s24  ;;  %v1324_v27 = vmax.f32 %v1308_v55, 0.0  ;;  %v5672_v38 = vpack.c.bf16 %v1317_v50, %v1313_v34 }
 0x340   :  { %v1295_v54 = vpop.permute.xlu1 %1294  ;;  %v1321_v17 = vmax.f32 %v1305_v35, 0.0  ;;  %v1322_v49 = vmax.f32 %v1306_v22, 0.0  ;;  %v1323_v16 = vmax.f32 %v1307_v42, 0.0 }
 0x341   :  { %v1312_v10 = vadd.f32 %v1295_v54, %v1276_v9  ;;  %v1309_v39 = vadd.f32 %v1295_v54, %v1273_v21  ;;  %v1310_v12 = vadd.f32 %v1295_v54, %v1274_v32  ;;  %v1311_v60 = vadd.f32 %v1295_v54, %v1275_v7  ;;  %7516 = vst [vmem:[#allocation35_spill] sm:$0xff] %v5672_v38 }
 0x342   :  { %v5670_v9 = vpack.c.bf16 %v1318_v1, %v1314_v4  ;;  %v5678_v32 = vpack.c.bf16 %v1320_v57, %v1316_v59 }
 0x343   :  { %3457 = vrot.lane.b32.xlu0 %v5631_v40, %s3911_s16  ;;  %3452 = vrot.lane.b32.xlu1 %v5639_v0, %s3910_s24  ;;  %v1328_v37 = vmax.f32 %v1312_v10, 0.0  ;;  %v1325_v58 = vmax.f32 %v1309_v39, 0.0  ;;  %v1326_v19 = vmax.f32 %v1310_v12, 0.0  ;;  %v1327_v36 = vmax.f32 %v1311_v60, 0.0 }
 0x344   :  { %7515 = vst [vmem:[#allocation34_spill] sm:$0xff] %v5670_v9  ;;  %7519 = vst [vmem:[#allocation38_spill] sm:$0xff] %v5678_v32  ;;  %v5683_v10 = vpack.c.bf16 %v1319_v48, %v1315_v26  ;;  %v5759_v48 = vld [vmem:[#allocation5 + $0x4] ss:$12 sps:$4 sm:$0xff]  }
 0x345   :  { %v5664_v13 = vpack.i.bf16 %v1328_v37, %v1324_v27  ;;  %v5666_v15 = vpack.c.bf16 %v1326_v19, %v1322_v49  ;;  %v5668_v54 = vpack.c.bf16 %v1325_v58, %v1321_v17  ;;  %v5674_v44 = vpack.c.bf16 %v1328_v37, %v1324_v27  ;;  %7521 = vst [vmem:[#allocation40_spill] sm:$0xff] %v5759_v48 }
 0x346   :  { %v5676_v21 = vpack.c.bf16 %v1327_v36, %v1323_v16  ;;  %7520 = vst [vmem:[#allocation39_spill] sm:$0xff] %v5683_v10  ;;  %v3591_v50 = vpack.i.bf16 %v1325_v58, %v1321_v17  ;;  %v3601_v1 = vpack.i.bf16 %v1326_v19, %v1322_v49  ;;  %v3606_v34 = vpack.i.bf16 %v1327_v36, %v1323_v16 }
 0x347   :  { %3467 = vrot.lane.b32.xlu0 %v5629_v20, %s3912_s17  ;;  %3462 = vrot.lane.b32.xlu1 %v5629_v20, %s3911_s16  ;;  %7513 = vst [vmem:[#allocation32_spill] sm:$0xff] %v5666_v15  ;;  %7514 = vst [vmem:[#allocation33_spill] sm:$0xff] %v5668_v54 }
 0x348   :  { %7517 = vst [vmem:[#allocation36_spill] sm:$0xff] %v5674_v44  ;;  %7518 = vst [vmem:[#allocation37_spill] sm:$0xff] %v5676_v21  ;;  %1989 = vmatprep.mubr.bf16.mxu1 %v5759_v48 }
 0x34b   :  { %3477 = vrot.lane.b32.xlu0 %v5639_v0, %s3911_s16  ;;  %3472 = vrot.lane.b32.xlu1 %v3471_v23, %s3912_s17 }
 0x34f   :  { %3487 = vrot.lane.b32.xlu0 %v5631_v40, %s3913_s22  ;;  %3482 = vrot.lane.b32.xlu1 %v5631_v40, %s3912_s17 }
 0x353   :  { %3497 = vrot.lane.b32.xlu0 %v3471_v23, %s3910_s24  ;;  %3492 = vrot.lane.b32.xlu1 %v5629_v20, %s3913_s22 }
 0x357   :  { %3507 = vrot.lane.b32.xlu0 %v5631_v40, %s3914_s23  ;;  %3502 = vrot.lane.b32.xlu1 %v5639_v0, %s3913_s22 }
 0x35b   :  { %3517 = vrot.lane.b32.xlu0 %v3471_v23, %s3911_s16  ;;  %3512 = vrot.lane.b32.xlu1 %v5629_v20, %s3914_s23 }
 0x35f   :  { %3527 = vrot.lane.b32.xlu0 %v3471_v23, %s3913_s22  ;;  %3522 = vrot.lane.b32.xlu1 %v5639_v0, %s3914_s23 }
 0x363   :  { %3537 = vrot.lane.b32.xlu0 %v3471_v23, %s3915_s3  ;;  %3532 = vrot.lane.b32.xlu1 %v5629_v20, %s3915_s3 }
 0x367   :  { %3547 = vrot.lane.b32.xlu0 %v3471_v23, %s3914_s23  ;;  %3542 = vrot.lane.b32.xlu1 %v5631_v40, %s3915_s3 }
 0x36b   :  { %3557 = vrot.lane.b32.xlu0 %v3471_v23, %s3916_s1  ;;  %3552 = vrot.lane.b32.xlu1 %v5629_v20, %s3916_s1 }
 0x36f   :  { %3567 = vrot.lane.b32.xlu0 %v5629_v20, %s3917_s2  ;;  %3562 = vrot.lane.b32.xlu1 %v5631_v40, %s3916_s1 }
 0x373   :  { %3572 = vrot.lane.b32.xlu1 %v3471_v23, %s3917_s2  ;;  %3587 = vrot.lane.b32.xlu0 %v5664_v13, %s3910_s24 }
 0x377   :  { %3592 = vrot.lane.b32.xlu0 %v3591_v50, %s3911_s16  ;;  %3577 = vrot.lane.b32.xlu1 %v3591_v50, %s3910_s24 }
 0x37b   :  { %3602 = vrot.lane.b32.xlu0 %v3601_v1, %s3912_s17  ;;  %3582 = vrot.lane.b32.xlu1 %v3601_v1, %s3910_s24 }
 0x37f   :  { %3612 = vrot.lane.b32.xlu0 %v5664_v13, %s3911_s16  ;;  %3597 = vrot.lane.b32.xlu1 %v3601_v1, %s3911_s16 }
 0x383   :  { %3622 = vrot.lane.b32.xlu0 %v3591_v50, %s3913_s22  ;;  %3607 = vrot.lane.b32.xlu1 %v3606_v34, %s3912_s17 }
 0x387   :  { %3632 = vrot.lane.b32.xlu0 %v3606_v34, %s3910_s24  ;;  %3617 = vrot.lane.b32.xlu1 %v3591_v50, %s3912_s17 }
 0x38b   :  { %3642 = vrot.lane.b32.xlu0 %v3591_v50, %s3914_s23  ;;  %3627 = vrot.lane.b32.xlu1 %v3601_v1, %s3913_s22 }
 0x38f   :  { %3652 = vrot.lane.b32.xlu0 %v3606_v34, %s3911_s16  ;;  %3637 = vrot.lane.b32.xlu1 %v5664_v13, %s3913_s22 }
 0x393   :  { %3662 = vrot.lane.b32.xlu0 %v3606_v34, %s3913_s22  ;;  %3647 = vrot.lane.b32.xlu1 %v3601_v1, %s3914_s23 }
 0x397   :  { %3672 = vrot.lane.b32.xlu0 %v3606_v34, %s3915_s3  ;;  %3657 = vrot.lane.b32.xlu1 %v5664_v13, %s3914_s23 }
 0x39b   :  { %3682 = vrot.lane.b32.xlu0 %v3606_v34, %s3914_s23  ;;  %3667 = vrot.lane.b32.xlu1 %v3601_v1, %s3915_s3 }
 0x39f   :  { %3692 = vrot.lane.b32.xlu0 %v3606_v34, %s3916_s1  ;;  %3677 = vrot.lane.b32.xlu1 %v3591_v50, %s3915_s3 }
 0x3a3   :  { %3702 = vrot.lane.b32.xlu0 %v3601_v1, %s3917_s2  ;;  %3687 = vrot.lane.b32.xlu1 %v3601_v1, %s3916_s1 }
 0x3a7   :  { %3712 = vrot.lane.b32.xlu0 %v5664_v13, %s3915_s3  ;;  %3697 = vrot.lane.b32.xlu1 %v3591_v50, %s3916_s1 }
 0x3ab   :  { %3717 = vrot.lane.b32.xlu0 %v5639_v0, %s3915_s3  ;;  %3707 = vrot.lane.b32.xlu1 %v3606_v34, %s3917_s2 }
 0x3af   :  { %3732 = vrot.lane.b32.xlu0 %v5664_v13, %s3916_s1  ;;  %3722 = vrot.lane.b32.xlu1 %v3591_v50, %s3917_s2 }
 0x3b1   :  { %v5747_v4 = vpop.permute.xlu0 %3447  ;;  %v3443_v57 = vpop.permute.xlu1 %3442 }
 0x3b2   :  { %v3450_v36 = vunpack.i.h.bf16 %v5747_v4  ;;  %v7177_v16 = vunpack.i.l.bf16 %v5747_v4  ;;  %v3444_v50 = vunpack.i.l.bf16 %v3443_v57 }
 0x3b3   :  { %3742 = vrot.lane.b32.xlu0 %v5664_v13, %s3917_s2  ;;  %3727 = vrot.lane.b32.xlu1 %v5631_v40, %s3917_s2 }
 0x3b4   :  { %v5820_v44 = vsel %vm7530_vm6, %v3444_v50, %v7177_v16 }
 0x3b5   :  { %v3458_v20 = vpop.permute.xlu0 %3457  ;;  %v5753_v59 = vpop.permute.xlu1 %3452 }
 0x3b6   :  { %v3454_v32 = vunpack.i.l.bf16 %v5753_v59  ;;  %v3460_v9 = vunpack.i.h.bf16 %v3458_v20  ;;  %v3459_v56 = vunpack.i.l.bf16 %v3458_v20  ;;  %v7533_v15 = vunpack.i.h.bf16 %v5753_v59 }
 0x3b7   :  { %3752 = vrot.lane.b32.xlu0 %v5664_v13, %s3912_s17  ;;  %3737 = vrot.lane.b32.xlu1 %v5639_v0, %s3916_s1  ;;  %v3445_v13 = vunpack.i.h.bf16 %v3443_v57 }
 0x3b8   :  { %v5834_v16 = vsel %vm7532_vm15, %v3454_v32, %v3444_v50 }
 0x3b9   :  { %v3468_v26 = vpop.permute.xlu0 %3467  ;;  %v5761_v29 = vpop.permute.xlu1 %3462  ;;  %v5814_v21 = vsel %vm7529_vm3, %v3445_v13, %v3450_v36  ;;  %v5840_v47 = vsel %vm7534_vm9, %v7533_v15, %v3445_v13  ;;  %vm7538_vm3 = vmmov %vm7536_vm5  ;;  %vm7544_vm9 = vcmp.lt.s32.totalorder %v4235_v41, 111 }
 0x3ba   :  { %v3470_v10 = vunpack.i.h.bf16 %v3468_v26  ;;  %v3469_v20 = vunpack.i.l.bf16 %v3468_v26  ;;  %v7535_v43 = vunpack.i.h.bf16 %v5761_v29  ;;  %v7537_v31 = vunpack.i.l.bf16 %v5761_v29  ;;  %vm7540_vm6 = vmmov %vm7538_vm3 }
 0x3bb   :  { %3747 = vrot.lane.b32.xlu1 %v5639_v0, %s3917_s2  ;;  %vm7542_vm15 = vmmov %vm7538_vm3 }
 0x3bc   :  { %v5850_v50 = vsel %vm7536_vm5, %v3460_v9, %v7535_v43  ;;  %v5856_v15 = vsel %vm7538_vm3, %v3459_v56, %v7537_v31  ;;  %v2874_v43 = vpack.c.bf16 %v5814_v21, %v5820_v44  ;;  %vm7546_vm5 = vmmov %vm7544_vm9 }
 0x3bd   :  { %v5766_v40 = vpop.permute.xlu0 %3477  ;;  %v5768_v6 = vpop.permute.xlu1 %3472  ;;  %vm7548_vm3 = vmmov %vm7546_vm5 }
 0x3be   :  { %7522 = vst [vmem:[#allocation41_spill] sm:$0xff] %v5768_v6  ;;  %v7539_v13 = vunpack.i.l.bf16 %v5766_v40  ;;  %v7541_v38 = vunpack.i.h.bf16 %v5766_v40  ;;  %v7543_v31 = vunpack.i.h.bf16 %v5768_v6 }
 0x3bf   :  { %3757 = vrot.lane.b32.xlu1 %v5639_v0, %s3912_s17 }
 0x3c0   :  { %v5862_v26 = vsel %vm7540_vm6, %v7539_v13, %v3459_v56  ;;  %v5868_v5 = vsel %vm7542_vm15, %v7541_v38, %v3460_v9  ;;  %v7545_v56 = vunpack.i.l.bf16 %v5768_v6  ;;  %vm7550_vm6 = vmmov %vm7548_vm3  ;;  %vm7551_vm15 = vcmp.lt.s32.totalorder %v4235_v41, 1 }
 0x3c1   :  { %v5772_v7 = vpop.permute.xlu0 %3487  ;;  %v5774_v55 = vpop.permute.xlu1 %3482 }
 0x3c2   :  { %7523 = vst [vmem:[#allocation42_spill] sm:$0xff] %v5774_v55  ;;  %v5884_v13 = vsel %vm7546_vm5, %v3469_v20, %v7545_v56  ;;  %v7547_v9 = vunpack.i.h.bf16 %v5774_v55  ;;  %v7549_v44 = vunpack.i.l.bf16 %v5774_v55  ;;  %v3490_v55 = vunpack.i.h.bf16 %v5772_v7 }
 0x3c3   :  { %v3489_v56 = vunpack.i.l.bf16 %v5772_v7 }
 0x3c4   :  { %v5890_v38 = vsel %vm7548_vm3, %v7547_v9, %v3470_v10  ;;  %v5896_v21 = vsel %vm7550_vm6, %v7549_v44, %v3469_v20 }
 0x3c5   :  { %v5776_v39 = vpop.permute.xlu0 %3497  ;;  %v5778_v12 = vpop.permute.xlu1 %3492 }
 0x3c9   :  { %v5780_v23 = vpop.permute.xlu0 %3507  ;;  %v5782_v35 = vpop.permute.xlu1 %3502 }
 0x3ca   :  { %v7604_v61 = vunpack.i.l.bf16 %v5782_v35 }
 0x3cd   :  { %v5784_v22 = vpop.permute.xlu0 %3517  ;;  %v5786_v60 = vpop.permute.xlu1 %3512 }
 0x3d1   :  { %v5788_v42 = vpop.permute.xlu0 %3527  ;;  %v5790_v37 = vpop.permute.xlu1 %3522 }
 0x3d5   :  { %v5792_v0 = vpop.permute.xlu0 %3537  ;;  %v5794_v27 = vpop.permute.xlu1 %3532 }
 0x3d9   :  { %v5796_v58 = vpop.permute.xlu0 %3547  ;;  %v5798_v19 = vpop.permute.xlu1 %3542 }
 0x3da   :  { %7524 = vst [vmem:[#allocation43_spill] sm:$0xff] %v5798_v19 }
 0x3dd   :  { %v5800_v17 = vpop.permute.xlu0 %3557  ;;  %v5802_v49 = vpop.permute.xlu1 %3552 }
 0x3de   :  { %7525 = vst [vmem:[#allocation44_spill] sm:$0xff] %v5800_v17  ;;  %7526 = vst [vmem:[#allocation45_spill] sm:$0xff] %v5802_v49 }
 0x3e1   :  { %v5806_v1 = vpop.permute.xlu0 %3567  ;;  %v5808_v34 = vpop.permute.xlu1 %3562 }
 0x3e2   :  { %7527 = vst [vmem:[#allocation46_spill] sm:$0xff] %v5806_v1  ;;  %7528 = vst [vmem:[#allocation47_spill] sm:$0xff] %v5808_v34  ;;  %v3500_v1 = vunpack.i.h.bf16 %v5776_v39  ;;  %v3499_v34 = vunpack.i.l.bf16 %v5776_v39 }
 0x3e5   :  { %v5822_v11 = vpop.permute.xlu0 %3587  ;;  %v5824_v57 = vpop.permute.xlu1 %3572 }
 0x3e6   :  { %7531 = vst [vmem:[#allocation48_spill] sm:$0xff] %v5824_v57  ;;  %v5878_v57 = vsel %vm7544_vm9, %v3470_v10, %v7543_v31  ;;  %v7195_v44 = vunpack.i.h.bf16 %v5822_v11  ;;  %vm7552_vm9 = vmmov %vm7551_vm15 }
 0x3e7   :  { %vm7554_vm5 = vmmov %vm7552_vm9 }
 0x3e8   :  { %vm7555_vm3 = vmmov %vm7554_vm5 }
 0x3e9   :  { %v5844_v30 = vpop.permute.xlu0 %3592  ;;  %v3578_v54 = vpop.permute.xlu1 %3577  ;;  %v5933_v39 = vsel %vm7555_vm3, %v3450_v36, %v3500_v1  ;;  %vm7556_vm6 = vmmov %vm7555_vm3 }
 0x3ea   :  { %v3580_v31 = vunpack.i.h.bf16 %v3578_v54  ;;  %v3579_v45 = vunpack.i.l.bf16 %v3578_v54  ;;  %v7196_v54 = vunpack.i.l.bf16 %v5822_v11  ;;  %v5937_v49 = vsel %vm7556_vm6, %v3499_v34, %v3454_v32 }
 0x3eb   :  { %v3595_v32 = vunpack.i.h.bf16 %v5844_v30 }
 0x3ec   :  { %v1600_v20 = vsel %vm7551_vm15, %v7195_v44, %v3580_v31  ;;  %v1599_v6 = vsel %vm7552_vm9, %v7196_v54, %v3579_v45  ;;  %vm7557_vm15 = vmmov %vm7555_vm3  ;;  %v3594_v44 = vunpack.i.l.bf16 %v5844_v30  ;;  %v7562_v30 = vunpack.i.h.bf16 %v5778_v12 }
 0x3ed   :  { %v5904_v10 = vpop.permute.xlu0 %3602  ;;  %v5906_v9 = vpop.permute.xlu1 %3582  ;;  %v2871_v19 = vpack.c.bf16 %v1600_v20, %v1599_v6  ;;  %vm7559_vm9 = vmmov %vm7555_vm3  ;;  %v7564_v6 = vunpack.i.l.bf16 %v5778_v12 }
 0x3ee   :  { %v7205_v62 = vunpack.i.l.bf16 %v5906_v9  ;;  %v7553_v48 = vunpack.i.h.bf16 %v5906_v9 }
 0x3f0   :  { %v1596_v7 = vsel %vm7554_vm5, %v3580_v31, %v7553_v48  ;;  %v1595_v54 = vsel %vm7557_vm15, %v3579_v45, %v7205_v62  ;;  %v7558_v45 = vunpack.i.h.bf16 %v5753_v59  ;;  %v7560_v48 = vunpack.i.l.bf16 %v5747_v4  ;;  %vm7561_vm5 = vmmov %vm7555_vm3 }
 0x3f1   :  { %v5944_v17 = vpop.permute.xlu0 %3612  ;;  %v5946_v53 = vpop.permute.xlu1 %3597  ;;  %v2868_v31 = vpack.c.bf16 %v1596_v7, %v1595_v54  ;;  %vm7563_vm3 = vcmp.lt.s32.totalorder %v4235_v41, 16  ;;  %vm7566_vm15 = vcmp.lt.s32.totalorder %v4235_v41, 15  ;;  %v3519_v7 = vunpack.i.l.bf16 %v5784_v22 }
 0x3f2   :  { %v7206_v2 = vunpack.i.h.bf16 %v5946_v53  ;;  %v7207_v3 = vunpack.i.l.bf16 %v5946_v53  ;;  %v5958_v62 = vsel %vm7559_vm9, %v3500_v1, %v7558_v45  ;;  %v5964_v54 = vsel %vm7561_vm5, %v7560_v48, %v3499_v34  ;;  %vm7565_vm6 = vmmov %vm7563_vm3 }
 0x3f3   :  { %v7208_v36 = vunpack.i.l.bf16 %v5944_v17  ;;  %2869 = vmatprep.subr.msk.bf16.mxu1 %vm4296_vm13, %v2868_v31  ;;  %v5974_v59 = vsel %vm7563_vm3, %v3490_v55, %v7562_v30  ;;  %v5980_v4 = vsel %vm7565_vm6, %v3489_v56, %v7564_v6  ;;  %vm7567_vm9 = vmmov %vm7566_vm15  ;;  %v7568_v31 = vunpack.i.h.bf16 %v5782_v35 }
 0x3f4   :  { %v1524_v1 = vsel %vm7566_vm15, %v3595_v32, %v7206_v2  ;;  %v1523_v34 = vsel %vm7567_vm9, %v3594_v44, %v7207_v3  ;;  %2872 = vmatpush1.bf16.msk.msra.mxu1 %vm4309_vm0, %v2871_v19  ;;  %vm7569_vm5 = vmmov %vm7563_vm3  ;;  %v7570_v30 = vunpack.i.l.bf16 %v5782_v35  ;;  %v3605_v2 = vunpack.i.h.bf16 %v5904_v10 }
 0x3f5   :  { %v5992_v20 = vpop.permute.xlu0 %3622  ;;  %v5994_v48 = vpop.permute.xlu1 %3607  ;;  %v6000_v45 = vsel %vm7569_vm5, %v7568_v31, %v3490_v55  ;;  %2875 = vmatprep.subr.msk.bf16.mxu1 %vm4296_vm13, %v2874_v43  ;;  %v3520_v3 = vunpack.i.h.bf16 %v5784_v22  ;;  %v3604_v55 = vunpack.i.l.bf16 %v5904_v10  ;;  %vm7571_vm6 = vmmov %vm7567_vm9  ;;  %v2880_v63 = vpack.c.bf16 %v1524_v1, %v1523_v34 }
 0x3f6   :  { %v6006_v6 = vsel %vm7563_vm3, %v7570_v30, %v3489_v56  ;;  %v1527_v56 = vsel %vm7571_vm6, %v7208_v36, %v3594_v44  ;;  %v7572_v30 = vunpack.i.h.bf16 %v5944_v17  ;;  %vm7573_vm15 = vmmov %vm7571_vm6  ;;  %v7574_v43 = vunpack.i.h.bf16 %v5994_v48 }
 0x3f7   :  { %vm7575_vm13 = vcmp.lt.s32.totalorder %v4235_v41, 111  ;;  %v7576_v36 = vunpack.i.l.bf16 %v5994_v48  ;;  %v7578_v1 = vpack.c.bf16 %v5840_v47, %v5834_v16  ;;  %v7211_v47 = vunpack.i.h.bf16 %v5786_v60 }
 0x3f8   :  { %v1528_v19 = vsel %vm7573_vm15, %v7572_v30, %v3595_v32  ;;  %v1888_v22 = vsel %vm7575_vm13, %v3605_v2, %v7574_v43  ;;  %vm7577_vm9 = vmmov %vm7575_vm13  ;;  %v3540_v35 = vunpack.i.h.bf16 %v5792_v0 }
 0x3f9   :  { %v1887_v32 = vsel %vm7577_vm9, %v3604_v55, %v7576_v36  ;;  %2878 = vmatpush1.bf16.msk.msra.mxu1 %vm4309_vm0, %v7578_v1  ;;  %v3633_v34 = vpop.permute.xlu0 %3632  ;;  %v6043_v30 = vpop.permute.xlu1 %3617  ;;  %v2883_v8 = vpack.c.bf16 %v1528_v19, %v1527_v56  ;;  %v7579_v1 = vunpack.i.l.bf16 %v5766_v40  ;;  %vm7580_vm0 = vmmov %vm7571_vm6  ;;  %v7585_v19 = vunpack.i.h.bf16 %v5761_v29 }
 0x3fa   :  { %v2952_v10 = vpack.c.bf16 %v1888_v22, %v1887_v32  ;;  %v7209_v44 = vunpack.i.h.bf16 %v6043_v30  ;;  %2881 = vmatprep.subr.msk.bf16.mxu1 %vm4366_vm11, %v2880_v63  ;;  %v7210_v16 = vunpack.i.l.bf16 %v6043_v30  ;;  %v7581_v22 = vunpack.i.h.bf16 %v5766_v40  ;;  %vm7582_vm5 = vmmov %vm7580_vm0 }
 0x3fb   :  { %v6058_v43 = vsel %vm7580_vm0, %v3519_v7, %v7579_v1  ;;  %v7583_v63 = vunpack.i.l.bf16 %v5761_v29  ;;  %vm7584_vm3 = vmmov %vm7580_vm0  ;;  %v3635_v40 = vunpack.i.h.bf16 %v3633_v34  ;;  %v3634_v1 = vunpack.i.l.bf16 %v3633_v34 }
 0x3fc   :  { %v6064_v32 = vsel %vm7582_vm5, %v3520_v3, %v7581_v22  ;;  %vm7586_vm6 = vmmov %vm7580_vm0  ;;  %2953 = vmatprep.subr.msk.bf16.mxu0 %vm4389_vm1, %v2952_v10  ;;  %v7214_v10 = vunpack.i.l.bf16 %v5786_v60  ;;  %v3625_v34 = vunpack.i.h.bf16 %v5992_v20  ;;  %vm7593_vm0 = vcmp.lt.s32.totalorder %v4235_v41, 16 }
 0x3fd   :  { %v6070_v36 = vsel %vm7584_vm3, %v7583_v63, %v3519_v7  ;;  %v6076_v56 = vsel %vm7586_vm6, %v7585_v19, %v3520_v3  ;;  %vm7587_vm15 = vmmov %vm7577_vm9  ;;  %v6090_v3 = vpop.permute.xlu0 %3642  ;;  %v6092_v29 = vpop.permute.xlu1 %3627  ;;  %vm7594_vm5 = vnez %v7244_v18  ;;  %vm7596_vm3 = vcmp.lt.s32.totalorder %v4235_v41, 1 }
 0x3fe   :  { %v1892_v22 = vsel %vm7587_vm15, %v7209_v44, %v3605_v2  ;;  %vm7588_vm13 = vmmov %vm7577_vm9  ;;  %vm7589_vm9 = vnez %v7246_v25  ;;  %v7212_v19 = vunpack.i.h.bf16 %v6092_v29  ;;  %v7590_v2 = vpack.c.bf16 %v5850_v50, %v5856_v15 }
 0x3ff   :  { %v1891_v7 = vsel %vm7588_vm13, %v7210_v16, %v3604_v55  ;;  %2884 = vmatpush1.bf16.msk.msra.mxu1 %vm7589_vm9, %v2883_v8  ;;  %v3530_v55 = vunpack.i.h.bf16 %v5788_v42  ;;  %v3529_v8 = vunpack.i.l.bf16 %v5788_v42  ;;  %v3624_v44 = vunpack.i.l.bf16 %v5992_v20  ;;  %vm7598_vm6 = vmmov %vm7596_vm3 }
 0x400   :  { %v2955_v63 = vpack.c.bf16 %v1892_v22, %v1891_v7  ;;  %2887 = vmatprep.subr.msk.bf16.mxu1 %vm4366_vm11, %v7590_v2  ;;  %v7213_v16 = vunpack.i.l.bf16 %v6092_v29  ;;  %v7591_v50 = vunpack.i.h.bf16 %v5780_v23  ;;  %vm7592_vm11 = vcmp.lt.s32.totalorder %v4235_v41, 17  ;;  %vm7599_vm15 = vmmov %vm7593_vm0 }
 0x401   :  { %v1452_v42 = vsel %vm7593_vm0, %v3625_v34, %v7212_v19  ;;  %v7595_v15 = vunpack.i.h.bf16 %v5822_v11  ;;  %v7597_v7 = vunpack.i.l.bf16 %v5822_v11  ;;  %v6146_v11 = vpop.permute.xlu0 %3652  ;;  %vm7603_vm13 = vmmov %vm7592_vm11  ;;  %v3525_v25 = vunpack.i.h.bf16 %v5790_v37 }
 0x402   :  { %v6116_v33 = vsel %vm7592_vm11, %v7591_v50, %v7211_v47  ;;  %2956 = vmatpush1.bf16.msk.msra.mxu0 %vm7594_vm5, %v2955_v63  ;;  %v1451_v50 = vsel %vm7599_vm15, %v3624_v44, %v7213_v16  ;;  %v7600_v47 = vpack.c.bf16 %v5868_v5, %v5862_v26  ;;  %v7601_v63 = vpack.c.bf16 %v5878_v57, %v5884_v13  ;;  %vm7609_vm11 = vmmov %vm7593_vm0  ;;  %v6189_v16 = vld [vmem:[#allocation5 + $0x8] ss:$12 sps:$4 sm:$0xff]  }
 0x403   :  { %v1588_v20 = vsel %vm7596_vm3, %v3635_v40, %v7595_v15  ;;  %v1587_v2 = vsel %vm7598_vm6, %v3634_v1, %v7597_v7  ;;  %v6148_v15 = vpop.permute.xlu1 %3637  ;;  %v7602_v7 = vunpack.i.l.bf16 %v5780_v23  ;;  %v2892_v26 = vpack.c.bf16 %v1452_v42, %v1451_v50  ;;  %vm7614_vm15 = vmmov %vm7598_vm6 }
 0x404   :  { %2890 = vmatpush1.bf16.msk.msra.mxu1 %vm7589_vm9, %v7600_v47  ;;  %2959 = vmatprep.subr.msk.bf16.mxu0 %vm4389_vm1, %v7601_v63  ;;  %v7217_v57 = vunpack.i.h.bf16 %v6148_v15  ;;  %vm7605_vm1 = vmmov %vm7593_vm0  ;;  %v7606_v47 = vmov %v7568_v31  ;;  %v3639_v22 = vunpack.i.l.bf16 %v6148_v15  ;;  %v7608_v42 = vunpack.i.l.bf16 %v5778_v12 }
 0x405   :  { %v6156_v5 = vsel %vm7603_vm13, %v7602_v7, %v7214_v10  ;;  %v6164_v13 = vsel %vm7605_vm1, %v3529_v8, %v7604_v61  ;;  %vm7607_vm9 = vmmov %vm7593_vm0  ;;  %v3524_v7 = vunpack.i.l.bf16 %v5790_v37  ;;  %v7610_v19 = vunpack.i.h.bf16 %v5778_v12 }
 0x406   :  { %v6170_v63 = vsel %vm7607_vm9, %v3530_v55, %v7606_v47  ;;  %v6178_v50 = vsel %vm7609_vm11, %v7608_v42, %v3529_v8  ;;  %v2966_v47 = vpack.c.bf16 %v1588_v20, %v1587_v2  ;;  %vm7611_vm3 = vnez %v7249_v14  ;;  %vm7615_vm13 = vmmov %vm7593_vm0 }
 0x407   :  { %v6184_v61 = vsel %vm7593_vm0, %v7610_v19, %v3530_v55  ;;  %2893 = vmatprep.subr.msk.bf16.mxu1 %vm7611_vm3, %v2892_v26  ;;  %v7612_v31 = vunpack.i.l.bf16 %v5906_v9  ;;  %v7613_v42 = vunpack.i.h.bf16 %v5906_v9  ;;  %v1456_v19 = vsel %vm7615_vm13, %v7217_v57, %v3625_v34  ;;  %vm7616_vm1 = vmmov %vm7593_vm0  ;;  %v6212_v9 = vpop.permute.xlu0 %3662 }
 0x408   :  { %v1455_v55 = vsel %vm7616_vm1, %v3639_v22, %v3624_v44  ;;  %v7617_v20 = vpack.c.bf16 %v5890_v38, %v5896_v21  ;;  %vm7618_vm9 = vnez %v7266_v51  ;;  %v3535_v2 = vunpack.i.h.bf16 %v5794_v27 }
 0x409   :  { %v1591_v8 = vsel %vm7598_vm6, %v7612_v31, %v3634_v1  ;;  %v1592_v12 = vsel %vm7614_vm15, %v7613_v42, %v3635_v40  ;;  %v6214_v31 = vpop.permute.xlu1 %3647  ;;  %v3655_v40 = vunpack.i.h.bf16 %v6146_v11  ;;  %v3654_v1 = vunpack.i.l.bf16 %v6146_v11 }
 0x40a   :  { %2962 = vmatpush1.bf16.msk.msra.mxu0 %vm7594_vm5, %v7617_v20  ;;  %v2895_v34 = vpack.c.bf16 %v1456_v19, %v1455_v55  ;;  %v7215_v44 = vunpack.i.h.bf16 %v6214_v31  ;;  %v3645_v38 = vunpack.i.h.bf16 %v6090_v3  ;;  %v3644_v18 = vunpack.i.l.bf16 %v6090_v3 }
 0x40b   :  { %2967 = vmatprep.subr.msk.bf16.mxu0 %vm7618_vm9, %v2966_v47  ;;  %v7216_v21 = vunpack.i.l.bf16 %v6214_v31  ;;  %v7218_v42 = vunpack.i.l.bf16 %v5792_v0  ;;  %v3534_v11 = vunpack.i.l.bf16 %v5794_v27  ;;  %v2969_v19 = vpack.c.bf16 %v1592_v12, %v1591_v8  ;;  %v6245_v8 = vpop.permute.xlu0 %3672 }
 0x40c   :  { %vm7619_vm5 = vcmask 261120   ;;  %vm7620_vm11 = vcmp.lt.s32.totalorder %v4235_v41, 17  ;;  %vm7622_vm6 = vnez %v7264_v46  ;;  %v7623_v47 = vunpack.i.l.bf16 %v5944_v17 }
 0x40d   :  { %2963 = vmatmul.mubr.msk.bf16.vlgmr.msra.gmra.mxu0 %vm7619_vm5, %v6189_v16  ;;  %v1380_v3 = vsel %vm7620_vm11, %v3645_v38, %v7215_v44  ;;  %vm7621_vm0 = vmmov %vm7620_vm11  ;;  %2896 = vmatpush1.bf16.msk.msra.mxu1 %vm7622_vm6, %v2895_v34  ;;  %v6247_v12 = vpop.permute.xlu1 %3657  ;;  %vm7624_vm15 = vcmp.lt.s32.totalorder %v4235_v41, 15  ;;  %v7625_v10 = vunpack.i.h.bf16 %v5944_v17  ;;  %vm7627_vm1 = vnez %v7268_v24 }
 0x40e   :  { %v1379_v20 = vsel %vm7621_vm0, %v3644_v18, %v7216_v21  ;;  %v1515_v55 = vsel %vm7624_vm15, %v3654_v1, %v7623_v47  ;;  %vm7626_vm13 = vmmov %vm7624_vm15  ;;  %2970 = vmatpush1.bf16.msk.msra.mxu0 %vm7627_vm1, %v2969_v19  ;;  %v7628_v34 = vpack.c.bf16 %v5974_v59, %v5980_v4  ;;  %v3660_v21 = vunpack.i.h.bf16 %v6247_v12  ;;  %2052 = vmatprep.mubr.bf16.mxu0 %v7307_v28 }
 0x40f   :  { %v1516_v44 = vsel %vm7626_vm13, %v3655_v40, %v7625_v10  ;;  %v2904_v26 = vpack.c.bf16 %v1380_v3, %v1379_v20  ;;  %v7629_v57 = vunpack.i.h.bf16 %v5780_v23  ;;  %vm7630_vm5 = vmmov %vm7621_vm0  ;;  %v7631_v10 = vunpack.i.l.bf16 %v5780_v23 }
 0x410   :  { %2899 = vmatprep.subr.msk.bf16.mxu1 %vm7611_vm3, %v7628_v34  ;;  %vm7632_vm11 = vmmov %vm7621_vm0  ;;  %vm7633_vm3 = vcmp.lt.s32.totalorder %v4235_v41, 112  ;;  %v7634_v59 = vpack.c.bf16 %v5958_v62, %v5937_v49  ;;  %v3659_v23 = vunpack.i.l.bf16 %v6247_v12  ;;  %v3549_v47 = vunpack.i.l.bf16 %v5796_v58  ;;  %v6306_v62 = vld [vmem:[#allocation5 + $0x20] ss:$12 sps:$4 sm:$0xff]  }
 0x411   :  { %v1382_v17 = vsel %vm7630_vm5, %v3525_v25, %v7629_v57  ;;  %v1381_v19 = vsel %vm7632_vm11, %v3524_v7, %v7631_v10  ;;  %v6283_v14 = vsel %vm7633_vm3, %v3535_v2, %v3540_v35  ;;  %vm7635_vm0 = vmmov %vm7633_vm3  ;;  %v3550_v57 = vunpack.i.h.bf16 %v5796_v58 }
 0x412   :  { %2973 = vmatprep.subr.msk.bf16.mxu0 %vm7618_vm9, %v7634_v59  ;;  %v6298_v4 = vsel %vm7635_vm0, %v3534_v11, %v7218_v42  ;;  %vm7636_vm9 = vmmov %vm7630_vm5  ;;  %v7637_v49 = vunpack.i.l.bf16 %v5946_v53  ;;  %v7639_v20 = vunpack.i.h.bf16 %v5946_v53  ;;  %v2978_v10 = vpack.c.bf16 %v1516_v44, %v1515_v55  ;;  %v6325_v42 = vpop.permute.xlu0 %3682 }
 0x413   :  { %v1384_v51 = vsel %vm7636_vm9, %v3660_v21, %v3645_v38  ;;  %vm7638_vm15 = vmmov %vm7626_vm13  ;;  %v1383_v59 = vsel %vm7630_vm5, %v3659_v23, %v3644_v18  ;;  %v7640_v38 = vpack.c.bf16 %v6000_v45, %v6006_v6  ;;  %v3665_v53 = vunpack.i.h.bf16 %v6212_v9 }
 0x414   :  { %v1519_v3 = vsel %vm7638_vm15, %v7637_v49, %v3654_v1  ;;  %v1520_v34 = vsel %vm7626_vm13, %v7639_v20, %v3655_v40  ;;  %v3668_v1 = vpop.permute.xlu1 %3667  ;;  %v3664_v49 = vunpack.i.l.bf16 %v6212_v9  ;;  %v2907_v40 = vpack.c.bf16 %v1384_v51, %v1383_v59  ;;  %vm7647_vm3 = vmmov %vm7635_vm0  ;;  %v7653_v59 = vld [vmem:[#allocation13_spill] sm:$0xff] }
 0x415   :  { %2902 = vmatpush1.bf16.msk.msra.mxu1 %vm7622_vm6, %v7640_v38  ;;  %v7641_v44 = vpack.c.bf16 %v5933_v39, %v5964_v54  ;;  %v3670_v45 = vunpack.i.h.bf16 %v3668_v1  ;;  %v2913_v46 = vpack.c.bf16 %v1382_v17, %v1381_v19  ;;  %v3675_v6 = vunpack.i.h.bf16 %v6245_v8  ;;  %v7643_v39 = vld [vmem:[#allocation43_spill] sm:$0xff] }
 0x416   :  { %2905 = vmatprep.subr.msk.bf16.mxu1 %vm4696_vm7, %v2904_v26  ;;  %v3674_v18 = vunpack.i.l.bf16 %v6245_v8  ;;  %v3669_v9 = vunpack.i.l.bf16 %v3668_v1  ;;  %v2922_v51 = vpack.c.bf16 %v6283_v14, %v6298_v4  ;;  %v3545_v54 = vunpack.i.h.bf16 %v7643_v39  ;;  %v6370_v37 = vpop.permute.xlu0 %3692 }
 0x417   :  { %2976 = vmatpush1.bf16.msk.msra.mxu0 %vm7627_vm1, %v7641_v44  ;;  %v3544_v24 = vunpack.i.l.bf16 %v7643_v39  ;;  %v2981_v20 = vpack.c.bf16 %v1520_v34, %v1519_v3  ;;  %vm7644_vm6 = vcmask 261120   ;;  %vm7645_vm1 = vmmov %vm7630_vm5  ;;  %v1816_v19 = vsel %vm7647_vm3, %v3670_v45, %v3675_v6  ;;  %v7719_v39 = vld [vmem:[#allocation22_spill] sm:$0xff] }
 0x418   :  { %2979 = vmatprep.subr.msk.bf16.mxu0 %vm4748_vm2, %v2978_v10  ;;  %2964 = vmatmul.mubr.msk.bf16.gmra.mxu0 %vm7644_vm6, %v6306_v62  ;;  %v6350_v26 = vsel %vm7645_vm1, %v3549_v47, %v3524_v7  ;;  %vm7646_vm11 = vmmov %vm7645_vm1  ;;  %v1815_v14 = vsel %vm7635_vm0, %v3669_v9, %v3674_v18  ;;  %v7648_v7 = vld [vmem:[#allocation11_spill] sm:$0xff]  ;;  %v6372_v4 = vpop.permute.xlu1 %3677  ;;  %vm7650_vm15 = vcmp.lt.s32.totalorder %v4235_v41, 16  ;;  %v7651_v3 = vunpack.i.h.bf16 %v6148_v15  ;;  %v7658_v15 = vld [vmem:[#allocation44_spill] sm:$0xff] }
 0x419   :  { %v6358_v17 = vsel %vm7646_vm11, %v3550_v57, %v3525_v25  ;;  %vm7649_vm9 = vnez %v7648_v7  ;;  %v1443_v25 = vsel %vm7650_vm15, %v3664_v49, %v3639_v22  ;;  %vm7652_vm13 = vmmov %vm7650_vm15  ;;  %v2916_v10 = vpack.c.bf16 %v1816_v19, %v1815_v14 }
 0x41a   :  { %2908 = vmatpush1.bf16.msk.msra.mxu1 %vm7649_vm9, %v2907_v40  ;;  %v1444_v34 = vsel %vm7652_vm13, %v3665_v53, %v7651_v3  ;;  %vm7654_vm5 = vnez %v7653_v59  ;;  %v7655_v38 = vpack.c.bf16 %v6116_v33, %v6156_v5  ;;  %v3680_v1 = vunpack.i.h.bf16 %v6372_v4  ;;  %vm7657_vm6 = vmmov %vm7645_vm1  ;;  %v7660_v33 = vld [vmem:[#allocation40_spill] sm:$0xff]  ;;  %v7661_v5 = vld [vmem:[#allocation45_spill] sm:$0xff] }
 0x41b   :  { %2982 = vmatpush1.bf16.msk.msra.mxu0 %vm7654_vm5, %v2981_v20  ;;  %v7656_v40 = vunpack.i.l.bf16 %v5786_v60  ;;  %v7220_v44 = vunpack.i.h.bf16 %v7658_v15  ;;  %v7219_v19 = vunpack.i.l.bf16 %v7658_v15  ;;  %v7659_v20 = vpack.c.bf16 %v6064_v32, %v6058_v43  ;;  %2095 = vmatprep.mubr.bf16.mxu0 %v7660_v33  ;;  %vm7664_vm1 = vmmov %vm7635_vm0 }
 0x41c   :  { %2911 = vmatprep.subr.msk.bf16.mxu1 %vm4696_vm7, %v7655_v38  ;;  %v3679_v52 = vunpack.i.l.bf16 %v6372_v4  ;;  %v3555_v14 = vunpack.i.h.bf16 %v7661_v5  ;;  %v3554_v3 = vunpack.i.l.bf16 %v7661_v5  ;;  %vm7663_vm7 = vmmov %vm7652_vm13  ;;  %v1820_v43 = vsel %vm7664_vm1, %v3680_v1, %v3670_v45  ;;  %v3688_v5 = vpop.permute.xlu1 %3687 }
 0x41d   :  { %v6394_v22 = vsel %vm7657_vm6, %v7656_v40, %v3549_v47  ;;  %2985 = vmatprep.subr.msk.bf16.mxu0 %vm4748_vm2, %v7659_v20  ;;  %v7662_v47 = vunpack.i.l.bf16 %v6092_v29  ;;  %v7665_v32 = vunpack.i.h.bf16 %v6092_v29  ;;  %vm7666_vm2 = vmmov %vm7663_vm7  ;;  %v2990_v40 = vpack.c.bf16 %v1444_v34, %v1443_v25  ;;  %v7669_v25 = vld [vmem:[#allocation16_spill] sm:$0xff] }
 0x41e   :  { %v3685_v20 = vunpack.i.h.bf16 %v6325_v42  ;;  %vm7667_vm11 = vmmov %vm7635_vm0  ;;  %2914 = vmatpush1.bf16.msk.msra.mxu1 %vm7649_vm9, %v2913_v46  ;;  %v3684_v45 = vunpack.i.l.bf16 %v6325_v42  ;;  %v3695_v29 = vunpack.i.h.bf16 %v6370_v37  ;;  %vm7670_vm3 = vnez %v7669_v25  ;;  %v7672_v46 = vld [vmem:[#allocation14_spill] sm:$0xff] }
 0x41f   :  { %v1447_v38 = vsel %vm7663_vm7, %v7662_v47, %v3664_v49  ;;  %v1448_v55 = vsel %vm7666_vm2, %v7665_v32, %v3665_v53  ;;  %v1819_v33 = vsel %vm7667_vm11, %v3679_v52, %v3669_v9  ;;  %v6426_v49 = vpop.permute.xlu0 %3702  ;;  %v7668_v53 = vpack.c.bf16 %v6076_v56, %v6070_v36  ;;  %2917 = vmatprep.subr.msk.bf16.mxu1 %vm7670_vm3, %v2916_v10  ;;  %vm7671_vm9 = vmmov %vm7635_vm0 }
 0x420   :  { %v2919_v47 = vpack.c.bf16 %v1820_v43, %v1819_v33  ;;  %v3690_v9 = vunpack.i.h.bf16 %v3688_v5  ;;  %v1817_v42 = vsel %vm7635_vm0, %v3544_v24, %v3534_v11  ;;  %v1818_v36 = vsel %vm7671_vm9, %v3545_v54, %v3535_v2  ;;  %v7679_v43 = vld [vmem:[#allocation47_spill] sm:$0xff]  ;;  %v6480_v58 = vpop.permute.xlu1 %3697 }
 0x421   :  { %2988 = vmatpush1.bf16.msk.msra.mxu0 %vm7654_vm5, %v7668_v53  ;;  %v3694_v56 = vunpack.i.l.bf16 %v6370_v37  ;;  %vm7673_vm15 = vnez %v7672_v46  ;;  %v3689_v7 = vunpack.i.l.bf16 %v3688_v5  ;;  %vm7674_vm13 = vcmp.lt.s32.totalorder %v4235_v41, 113  ;;  %v7685_v53 = vld [vmem:[#allocation15_spill] sm:$0xff] }
 0x422   :  { %2991 = vmatprep.subr.msk.bf16.mxu0 %vm7673_vm15, %v2990_v40  ;;  %v1742_v34 = vsel %vm7674_vm13, %v3555_v14, %v7220_v44  ;;  %vm7675_vm5 = vmmov %vm7674_vm13  ;;  %v2993_v11 = vpack.c.bf16 %v1448_v55, %v1447_v38  ;;  %v7677_v10 = vunpack.i.h.bf16 %v5786_v60  ;;  %vm7678_vm7 = vcmp.lt.s32.totalorder %v4235_v41, 17  ;;  %v7681_v55 = vld [vmem:[#allocation17_spill] sm:$0xff] }
 0x423   :  { %v1741_v27 = vsel %vm7675_vm5, %v3554_v3, %v7219_v19  ;;  %vm7676_vm6 = vmmov %vm7675_vm5  ;;  %v3565_v32 = vunpack.i.h.bf16 %v7679_v43  ;;  %v3564_v40 = vunpack.i.l.bf16 %v7679_v43  ;;  %vm7682_vm2 = vnez %v7681_v55  ;;  %v3713_v33 = vpop.permute.xlu0 %3712 }
 0x424   :  { %v1744_v2 = vsel %vm7676_vm6, %v3690_v9, %v3695_v29  ;;  %v6470_v59 = vsel %vm7678_vm7, %v7677_v10, %v3550_v57  ;;  %vm7680_vm1 = vmmov %vm7675_vm5  ;;  %2920 = vmatpush2.bf16.msk.msra.mxu1 %vm7682_vm2, %v2919_v47  ;;  %vm7686_vm9 = vnez %v7685_v53  ;;  %v3700_v47 = vunpack.i.h.bf16 %v6480_v58 }
 0x425   :  { %v1743_v38 = vsel %vm7680_vm1, %v3689_v7, %v3694_v56  ;;  %vm7683_vm11 = vmmov %vm7678_vm7  ;;  %2994 = vmatpush1.bf16.msk.msra.mxu0 %vm7686_vm9, %v2993_v11  ;;  %2923 = vmatprep.subr.msk.bf16.mxu1 %vm7670_vm3, %v2922_v51  ;;  %v3008_v10 = vpack.c.bf16 %v6358_v17, %v6350_v26  ;;  %v2925_v19 = vpack.c.bf16 %v1818_v36, %v1817_v42  ;;  %v7689_v25 = vunpack.i.l.bf16 %v6214_v31  ;;  %v6522_v36 = vpop.permute.xlu1 %3707 }
 0x426   :  { %v1371_v60 = vsel %vm7683_vm11, %v3684_v45, %v3659_v23  ;;  %vm7684_vm0 = vmmov %vm7678_vm7  ;;  %v2928_v5 = vpack.c.bf16 %v1744_v2, %v1743_v38  ;;  %v2934_v44 = vpack.c.bf16 %v1742_v34, %v1741_v27  ;;  %v7687_v12 = vpack.c.bf16 %v6170_v63, %v6164_v13  ;;  %v7688_v23 = vld [vmem:[#allocation46_spill] sm:$0xff]  ;;  %v7700_v34 = vld [vmem:[#allocation48_spill] sm:$0xff] }
 0x427   :  { %v1372_v57 = vsel %vm7684_vm0, %v3685_v20, %v3660_v21  ;;  %v3699_v21 = vunpack.i.l.bf16 %v6480_v58  ;;  %v3570_v11 = vunpack.i.h.bf16 %v7688_v23  ;;  %vm7690_vm3 = vmmov %vm7684_vm0  ;;  %v3715_v2 = vunpack.i.h.bf16 %v3713_v33 }
 0x428   :  { %2997 = vmatprep.subr.msk.bf16.mxu0 %vm7673_vm15, %v7687_v12  ;;  %v1375_v51 = vsel %vm7690_vm3, %v7689_v25, %v3684_v45  ;;  %v3714_v38 = vunpack.i.l.bf16 %v3713_v33  ;;  %v7691_v26 = vunpack.i.h.bf16 %v6214_v31  ;;  %vm7692_vm13 = vmmov %vm7684_vm0  ;;  %v3002_v13 = vpack.c.bf16 %v1372_v57, %v1371_v60  ;;  %2926 = vmatpush2.bf16.msk.msra.mxu1 %vm7682_vm2, %v2925_v19  ;;  %v3718_v45 = vpop.permute.xlu0 %3717  ;;  %v7698_v19 = vld [vmem:[#allocation20_spill] sm:$0xff]  ;;  %v7701_v33 = vld [vmem:[#allocation18_spill] sm:$0xff] }
 0x429   :  { %vm7693_vm15 = vmmov %vm7680_vm1  ;;  %v3575_v27 = vunpack.i.h.bf16 %v7700_v34  ;;  %v3704_v55 = vunpack.i.l.bf16 %v6426_v49  ;;  %vm7702_vm2 = vnez %v7701_v33  ;;  %vm7703_vm11 = vcmp.lt.s32.totalorder %v4235_v41, 112  ;;  %v7707_v25 = vld [vmem:[#allocation21_spill] sm:$0xff]  ;;  %v6565_v4 = vpop.permute.xlu1 %3722 }
 0x42a   :  { %v1376_v17 = vsel %vm7692_vm13, %v7691_v26, %v3685_v20  ;;  %v1747_v63 = vsel %vm7693_vm15, %v3699_v21, %v3689_v7  ;;  %vm7694_vm5 = vmmov %vm7680_vm1  ;;  %v3710_v7 = vunpack.i.h.bf16 %v6522_v36  ;;  %v1823_v60 = vsel %vm7703_vm11, %v3714_v38, %v3679_v52  ;;  %v7709_v26 = vld [vmem:[#allocation19_spill] sm:$0xff] }
 0x42b   :  { %v1748_v42 = vsel %vm7694_vm5, %v3700_v47, %v3690_v9  ;;  %vm7695_vm6 = vmmov %vm7680_vm1  ;;  %v7697_v9 = vpack.c.bf16 %v6184_v61, %v6178_v50  ;;  %v3574_v50 = vunpack.i.l.bf16 %v7700_v34  ;;  %v3005_v61 = vpack.c.bf16 %v1376_v17, %v1375_v51  ;;  %v3780_v34 = vld [vmem:[#allocation5 + $0x18] ss:$12 sps:$4 sm:$0xff]  }
 0x42c   :  { %v1745_v31 = vsel %vm7695_vm6, %v3564_v40, %v3554_v3  ;;  %vm7696_vm7 = vmmov %vm7680_vm1  ;;  %v2931_v46 = vpack.c.bf16 %v1748_v42, %v1747_v63  ;;  %vm7699_vm1 = vnez %v7698_v19  ;;  %v3705_v3 = vunpack.i.h.bf16 %v6426_v49  ;;  %v3733_v52 = vpop.permute.xlu0 %3732 }
 0x42d   :  { %v1746_v20 = vsel %vm7696_vm7, %v3565_v32, %v3555_v14  ;;  %3000 = vmatpush1.bf16.msk.msra.mxu0 %vm7686_vm9, %v7697_v9  ;;  %2929 = vmatprep.subr.msk.bf16.mxu1 %vm7699_vm1, %v2928_v5  ;;  %v3709_v14 = vunpack.i.l.bf16 %v6522_v36  ;;  %vm7704_vm0 = vmmov %vm7703_vm11  ;;  %v3720_v5 = vunpack.i.h.bf16 %v3718_v45  ;;  %v3719_v49 = vunpack.i.l.bf16 %v3718_v45  ;;  %v7721_v9 = vld [vmem:[#allocation24_spill] sm:$0xff] }
 0x42e   :  { %3003 = vmatprep.subr.msk.bf16.mxu0 %vm7702_vm2, %v3002_v13  ;;  %v1824_v57 = vsel %vm7704_vm0, %v3715_v2, %v3680_v1  ;;  %vm7705_vm9 = vcmp.lt.s32.totalorder %v4235_v41, 127  ;;  %vm7708_vm13 = vnez %v7707_v25  ;;  %v3569_v1 = vunpack.i.l.bf16 %v7688_v23  ;;  %vm7713_vm7 = vmmov %vm7704_vm0  ;;  %v7728_v25 = vld [vmem:[#allocation23_spill] sm:$0xff] }
 0x42f   :  { %v1672_v53 = vsel %vm7705_vm9, %v3705_v3, %v3710_v7  ;;  %vm7706_vm3 = vmmov %vm7705_vm9  ;;  %2932 = vmatpush2.bf16.msk.msra.mxu1 %vm7708_vm13, %v2931_v46  ;;  %vm7710_vm15 = vnez %v7709_v26  ;;  %v3725_v17 = vunpack.i.h.bf16 %v6565_v4  ;;  %v3011_v13 = vpack.c.bf16 %v6470_v59, %v6394_v22 }
 0x430   :  { %v1671_v12 = vsel %vm7706_vm3, %v3704_v55, %v3709_v14  ;;  %2935 = vmatprep.subr.msk.bf16.mxu1 %vm7699_vm1, %v2934_v44  ;;  %v2937_v63 = vpack.c.bf16 %v1746_v20, %v1745_v31  ;;  %vm7711_vm5 = vmmov %vm7706_vm3  ;;  %v3724_v45 = vunpack.i.l.bf16 %v6565_v4  ;;  %v1811_v22 = vsel %vm7713_vm7, %v3674_v18, %v3714_v38  ;;  %v6612_v18 = vpop.permute.xlu1 %3727 }
 0x431   :  { %v2940_v51 = vpack.c.bf16 %v1672_v53, %v1671_v12  ;;  %3006 = vmatpush1.bf16.msk.msra.mxu0 %vm7710_vm15, %v3005_v61  ;;  %v1670_v42 = vsel %vm7711_vm5, %v3570_v11, %v3575_v27  ;;  %vm7712_vm6 = vmmov %vm7706_vm3  ;;  %v3014_v31 = vpack.c.bf16 %v1824_v57, %v1823_v60  ;;  %vm7722_vm5 = vnez %v7721_v9 }
 0x432   :  { %3009 = vmatprep.subr.msk.bf16.mxu0 %vm7702_vm2, %v3008_v10  ;;  %v1669_v44 = vsel %vm7712_vm6, %v3569_v1, %v3574_v50  ;;  %vm7714_vm1 = vmmov %vm7704_vm0  ;;  %v3729_v19 = vunpack.i.l.bf16 %v6612_v18  ;;  %v7724_v61 = vunpack.i.l.bf16 %v5792_v0  ;;  %v7742_v43 = vunpack.i.l.bf16 %v6043_v30 }
 0x433   :  { %v1812_v59 = vsel %vm7714_vm1, %v3675_v6, %v3715_v2  ;;  %vm7715_vm2 = vmmov %vm7704_vm0  ;;  %2938 = vmatpush2.bf16.msk.msra.mxu1 %vm7708_vm13, %v2937_v63  ;;  %v6610_v6 = vpop.permute.xlu0 %3742  ;;  %v3735_v2 = vunpack.i.h.bf16 %v3733_v52 }
 0x434   :  { %v1821_v10 = vsel %vm7715_vm2, %v3719_v49, %v3544_v24  ;;  %vm7716_vm11 = vmmov %vm7704_vm0  ;;  %v3734_v24 = vunpack.i.l.bf16 %v3733_v52  ;;  %v3738_v0 = vpop.permute.xlu1 %3737  ;;  %vm7730_vm2 = vcmp.lt.s32.totalorder %v4235_v41, 113 }
 0x435   :  { %v1822_v20 = vsel %vm7716_vm11, %v3720_v5, %v3545_v54  ;;  %vm7717_vm0 = vmmov %vm7706_vm3  ;;  %3012 = vmatpush1.bf16.msk.msra.mxu0 %vm7710_vm15, %v3011_v13  ;;  %vm7720_vm3 = vnez %v7719_v39  ;;  %v3730_v54 = vunpack.i.h.bf16 %v6612_v18  ;;  %v3740_v52 = vunpack.i.h.bf16 %v3738_v0 }
 0x436   :  { %v1676_v46 = vsel %vm7717_vm0, %v3725_v17, %v3705_v3  ;;  %vm7718_vm9 = vmmov %vm7717_vm0  ;;  %2941 = vmatprep.subr.msk.bf16.mxu1 %vm7720_vm3, %v2940_v51  ;;  %3015 = vmatprep.subr.msk.bf16.mxu0 %vm7722_vm5, %v3014_v31  ;;  %v2946_v3 = vpack.c.bf16 %v1670_v42, %v1669_v44  ;;  %v3020_v57 = vpack.c.bf16 %v1822_v20, %v1821_v10  ;;  %v3739_v4 = vunpack.i.l.bf16 %v3738_v0 }
 0x437   :  { %v1675_v8 = vsel %vm7718_vm9, %v3724_v45, %v3704_v55  ;;  %v3017_v55 = vpack.c.bf16 %v1812_v59, %v1811_v22  ;;  %vm7723_vm13 = vmmov %vm7714_vm1  ;;  %v7739_v22 = vld [vmem:[#allocation26_spill] sm:$0xff]  ;;  %v7744_v10 = vunpack.i.h.bf16 %v6043_v30 }
 0x438   :  { %v2943_v38 = vpack.c.bf16 %v1676_v46, %v1675_v8  ;;  %v1810_v33 = vsel %vm7723_vm13, %v3540_v35, %v3720_v5  ;;  %vm7725_vm15 = vmmov %vm7714_vm1  ;;  %vm7729_vm1 = vnez %v7728_v25  ;;  %v1751_v35 = vsel %vm7730_vm2, %v3734_v24, %v3699_v21  ;;  %v7732_v5 = vld [vmem:[#allocation25_spill] sm:$0xff]  ;;  %v3748_v42 = vpop.permute.xlu1 %3747  ;;  %v7752_v30 = vld [vmem:[#allocation34_spill] sm:$0xff] }
 0x439   :  { %v1809_v60 = vsel %vm7725_vm15, %v7724_v61, %v3719_v49  ;;  %vm7726_vm6 = vmmov %vm7717_vm0  ;;  %v3753_v49 = vpop.permute.xlu0 %3752  ;;  %v3744_v21 = vunpack.i.l.bf16 %v6610_v6  ;;  %vm7740_vm15 = vnez %v7739_v22  ;;  %v7746_v46 = vunpack.i.h.bf16 %v7658_v15 }
 0x43a   :  { %v1674_v53 = vsel %vm7726_vm6, %v3730_v54, %v3570_v11  ;;  %vm7727_vm7 = vmmov %vm7717_vm0  ;;  %2944 = vmatpush2.bf16.msk.msra.mxu1 %vm7729_vm1, %v2943_v38  ;;  %vm7733_vm0 = vnez %v7732_v5  ;;  %v3755_v13 = vunpack.i.h.bf16 %v3753_v49  ;;  %v3754_v63 = vunpack.i.l.bf16 %v3753_v49  ;;  %v7763_v49 = vld [vmem:[#allocation35_spill] sm:$0xff] }
 0x43b   :  { %v1673_v12 = vsel %vm7727_vm7, %v3729_v19, %v3569_v1  ;;  %vm7731_vm11 = vmmov %vm7730_vm2  ;;  %3018 = vmatpush2.bf16.msk.msra.mxu0 %vm7733_vm0, %v3017_v55  ;;  %2947 = vmatprep.subr.msk.bf16.mxu1 %vm7720_vm3, %v2946_v3  ;;  %v3023_v1 = vpack.c.bf16 %v1810_v33, %v1809_v60  ;;  %v1679_v31 = vsel %vm7726_vm6, %v3744_v21, %v3724_v45  ;;  %v7748_v45 = vunpack.i.l.bf16 %v7658_v15 }
 0x43c   :  { %v1752_v23 = vsel %vm7731_vm11, %v3735_v2, %v3700_v47  ;;  %v2949_v11 = vpack.c.bf16 %v1674_v53, %v1673_v12  ;;  %3021 = vmatprep.subr.msk.bf16.mxu0 %vm7722_vm5, %v3020_v57  ;;  %vm7734_vm9 = vmmov %vm7730_vm2  ;;  %v3745_v47 = vunpack.i.h.bf16 %v6610_v6  ;;  %v7750_v6 = vld [vmem:[#allocation33_spill] sm:$0xff]  ;;  %v3749_v38 = vunpack.i.l.bf16 %v3748_v42  ;;  %v7757_v53 = vld [vmem:[#allocation42_spill] sm:$0xff] }
 0x43d   :  { %v1739_v58 = vsel %vm7734_vm9, %v3694_v56, %v3734_v24  ;;  %vm7735_vm3 = vmmov %vm7730_vm2  ;;  %v3026_v26 = vpack.c.bf16 %v1752_v23, %v1751_v35  ;;  %v3750_v24 = vunpack.i.h.bf16 %v3748_v42  ;;  %v7753_v55 = vunpack.i.l.bf16 %v5994_v48  ;;  %v3774_v23 = vld [vmem:[#allocation5] ss:$12 sps:$4 sm:$0xff]  }
 0x43e   :  { %v1740_v51 = vsel %vm7735_vm3, %v3695_v29, %v3735_v2  ;;  %2950 = vmatpush2.bf16.msk.msra.mxu1 %vm7729_vm1, %v2949_v11  ;;  %vm7736_vm5 = vmmov %vm7730_vm2  ;;  %v7738_v29 = vld [vmem:[#allocation32_spill] sm:$0xff]  ;;  %vm7743_vm1 = vcmp.lt.s32.totalorder %v4235_v41, 111  ;;  %v3758_v2 = vpop.permute.xlu1 %3757  ;;  %v7755_v33 = vunpack.i.h.bf16 %v5994_v48  ;;  %v7758_v12 = vunpack.i.l.bf16 %v7757_v53 }
 0x43f   :  { %v1749_v56 = vsel %vm7736_vm5, %v3739_v4, %v3564_v40  ;;  %vm7737_vm13 = vmmov %vm7730_vm2  ;;  %3024 = vmatpush2.bf16.msk.msra.mxu0 %vm7733_vm0, %v3023_v1  ;;  %1985 = vmatprep.subr.bf16.mxu1 %v7738_v29  ;;  %v3029_v59 = vpack.c.bf16 %v1740_v51, %v1739_v58  ;;  %v3760_v9 = vunpack.i.h.bf16 %v3758_v2  ;;  %v3759_v3 = vunpack.i.l.bf16 %v3758_v2  ;;  %v7776_v41 = vld [vmem:[#allocation36_spill] sm:$0xff]  ;;  %v7778_v29 = vld [vmem:[#allocation38_spill] sm:$0xff] }
 0x440   :  { %v1750_v37 = vsel %vm7737_vm13, %v3740_v52, %v3565_v32  ;;  %3027 = vmatprep.subr.msk.bf16.mxu0 %vm7740_vm15, %v3026_v26  ;;  %vm7741_vm7 = vmmov %vm7726_vm6  ;;  %v1895_v32 = vsel %vm7743_vm1, %v3754_v63, %v7742_v43  ;;  %v7760_v0 = vunpack.i.h.bf16 %v7757_v53  ;;  %v1667_v48 = vsel %vm7726_vm6, %v3709_v14, %v3744_v21  ;;  %v7768_v21 = vld [vmem:[#allocation41_spill] sm:$0xff] }
 0x441   :  { %v3032_v44 = vpack.c.bf16 %v1750_v37, %v1749_v56  ;;  %v1680_v40 = vsel %vm7741_vm7, %v3745_v47, %v3725_v17  ;;  %vm7745_vm2 = vmmov %vm7743_vm1  ;;  %v7769_v51 = vunpack.i.l.bf16 %v7768_v21 }
 0x442   :  { %v1896_v20 = vsel %vm7745_vm2, %v3755_v13, %v7744_v10  ;;  %vm7747_vm11 = vmmov %vm7735_vm3  ;;  %1986 = vmatpush2.bf16.msra.mxu1 %v7750_v6  ;;  %v3038_v5 = vpack.c.bf16 %v1680_v40, %v1679_v31 }
 0x443   :  { %v1738_v8 = vsel %vm7747_vm11, %v7746_v46, %v3740_v52  ;;  %vm7749_vm0 = vmmov %vm7735_vm3  ;;  %3030 = vmatpush2.bf16.msk.msra.mxu0 %vm5330_vm8, %v3029_v59  ;;  %1987 = vmatprep.subr.bf16.mxu1 %v7752_v30  ;;  %v3050_v60 = vpack.c.bf16 %v1896_v20, %v1895_v32  ;;  %v3778_v52 = vld [vmem:[#allocation5 + $0x1c] ss:$12 sps:$4 sm:$0xff]   ;;  %v1881_v18 = vsel %vm7745_vm2, %v7769_v51, %v3759_v3 }
 0x444   :  { %v1737_v17 = vsel %vm7749_vm0, %v7748_v45, %v3739_v4  ;;  %vm7754_vm9 = vmmov %vm7743_vm1  ;;  %3033 = vmatprep.subr.msk.bf16.mxu0 %vm7740_vm15, %v3032_v44  ;;  %v7779_v44 = vld [vmem:[#allocation39_spill] sm:$0xff] }
 0x445   :  { %v1883_v15 = vsel %vm7754_vm9, %v7753_v55, %v3754_v63  ;;  %vm7756_vm3 = vmmov %vm7743_vm1  ;;  %v3035_v57 = vpack.c.bf16 %v1738_v8, %v1737_v17 }
 0x446   :  { %v1884_v61 = vsel %vm7756_vm3, %v7755_v33, %v3755_v13  ;;  %vm7759_vm5 = vmmov %vm7743_vm1  ;;  %1988 = vmatpush2.bf16.msra.mxu1 %v7763_v49  ;;  %vm2440_vm3 = vcmask 31744  }
 0x447   :  { %v1893_v25 = vsel %vm7759_vm5, %v3759_v3, %v7758_v12  ;;  %vm7761_vm13 = vmmov %vm7743_vm1  ;;  %3036 = vmatpush2.bf16.msk.msra.mxu0 %vm5330_vm8, %v3035_v57  ;;  %3051 = vmatprep.subr.msk.bf16.mxu1 %vm5416_vm12, %v3050_v60  ;;  %vm2447_vm5 = vcmask 1041408  }
 0x448   :  { %v1894_v35 = vsel %vm7761_vm13, %v3760_v9, %v7760_v0  ;;  %vm7762_vm15 = vmmov %vm7726_vm6  ;;  %3039 = vmatprep.subr.msk.bf16.mxu0 %vm5393_vm4, %v3038_v5 }
 0x449   :  { %v1668_v11 = vsel %vm7762_vm15, %v3710_v7, %v3745_v47  ;;  %vm7764_vm7 = vmmov %vm7726_vm6  ;;  %v3056_v14 = vpack.c.bf16 %v1894_v35, %v1893_v25  ;;  %v3053_v7 = vpack.c.bf16 %v1884_v61, %v1883_v15  ;;  %1990 = vmatmul.mubr.bf16.vlgmr.msra.gmra.mxu1 %v3774_v23 }
 0x44a   :  { %v1677_v4 = vsel %vm7764_vm7, %v3749_v38, %v3729_v19  ;;  %vm7765_vm1 = vmmov %vm7726_vm6  ;;  %v3041_v47 = vpack.c.bf16 %v1668_v11, %v1667_v48  ;;  %v7770_v19 = vunpack.i.h.bf16 %v7768_v21  ;;  %1999 = vmatprep.mubr.bf16.mxu1 %v3778_v52 }
 0x44b   :  { %v1678_v1 = vsel %vm7765_vm1, %v3750_v24, %v3730_v54  ;;  %vm7771_vm11 = vmmov %vm7745_vm2  ;;  %3054 = vmatpush1.bf16.msk.msra.mxu1 %vm5433_vm10, %v3053_v7 }
 0x44c   :  { %v1882_v54 = vsel %vm7771_vm11, %v7770_v19, %v3760_v9  ;;  %vm7772_vm8 = vmmov %vm7765_vm1  ;;  %v3044_v63 = vpack.c.bf16 %v1678_v1, %v1677_v4  ;;  %3042 = vmatpush2.bf16.msk.msra.mxu0 %vm5442_vm14, %v3041_v47  ;;  %3057 = vmatprep.subr.msk.bf16.mxu1 %vm5416_vm12, %v3056_v14  ;;  %vm7780_vm12 = vcmask 261120  }
 0x44d   :  { %v1665_v26 = vsel %vm7772_vm8, %v3574_v50, %v3749_v38  ;;  %vm7773_vm0 = vmmov %vm7765_vm1  ;;  %v3059_v37 = vpack.c.bf16 %v1882_v54, %v1881_v18 }
 0x44e   :  { %v1666_v13 = vsel %vm7773_vm0, %v3575_v27, %v3750_v24  ;;  %3045 = vmatprep.subr.msk.bf16.mxu0 %vm5393_vm4, %v3044_v63  ;;  %v7777_v27 = vld [vmem:[#allocation37_spill] sm:$0xff]  ;;  %vm7781_vm4 = vmmov %vm7780_vm12 }
 0x44f   :  { %v3047_v50 = vpack.c.bf16 %v1666_v13, %v1665_v26  ;;  %3060 = vmatpush1.bf16.msk.msra.mxu1 %vm5433_vm10, %v3059_v37  ;;  %vm3919_vm10 = vmmov 0   ;;  %vm7782_vm9 = vmmov %vm7781_vm4 }
 0x451   :  { %3048 = vmatpush2.bf16.msk.msra.mxu0 %vm5442_vm14, %v3047_v50  ;;  %2000 = vmatmul.mubr.bf16.gmra.mxu1 %v3780_v34  ;;  %vm2373_vm14 = vcmask 7168  }
 0x452   :  { %2091 = vmatprep.subr.bf16.mxu0 %v7776_v41  ;;  %2148 = vmatprep.mubr.bf16.mxu1 %v7307_v28 }
 0x455   :  { %2092 = vmatpush2.bf16.msra.mxu0 %v7777_v27 }
 0x456   :  { %2093 = vmatprep.subr.bf16.mxu0 %v7778_v29 }
 0x459   :  { %2094 = vmatpush2.bf16.msra.mxu0 %v7779_v44  ;;  %3061 = vmatmul.mubr.msk.bf16.vlgmr.msra.gmra.mxu1 %vm7780_vm12, %v6189_v16 }
 0x45a   :  { %2158 = vmatprep.mubr.bf16.mxu1 %v7307_v28 }
 0x45c   :  { %2096 = vmatmul.mubr.bf16.vlgmr.msra.gmra.mxu0 %v3774_v23 }
 0x45d   :  { %2105 = vmatprep.mubr.bf16.mxu0 %v3778_v52 }
 0x461   :  { %3062 = vmatmul.mubr.msk.bf16.gmra.mxu1 %vm7781_vm4, %v6306_v62 }
 0x464   :  { %2106 = vmatmul.mubr.bf16.gmra.mxu0 %v3780_v34 }
 0x4cd   :  { %v2044_v22 = vpop.f32.mrf.mxu0 }
 0x4cf   :  { %v2046_v59 = vpop.f32.mrf.mxu0 }
 0x4d1   :  { %v2048_v31 = vpop.f32.mrf.mxu0 }
 0x4d3   :  { %v2050_v43 = vpop.f32.mrf.mxu0 }
 0x4d8   :  { %v2054_v10 = vpop.f32.mrf.mxu0 }
 0x4da   :  { %v2056_v8 = vpop.f32.mrf.mxu0 }
 0x4dc   :  { %v2058_v17 = vpop.f32.mrf.mxu0 }
 0x4de   :  { %v2060_v24 = vpop.f32.mrf.mxu0 }
 0x509   :  { %v1991_v40 = vpop.f32.mrf.mxu1 }
 0x50a   :  { %v6798_v48 = vadd.f32 %v2044_v22, %v1991_v40 }
 0x50b   :  { %v1993_v32 = vpop.f32.mrf.mxu1 }
 0x50c   :  { %v6800_v11 = vadd.f32 %v2046_v59, %v1993_v32  ;;  %v2189_v42 = vmul.f32 %v6798_v48, %v6798_v48 }
 0x50d   :  { %v1995_v20 = vpop.f32.mrf.mxu1 }
 0x50e   :  { %v6811_v58 = vadd.f32 %v2048_v31, %v1995_v20  ;;  %v2169_v56 = vadd.f32 %v6800_v11, %v6798_v48  ;;  %v2190_v37 = vmul.f32 %v6800_v11, %v6800_v11 }
 0x50f   :  { %v1997_v46 = vpop.f32.mrf.mxu1 }
 0x510   :  { %v6802_v5 = vadd.f32 %v2050_v43, %v1997_v46  ;;  %v2205_v46 = vadd.f32 %v2190_v37, %v2189_v42 }
 0x511   :  { %v2001_v45 = vpop.f32.mrf.mxu1 }
 0x512   :  { %v6786_v15 = vadd.f32 %v2054_v10, %v2001_v45  ;;  %v2174_v50 = vadd.f32 %v6802_v5, %v6811_v58 }
 0x513   :  { %v2003_v16 = vpop.f32.mrf.mxu1 }
 0x514   :  { %v6784_v9 = vadd.f32 %v2056_v8, %v2003_v16  ;;  %v2197_v25 = vmul.f32 %v6786_v15, %v6786_v15  ;;  %v2194_v8 = vmul.f32 %v6802_v5, %v6802_v5  ;;  %v2193_v16 = vmul.f32 %v6811_v58, %v6811_v58 }
 0x515   :  { %v2005_v6 = vpop.f32.mrf.mxu1 }
 0x516   :  { %v2198_v60 = vmul.f32 %v6784_v9, %v6784_v9  ;;  %v2179_v0 = vadd.f32 %v6784_v9, %v6786_v15  ;;  %v6804_v49 = vadd.f32 %v2058_v17, %v2005_v6 }
 0x517   :  { %v2007_v2 = vpop.f32.mrf.mxu1 }
 0x518   :  { %v6790_v53 = vadd.f32 %v2060_v24, %v2007_v2  ;;  %v2215_v4 = vadd.f32 %v2198_v60, %v2197_v25  ;;  %v2201_v41 = vmul.f32 %v6804_v49, %v6804_v49 }
 0x519   :  { %v2150_v38 = vpop.f32.mrf.mxu1 }
 0x51a   :  { %v2184_v47 = vadd.f32 %v6790_v53, %v6804_v49  ;;  %v2202_v27 = vmul.f32 %v6790_v53, %v6790_v53 }
 0x51b   :  { %v2152_v62 = vpop.f32.mrf.mxu1 }
 0x51c   :  { %v2097_v39 = vpop.f32.mrf.mxu0  ;;  %v2220_v45 = vadd.f32 %v2202_v27, %v2201_v41 }
 0x51d   :  { %v2154_v3 = vpop.f32.mrf.mxu1  ;;  %v6815_v21 = vadd.f32 %v2150_v38, %v2097_v39 }
 0x51e   :  { %v2099_v30 = vpop.f32.mrf.mxu0 }
 0x51f   :  { %v2156_v33 = vpop.f32.mrf.mxu1  ;;  %v2170_v22 = vadd.f32 %v2169_v56, %v6815_v21  ;;  %v2191_v59 = vmul.f32 %v6815_v21, %v6815_v21  ;;  %v6842_v31 = vadd.f32 %v2152_v62, %v2099_v30  ;;  %v2210_v30 = vadd.f32 %v2194_v8, %v2193_v16  ;;  %v2244_v8 = vld [vmem:[%s7038_s7 + $0x18] sm:$0xff] }
 0x520   :  { %v2101_v55 = vpop.f32.mrf.mxu0 }
 0x521   :  { %v2160_v57 = vpop.f32.mrf.mxu1  ;;  %v6817_v51 = vadd.f32 %v2154_v3, %v2101_v55  ;;  %v2192_v17 = vmul.f32 %v6842_v31, %v6842_v31  ;;  %v2171_v6 = vadd.f32 %v2170_v22, %v6842_v31  ;;  %v2206_v2 = vadd.f32 %v2205_v46, %v2191_v59 }
 0x522   :  { %v2103_v61 = vpop.f32.mrf.mxu0 }
 0x523   :  { %v2162_v23 = vpop.f32.mrf.mxu1  ;;  %v2175_v40 = vadd.f32 %v2174_v50, %v6817_v51  ;;  %v6845_v43 = vadd.f32 %v2156_v33, %v2103_v61  ;;  %v2195_v24 = vmul.f32 %v6817_v51, %v6817_v51  ;;  %v2207_v33 = vadd.f32 %v2206_v2, %v2192_v17  ;;  %v2242_v2 = vld [vmem:[%s7038_s7 + $0x8] sm:$0xff] }
 0x524   :  { %v2107_v12 = vpop.f32.mrf.mxu0 }
 0x525   :  { %v6796_v35 = vadd.f32 %v2160_v57, %v2107_v12  ;;  %v2164_v7 = vpop.f32.mrf.mxu1  ;;  %v2176_v39 = vadd.f32 %v2175_v40, %v6845_v43  ;;  %v2196_v3 = vmul.f32 %v6845_v43, %v6845_v43  ;;  %v2211_v61 = vadd.f32 %v2210_v30, %v2195_v24 }
 0x526   :  { %v2109_v52 = vpop.f32.mrf.mxu0 }
 0x527   :  { %v2180_v1 = vadd.f32 %v2179_v0, %v6796_v35  ;;  %v2199_v14 = vmul.f32 %v6796_v35, %v6796_v35  ;;  %v6809_v36 = vadd.f32 %v2162_v23, %v2109_v52  ;;  %v2166_v26 = vpop.f32.mrf.mxu1  ;;  %v2212_v60 = vadd.f32 %v2211_v61, %v2196_v3  ;;  %v2259_v3 = vld [vmem:[%s7039_s8 + $0x10] sm:$0xff] }
 0x528   :  { %v2111_v18 = vpop.f32.mrf.mxu0 }
 0x529   :  { %v2200_v19 = vmul.f32 %v6809_v36, %v6809_v36  ;;  %v6821_v54 = vadd.f32 %v2164_v7, %v2111_v18  ;;  %v2181_v13 = vadd.f32 %v2180_v1, %v6809_v36  ;;  %v2216_v63 = vadd.f32 %v2215_v4, %v2199_v14 }
 0x52a   :  { %v2113_v34 = vpop.f32.mrf.mxu0 }
 0x52b   :  { %v2185_v29 = vadd.f32 %v2184_v47, %v6821_v54  ;;  %v6837_v44 = vadd.f32 %v2166_v26, %v2113_v34  ;;  %2182 = vadd.xlane.f32.xlu0 %v2181_v13  ;;  %v2203_v32 = vmul.f32 %v6821_v54, %v6821_v54  ;;  %v2217_v10 = vadd.f32 %v2216_v63, %v2200_v19 }
 0x52d   :  { %v2186_v20 = vadd.f32 %v2185_v29, %v6837_v44  ;;  %v2204_v38 = vmul.f32 %v6837_v44, %v6837_v44  ;;  %v2221_v62 = vadd.f32 %v2220_v45, %v2203_v32  ;;  %v2241_v45 = vld [vmem:[%s7038_s7] sm:$0xff] }
 0x52f   :  { %2218 = vadd.xlane.f32.xlu0 %v2217_v10  ;;  %2187 = vadd.xlane.f32.xlu1 %v2186_v20  ;;  %v2222_v55 = vadd.f32 %v2221_v62, %v2204_v38  ;;  %v2243_v10 = vld [vmem:[%s7038_s7 + $0x10] sm:$0xff] }
 0x533   :  { %2177 = vadd.xlane.f32.xlu0 %v2176_v39  ;;  %2172 = vadd.xlane.f32.xlu1 %v2171_v6 }
 0x537   :  { %2223 = vadd.xlane.f32.xlu0 %v2222_v55  ;;  %2208 = vadd.xlane.f32.xlu1 %v2207_v33  ;;  %v2257_v55 = vld [vmem:[%s7039_s8] sm:$0xff] }
 0x53b   :  { %2213 = vadd.xlane.f32.xlu0 %v2212_v60 }
 0x5b4   :  { %v2183_v57 = vpop.xlane.xlu0 %2182 }
 0x5b5   :  { %v2227_v12 = vmul.f32 0.001953125, %v2183_v57  ;;  %v2260_v57 = vld [vmem:[%s7039_s8 + $0x18] sm:$0xff] }
 0x5b7   :  { %v2235_v23 = vmul.f32 %v2227_v12, %v2227_v12 }
 0x5b8   :  { %v2219_v25 = vpop.xlane.xlu0 %2218  ;;  %v2188_v0 = vpop.xlane.xlu1 %2187 }
 0x5b9   :  { %v2231_v52 = vmul.f32 0.001953125, %v2219_v25  ;;  %v2228_v1 = vmul.f32 0.001953125, %v2188_v0  ;;  %v2258_v0 = vld [vmem:[%s7039_s8 + $0x8] sm:$0xff] }
 0x5bb   :  { %v2239_v4 = vsub.f32 %v2231_v52, %v2235_v23  ;;  %v2236_v19 = vmul.f32 %v2228_v1, %v2228_v1 }
 0x5bc   :  { %v2178_v14 = vpop.xlane.xlu0 %2177  ;;  %v2173_v7 = vpop.xlane.xlu1 %2172 }
 0x5bd   :  { %v2247_v47 = vadd.f32 1e-05, %v2239_v4  ;;  %v2225_v18 = vmul.f32 0.001953125, %v2173_v7  ;;  %v2226_v63 = vmul.f32 0.001953125, %v2178_v14 }
 0x5bf   :  { %3791 = vrsqrt.f32 %v2247_v47  ;;  %v2233_v42 = vmul.f32 %v2225_v18, %v2225_v18  ;;  %v2234_v27 = vmul.f32 %v2226_v63, %v2226_v63 }
 0x5c0   :  { %v2224_v26 = vpop.xlane.xlu0 %2223  ;;  %v2209_v13 = vpop.xlane.xlu1 %2208 }
 0x5c1   :  { %v2232_v56 = vmul.f32 0.001953125, %v2224_v26  ;;  %v2229_v37 = vmul.f32 0.001953125, %v2209_v13 }
 0x5c3   :  { %v2240_v50 = vsub.f32 %v2232_v56, %v2236_v19  ;;  %v2237_v34 = vsub.f32 %v2229_v37, %v2233_v42 }
 0x5c4   :  { %v2214_v41 = vpop.xlane.xlu0 %2213 }
 0x5c5   :  { %v2248_v29 = vadd.f32 1e-05, %v2240_v50  ;;  %v2245_v22 = vadd.f32 1e-05, %v2237_v34  ;;  %v2230_v59 = vmul.f32 0.001953125, %v2214_v41 }
 0x5c7   :  { %3793 = vrsqrt.f32 %v2248_v29  ;;  %v2238_v40 = vsub.f32 %v2230_v59, %v2234_v27 }
 0x5c8   :  { %3795 = vrsqrt.f32 %v2245_v22 }
 0x5c9   :  { %v2246_v32 = vadd.f32 1e-05, %v2238_v40 }
 0x5cb   :  { %3797 = vrsqrt.f32 %v2246_v32 }
 0x5cc   :  { %v3792_v20 = vpop.eup %3791 }
 0x5cd   :  { %v2255_v46 = vmul.f32 %v3792_v20, %v2243_v10 }
 0x5cf   :  { %2281 = vperm.xlu1 %3439, %v2255_v46   ;;  %v2263_v62 = vmul.f32 %v2255_v46, %v2227_v12 }
 0x5d1   :  { %v2267_v33 = vsub.f32 %v2259_v3, %v2263_v62 }
 0x5d4   :  { %v3794_v16 = vpop.eup %3793 }
 0x5d5   :  { %v3796_v17 = vpop.eup %3795  ;;  %v2256_v6 = vmul.f32 %v3794_v16, %v2244_v8 }
 0x5d6   :  { %v2253_v24 = vmul.f32 %v3796_v17, %v2241_v45 }
 0x5d7   :  { %2286 = vperm.xlu0 %3440, %v2256_v6   ;;  %v2264_v60 = vmul.f32 %v2256_v6, %v2228_v1 }
 0x5d8   :  { %v3798_v38 = vpop.eup %3797  ;;  %v2261_v30 = vmul.f32 %v2253_v24, %v2225_v18 }
 0x5d9   :  { %v2254_v39 = vmul.f32 %v3798_v38, %v2242_v2  ;;  %v2268_v12 = vsub.f32 %v2260_v57, %v2264_v60 }
 0x5da   :  { %v2265_v61 = vsub.f32 %v2257_v55, %v2261_v30 }
 0x5db   :  { %2276 = vperm.xlu1 %3439, %v2254_v39   ;;  %2271 = vperm.xlu0 %3440, %v2253_v24   ;;  %v2262_v25 = vmul.f32 %v2254_v39, %v2226_v63  ;;  %v3918_v39 = vmov 0.0  }
 0x5dc   :  { %3086 = vmatprep.subr.bf16.mxu1 %v3918_v39  ;;  %3090 = vmatprep.mubr.msk.bf16.mxu1 %vm3919_vm10, %v3918_v39 }
 0x5dd   :  { %v2266_v23 = vsub.f32 %v2258_v0, %v2262_v25 }
 0x5df   :  { %2317 = vperm.xlu1 %3439, %v2267_v33   ;;  %2307 = vperm.xlu0 %3440, %v2265_v61  }
 0x5e3   :  { %2322 = vperm.xlu1 %3439, %v2268_v12  }
 0x5e7   :  { %2312 = vperm.xlu1 %3439, %v2266_v23  }
 0x64a   :  { %v2282_v52 = vpop.permute.xlu1 %2281 }
 0x64b   :  { %v2299_v20 = vmul.f32 %v2282_v52, %v6796_v35 }
 0x652   :  { %v2287_v4 = vpop.permute.xlu0 %2286 }
 0x653   :  { %v2301_v63 = vmul.f32 %v2287_v4, %v6804_v49  ;;  %v2302_v42 = vmul.f32 %v2287_v4, %v6790_v53  ;;  %v2303_v45 = vmul.f32 %v2287_v4, %v6821_v54  ;;  %v2304_v16 = vmul.f32 %v2287_v4, %v6837_v44 }
 0x656   :  { %v2272_v14 = vpop.permute.xlu0 %2271  ;;  %v2277_v7 = vpop.permute.xlu1 %2276 }
 0x657   :  { %v2289_v1 = vmul.f32 %v2272_v14, %v6798_v48  ;;  %v2290_v47 = vmul.f32 %v2272_v14, %v6800_v11  ;;  %v2291_v50 = vmul.f32 %v2272_v14, %v6815_v21  ;;  %v2292_v48 = vmul.f32 %v2272_v14, %v6842_v31 }
 0x658   :  { %v2293_v41 = vmul.f32 %v2277_v7, %v6811_v58  ;;  %v2294_v27 = vmul.f32 %v2277_v7, %v6802_v5  ;;  %v2297_v21 = vmul.f32 %v2282_v52, %v6786_v15  ;;  %v2298_v31 = vmul.f32 %v2282_v52, %v6784_v9 }
 0x659   :  { %v2300_v15 = vmul.f32 %v2282_v52, %v6809_v36  ;;  %v2295_v36 = vmul.f32 %v2277_v7, %v6817_v51  ;;  %v2296_v2 = vmul.f32 %v2277_v7, %v6845_v43 }
 0x65a   :  { %v2308_v18 = vpop.permute.xlu0 %2307  ;;  %v2318_v19 = vpop.permute.xlu1 %2317 }
 0x65b   :  { %v6890_v26 = vadd.f32 %v2308_v18, %v2289_v1  ;;  %v6892_v13 = vadd.f32 %v2308_v18, %v2290_v47  ;;  %v6906_v49 = vadd.f32 %v2308_v18, %v2291_v50  ;;  %v6908_v53 = vadd.f32 %v2308_v18, %v2292_v48 }
 0x65c   :  { %v6918_v58 = vadd.f32 %v2318_v19, %v2297_v21  ;;  %v6920_v5 = vadd.f32 %v2318_v19, %v2298_v31  ;;  %v6928_v9 = vadd.f32 %v2318_v19, %v2299_v20  ;;  %v6930_v46 = vadd.f32 %v2318_v19, %v2300_v15 }
 0x65d   :  { %v2341_v56 = vadd.f32 %v6892_v13, %v6890_v26  ;;  %v2357_v32 = vadd.f32 %v6908_v53, %v6906_v49  ;;  %v3920_v21 = vmov 1  }
 0x65e   :  { %v2323_v37 = vpop.permute.xlu1 %2322  ;;  %v2347_v8 = vadd.f32 %v6920_v5, %v6918_v58  ;;  %v2363_v35 = vadd.f32 %v6930_v46, %v6928_v9  ;;  %3761 = vset.pattern.permute.xlu0 %v3920_v21 }
 0x65f   :  { %v6900_v34 = vadd.f32 %v2323_v37, %v2301_v63  ;;  %v6902_v11 = vadd.f32 %v2323_v37, %v2302_v42  ;;  %2342 = vadd.xlane.f32.xlu1 %v2341_v56  ;;  %v6936_v17 = vadd.f32 %v2323_v37, %v2303_v45  ;;  %v6938_v6 = vadd.f32 %v2323_v37, %v2304_v16  ;;  %v2380_v63 = vld [vmem:[%s7040_s9] sm:$0x3] }
 0x660   :  { %v3781_v42 = vld [vmem:[%s7041_s10] sm:$0xff]  }
 0x661   :  { %v2350_v29 = vadd.f32 %v6902_v11, %v6900_v34  ;;  %v2366_v54 = vadd.f32 %v6938_v6, %v6936_v17  ;;  %3096 = vmatprep.mubr.msk.bf16.mxu0 %vm2440_vm3, %v3781_v42 }
 0x662   :  { %v2313_v22 = vpop.permute.xlu1 %2312 }
 0x663   :  { %v6914_v59 = vadd.f32 %v2313_v22, %v2293_v41  ;;  %v6916_v40 = vadd.f32 %v2313_v22, %v2294_v27  ;;  %2351 = vadd.xlane.f32.xlu1 %v2350_v29  ;;  %v6944_v24 = vadd.f32 %v2313_v22, %v2295_v36  ;;  %v6946_v38 = vadd.f32 %v2313_v22, %v2296_v2  ;;  %v3782_v29 = vld [vmem:[%s7041_s10 + $0x8] sm:$0xff]  }
 0x665   :  { %v2344_v10 = vadd.f32 %v6916_v40, %v6914_v59  ;;  %v2360_v44 = vadd.f32 %v6946_v38, %v6944_v24 }
 0x667   :  { %2358 = vadd.xlane.f32.xlu1 %v2357_v32  ;;  %2345 = vadd.xlane.f32.xlu0 %v2344_v10 }
 0x66b   :  { %2348 = vadd.xlane.f32.xlu0 %v2347_v8 }
 0x66f   :  { %2364 = vadd.xlane.f32.xlu0 %v2363_v35 }
 0x673   :  { %2367 = vadd.xlane.f32.xlu0 %v2366_v54 }
 0x677   :  { %2361 = vadd.xlane.f32.xlu0 %v2360_v44 }
 0x6e8   :  { %v2343_v51 = vpop.xlane.xlu1 %2342 }
 0x6e9   :  { %v2353_v14 = vmul.f32 0.00390625, %v2343_v51 }
 0x6ec   :  { %v2352_v30 = vpop.xlane.xlu1 %2351 }
 0x6ed   :  { %v2356_v60 = vmul.f32 0.00390625, %v2352_v30 }
 0x6f0   :  { %v2346_v62 = vpop.xlane.xlu0 %2345  ;;  %v2359_v33 = vpop.xlane.xlu1 %2358 }
 0x6f1   :  { %v2369_v25 = vmul.f32 0.00390625, %v2359_v33  ;;  %v2354_v7 = vmul.f32 0.00390625, %v2346_v62 }
 0x6f3   :  { %v2374_v47 = vsel %vm2373_vm14, %v2353_v14, %v2369_v25  ;;  %v3831_v25 = vld [vmem:[%s7031_s0 + $0x20] sm:$0xff] }
 0x6f4   :  { %v2349_v43 = vpop.xlane.xlu0 %2348 }
 0x6f5   :  { %v2355_v57 = vmul.f32 0.00390625, %v2349_v43 }
 0x6f8   :  { %v2365_v3 = vpop.xlane.xlu0 %2364 }
 0x6f9   :  { %v2371_v55 = vmul.f32 0.00390625, %v2365_v3 }
 0x6fb   :  { %v2376_v0 = vsel %vm2373_vm14, %v2355_v57, %v2371_v55  ;;  %v3072_v57 = vld [vmem:[%s7031_s0 + $0x40] sm:$0xff] }
 0x6fc   :  { %v2368_v61 = vpop.xlane.xlu0 %2367 }
 0x6fd   :  { %v2372_v12 = vmul.f32 0.00390625, %v2368_v61 }
 0x6ff   :  { %v2377_v23 = vsel %vm2373_vm14, %v2356_v60, %v2372_v12 }
 0x700   :  { %v2379_v52 = vpack.c.bf16 %v2377_v23, %v2376_v0  ;;  %v2362_v4 = vpop.xlane.xlu0 %2361 }
 0x701   :  { %v2370_v1 = vmul.f32 0.00390625, %v2362_v4 }
 0x702   :  { %3087 = vmatpush3.bf16.msra.mxu1 %v2379_v52 }
 0x703   :  { %v2375_v18 = vsel %vm2373_vm14, %v2354_v7, %v2370_v1  ;;  %3088 = vmatprep.subr.bf16.mxu1 %v3918_v39 }
 0x704   :  { %v2378_v19 = vpack.c.bf16 %v2375_v18, %v2374_v47 }
 0x706   :  { %3089 = vmatpush3.bf16.msra.mxu1 %v2378_v19 }
 0x709   :  { %3091 = vmatmul.mubr.msk.bf16.vlgmr.msra.gmra.mxu1 %vm7782_vm9, %v2380_v63 }
 0x7c9   :  { %v2418_v56 = vpop.f32.mrf.mxu1 }
 0x7ca   :  { %v2424_v37 = vmax.f32 %v2418_v56, 0.0 }
 0x7cb   :  { %v3092_v50 = vpop.f32.mrf.mxu1 }
 0x7cc   :  { %v2429_v48 = vpack.c.bf16 %v2424_v37, %v2424_v37 }
 0x7cd   :  { %v2421_v41 = vpop.f32.mrf.mxu1 }
 0x7ce   :  { %v2449_v27 = vsel %vm2447_vm5, %v2429_v48, 0  ;;  %3100 = vmatprep.subr.msk.bf16.mxu0 %vm2447_vm5, %v2429_v48 }
 0x7cf   :  { %v3093_v22 = vpop.f32.mrf.mxu1  ;;  %3095 = vmatpush3.bf16.msra.mxu0 %v2449_v27 }
 0x7d2   :  { %3097 = vmatmul.mubr.msk.bf16.vlgmr.msra.gmra.mxu0 %vm2440_vm3, %v3782_v29 }
 0x892   :  { %v3098_v31 = vpop.f32.mrf.mxu0 }
 0x893   :  { %v3070_v32 = vmul.f32 -1.442695, %v3098_v31 }
 0x894   :  { %v2485_v10 = vpop.f32.mrf.mxu0 }
 0x895   :  { %3799 = vpow2.f32 %v3070_v32  ;;  %v3068_v20 = vmul.f32 -1.442695, %v2485_v10 }
 0x896   :  { %v3099_v15 = vpop.f32.mrf.mxu0 }
 0x897   :  { %3801 = vpow2.f32 %v3068_v20  ;;  %v3071_v8 = vmul.f32 -1.442695, %v3099_v15 }
 0x898   :  { %v2488_v45 = vpop.f32.mrf.mxu0 }
 0x899   :  { %3803 = vpow2.f32 %v3071_v8  ;;  %v3069_v16 = vmul.f32 -1.442695, %v2488_v45  ;;  %v3078_v8 = vld [vmem:[%s7031_s0 + $0x70] sm:$0xff]  ;;  %v3079_v45 = vld [vmem:[%s7031_s0 + $0x78] sm:$0xff] }
 0x89b   :  { %3805 = vpow2.f32 %v3069_v16 }
 0x8a2   :  { %v3800_v35 = vpop.eup %3799 }
 0x8a3   :  { %v2514_v36 = vadd.f32 1.0, %v3800_v35 }
 0x8a4   :  { %v3802_v2 = vpop.eup %3801 }
 0x8a5   :  { %3807 = vrcp.f32 %v2514_v36  ;;  %v2512_v54 = vadd.f32 1.0, %v3802_v2 }
 0x8a6   :  { %v3804_v44 = vpop.eup %3803 }
 0x8a7   :  { %3809 = vrcp.f32 %v2512_v54  ;;  %v2515_v51 = vadd.f32 1.0, %v3804_v44  ;;  %v3074_v44 = vld [vmem:[%s7031_s0 + $0x50] sm:$0xff] }
 0x8a8   :  { %v3806_v39 = vpop.eup %3805 }
 0x8a9   :  { %v2513_v62 = vadd.f32 1.0, %v3806_v39  ;;  %v3075_v39 = vld [vmem:[%s7031_s0 + $0x58] sm:$0xff] }
 0x8ab   :  { %3811 = vrcp.f32 %v2513_v62 }
 0x8ac   :  { %3813 = vrcp.f32 %v2515_v51 }
 0x8b2   :  { %v3808_v43 = vpop.eup %3807 }
 0x8b3   :  { %2536 = vperm.xlu1 %3439, %v3808_v43  }
 0x8b4   :  { %v3810_v30 = vpop.eup %3809 }
 0x8b5   :  { %2577 = vperm.xlu0 %3761, %v3810_v30  }
 0x8b7   :  { %2526 = vperm.xlu1 %3439, %v3810_v30  }
 0x8b8   :  { %v3812_v3 = vpop.eup %3811 }
 0x8b9   :  { %3762 = vset.pattern.permute.xlu0 %v7307_v28  ;;  %v3814_v55 = vpop.eup %3813  ;;  %v3073_v28 = vld [vmem:[%s7031_s0 + $0x48] sm:$0xff] }
 0x8ba   :  { %2531 = vperm.xlu0 %3762, %v3812_v3  }
 0x8bb   :  { %2541 = vperm.xlu1 %3439, %v3814_v55  }
 0x8be   :  { %3764 = vset.pattern.permute.xlu0 %v3920_v21 }
 0x8bf   :  { %3763 = vset.pattern.permute.xlu1 %v3920_v21  ;;  %2589 = vperm.xlu0 %3764, %v3814_v55   ;;  %v3835_v21 = vld [vmem:[%s7031_s0 + $0x10] sm:$0xff] }
 0x8c0   :  { %2581 = vperm.xlu1 %3763, %v3812_v3  }
 0x8c4   :  { %2585 = vperm.xlu1 %3763, %v3808_v43  }
 0x92e   :  { %v2537_v33 = vpop.permute.xlu1 %2536 }
 0x92f   :  { %v2548_v61 = vmul.f32 %v2537_v33, %v6918_v58  ;;  %v2549_v60 = vmul.f32 %v2537_v33, %v6920_v5  ;;  %v3832_v58 = vld [vmem:[%s7031_s0 + $0x28] sm:$0xff] }
 0x930   :  { %v2578_v12 = vpop.permute.xlu0 %2577 }
 0x931   :  { %v2556_v0 = vadd.f32 %v3831_v25, %v2548_v61  ;;  %v2557_v23 = vadd.f32 %v3832_v58, %v2549_v60  ;;  %v2592_v5 = vmul.f32 %v2578_v12, %v6906_v49  ;;  %v2593_v52 = vmul.f32 %v2578_v12, %v6908_v53  ;;  %v3833_v49 = vld [vmem:[%s7031_s0] sm:$0xff]  ;;  %v3834_v53 = vld [vmem:[%s7031_s0 + $0x8] sm:$0xff] }
 0x932   :  { %v2527_v4 = vpop.permute.xlu1 %2526  ;;  %v3076_v61 = vld [vmem:[%s7031_s0 + $0x60] sm:$0xff]  ;;  %v3077_v60 = vld [vmem:[%s7031_s0 + $0x68] sm:$0xff] }
 0x933   :  { %v2564_v14 = vmax.f32 %v2556_v0, 0.0  ;;  %v2565_v7 = vmax.f32 %v2557_v23, 0.0  ;;  %v2608_v1 = vadd.f32 %v3072_v57, %v2592_v5  ;;  %v2609_v47 = vadd.f32 %v3073_v28, %v2593_v52 }
 0x934   :  { %v2544_v18 = vmul.f32 %v2527_v4, %v6890_v26  ;;  %v2545_v19 = vmul.f32 %v2527_v4, %v6892_v13 }
 0x935   :  { %2572 = vst [vmem:[#allocation7 + $0x20] sm:$0xff] %v2564_v14  ;;  %2573 = vst [vmem:[#allocation7 + $0x28] sm:$0xff] %v2565_v7  ;;  %v2616_v63 = vmax.f32 %v2608_v1, 0.0  ;;  %v2617_v42 = vmax.f32 %v2609_v47, 0.0  ;;  %v2532_v56 = vpop.permute.xlu0 %2531 }
 0x936   :  { %v2552_v37 = vadd.f32 %v3833_v49, %v2544_v18  ;;  %v2553_v50 = vadd.f32 %v3834_v53, %v2545_v19  ;;  %v2546_v48 = vmul.f32 %v2532_v56, %v6914_v59  ;;  %v2547_v26 = vmul.f32 %v2532_v56, %v6916_v40  ;;  %v2542_v13 = vpop.permute.xlu1 %2541  ;;  %v3836_v59 = vld [vmem:[%s7031_s0 + $0x18] sm:$0xff]  ;;  %v3837_v40 = vld [vmem:[%s7031_s0 + $0x30] sm:$0xff] }
 0x937   :  { %2625 = vst [vmem:[#allocation7 + $0x40] sm:$0xff] %v2616_v63  ;;  %2626 = vst [vmem:[#allocation7 + $0x48] sm:$0xff] %v2617_v42  ;;  %v2550_v41 = vmul.f32 %v2542_v13, %v6900_v34  ;;  %v2551_v27 = vmul.f32 %v2542_v13, %v6902_v11  ;;  %v3838_v34 = vld [vmem:[%s7031_s0 + $0x38] sm:$0xff]  ;;  %s3879_s0 = scalar_lea.vmem %s2639_s30, 2048 }
 0x938   :  { %v2560_v29 = vmax.f32 %v2552_v37, 0.0  ;;  %v2561_v22 = vmax.f32 %v2553_v50, 0.0  ;;  %v2554_v31 = vadd.f32 %v3835_v21, %v2546_v48  ;;  %v2555_v32 = vadd.f32 %v3836_v59, %v2547_v26  ;;  %p3880_p10 = scmp.ne.s32.totalorder %s2639_s30, %s3879_s0  ;;  %p3885_p12 = scmp.lt.s32.totalorder %s3879_s0, %s3879_s0 }
 0x939   :  { %v2558_v10 = vadd.f32 %v3837_v40, %v2550_v41  ;;  %v2559_v11 = vadd.f32 %v3838_v34, %v2551_v27 }
 0x93a   :  { %2568 = vst [vmem:[#allocation7] sm:$0xff] %v2560_v29  ;;  %2569 = vst [vmem:[#allocation7 + $0x8] sm:$0xff] %v2561_v22  ;;  %v2562_v20 = vmax.f32 %v2554_v31, 0.0  ;;  %v2563_v15 = vmax.f32 %v2555_v32, 0.0  ;;  %v2590_v16 = vpop.permute.xlu0 %2589  ;;  %p3886_p13 = por %p3885_p12, %p3884_p11 }
 0x93b   :  { %v2566_v35 = vmax.f32 %v2558_v10, 0.0  ;;  %v2567_v36 = vmax.f32 %v2559_v11, 0.0  ;;  %v2598_v2 = vmul.f32 %v2590_v16, %v6936_v17  ;;  %v2599_v54 = vmul.f32 %v2590_v16, %v6938_v6  ;;  %v2582_v51 = vpop.permute.xlu1 %2581 }
 0x93c   :  { %2570 = vst [vmem:[#allocation7 + $0x10] sm:$0xff] %v2562_v20  ;;  %2571 = vst [vmem:[#allocation7 + $0x18] sm:$0xff] %v2563_v15  ;;  %v2594_v62 = vmul.f32 %v2582_v51, %v6944_v24  ;;  %v2595_v43 = vmul.f32 %v2582_v51, %v6946_v38  ;;  %p3887_p0 = pnand %p3886_p13, %p3880_p10 }
 0x93d   :  { %2574 = vst [vmem:[#allocation7 + $0x30] sm:$0xff] %v2566_v35  ;;  %2575 = vst [vmem:[#allocation7 + $0x38] sm:$0xff] %v2567_v36  ;;  %v2614_v17 = vadd.f32 %v3078_v8, %v2598_v2  ;;  %v2615_v30 = vadd.f32 %v3079_v45, %v2599_v54 }
 0x93e   :  { %v2610_v6 = vadd.f32 %v3074_v44, %v2594_v62  ;;  %v2611_v3 = vadd.f32 %v3075_v39, %v2595_v43 }
 0x93f   :  { %v2622_v55 = vmax.f32 %v2614_v17, 0.0  ;;  %v2623_v33 = vmax.f32 %v2615_v30, 0.0  ;;  %v2586_v57 = vpop.permute.xlu1 %2585 }
 0x940   :  { %v2618_v24 = vmax.f32 %v2610_v6, 0.0  ;;  %v2619_v28 = vmax.f32 %v2611_v3, 0.0  ;;  %v2596_v38 = vmul.f32 %v2586_v57, %v6928_v9  ;;  %v2597_v12 = vmul.f32 %v2586_v57, %v6930_v46 }
 0x941   :  { %2631 = vst [vmem:[#allocation7 + $0x70] sm:$0xff] %v2622_v55  ;;  %2632 = vst [vmem:[#allocation7 + $0x78] sm:$0xff] %v2623_v33 }
 0x942   :  { %2627 = vst [vmem:[#allocation7 + $0x50] sm:$0xff] %v2618_v24  ;;  %2628 = vst [vmem:[#allocation7 + $0x58] sm:$0xff] %v2619_v28  ;;  %v2612_v25 = vadd.f32 %v3076_v61, %v2596_v38  ;;  %v2613_v0 = vadd.f32 %v3077_v60, %v2597_v12 }
 0x944   :  { %v2620_v58 = vmax.f32 %v2612_v25, 0.0  ;;  %v2621_v23 = vmax.f32 %v2613_v0, 0.0 }
 0x946   :  { %2629 = vst [vmem:[#allocation7 + $0x60] sm:$0xff] %v2620_v58  ;;  %2630 = vst [vmem:[#allocation7 + $0x68] sm:$0xff] %v2621_v23 }
 0x947   :  { %3890 = shalt.err (!%p3887_p0)
}
 0x948   :  { %s3922_s5 = smov 256  }
 0x949   :  { %2644 = dma.vmem_to_hbm [thread:$0]  %s2639_s30, 2048, %s7042_s11, [#allocation4], %s3922_s5, %s3922_s5, %s3913_s22  }
 0x94a   :  { %3903 = dma.done.wait [#allocation4], 2048  }
 0x94b   :  { %3904 = vsyncadd [#allocation4], 4294965248 }
 0x94c   :  { %2648 = vsyncpa [#allocation3], 1 }
 0x94d   :  { %2649 = vsyncpa [#allocation6], 1 }
 0x94e   :  { %2650 = vsyncpa [#allocation4], 1 }

</bundles_post_ra>
